<compile_context>
chip_gen: v7x
topology: tpu7x:2x2x1
jax: 0.10.0
libtpu: 0.0.40
codegen_flags: <defaults>
</compile_context>

<pallas_src>
import functools

import jax
import jax.numpy as jnp
from jax.experimental import pallas as pl
from jax.experimental.pallas import tpu as pltpu


def _round_up(x, m):
    return (x + m - 1) // m * m


def _vmem_limit_bytes(frac=0.8):
    """Generation-aware VMEM limit (~80% of capacity, never the full physical VMEM)."""
    try:
        cap = int(pltpu.get_tpu_info().vmem_capacity_bytes)
    except Exception:                      # emulator / missing field -> assume 128 MiB part
        cap = 128 * 1024 * 1024
    return max(32 * 1024 * 1024, int(cap * frac))


# ---------------------------------------------------------------------------
# Pallas kernel: shifted-tap conv matmul + BN scale/bias + ReLU (f32 epilogue)
# ---------------------------------------------------------------------------
def _convbnrelu_kernel(x_ref, w_ref, s_ref, b_ref, o_ref, *, tm, wp, ks, extra):
    # x_ref : (1, M_in, Cin)    f32   whole padded image (VMEM-resident across j/m)
    # w_ref : (ks*ks, Cin, tcn) bf16  conv taps (scale-free)
    # s_ref : (1, tcn)          f32   BN scale  gamma / sqrt(var + eps)
    # b_ref : (1, tcn)          f32   BN bias   beta - mean * scale
    # o_ref : (1, tm, tcn)            output tile
    base = pl.multiple_of(pl.program_id(2) * tm, 8)
    acc = None
    for kh in range(ks):
        # 8-aligned dynamic slice of the resident image (wp and tm are multiples of 8).
        start = pl.multiple_of(base + kh * wp, 8)
        xw = x_ref[0, pl.ds(start, tm + extra), :]            # (tm+extra, Cin) f32
        for kw in range(ks):
            xs = xw[kw:kw + tm, :].astype(jnp.bfloat16)       # static shift + bf16 cast
            part = jnp.dot(xs, w_ref[kh * ks + kw],
                           preferred_element_type=jnp.float32)
            acc = part if acc is None else acc + part         # MRB-friendly acc chain (v7x)
    y = acc * s_ref[...] + b_ref[...]                         # BN applied in f32 epilogue
    o_ref[...] = jnp.maximum(y, 0.0)[None].astype(o_ref.dtype)


# ---------------------------------------------------------------------------
# ConvBNReLU forward (wrapper: layout, padding, BN prep, tiling)
# ---------------------------------------------------------------------------
def conv_bn_relu(x, weight, gamma, beta, running_mean, running_var,
                 *, stride=1, padding=1, eps=1e-5,
                 tm_max=256, acc_bytes_max=128 * 1024, image_buffers=1):
    """x: (N, Cin, H, W); weight: (Cout, Cin, ks, ks). Returns (N, Cout, Hout, Wout)."""
    N, Cin, H, W = x.shape
    Cout, _, ks, _ = weight.shape
    if stride != 1:
        raise NotImplementedError("only stride=1 is implemented")  # TODO(synk)

    Hp = H + 2 * padding
    Wp = W + 2 * padding
    Hout = Hp - ks + 1
    Wout = Wp - ks + 1
    Wp8 = _round_up(Wp, 8)        # pad width so row shifts stay 8-aligned

    # ---- tiling plan -------------------------------------------------------
    Cout_pad = _round_up(Cout, 128)
    tcn = 256 if Cout_pad % 256 == 0 else 128          # lane-dense, never over-pads Cout

    M_out = Hout * Wp8            # output rows computed "wide"; extra cols dropped later
    # Cap the f32 accumulator tile at acc_bytes_max (default 128 KiB = 32 vregs) so the
    # 9-tap accumulation never spills to VMEM, then rebalance tiles to avoid padded rows.
    tm_cap = max(8, (acc_bytes_max // (tcn * 4)) // 8 * 8)
    tm = min(tm_max, tm_cap, _round_up(M_out, 8))
    n_m = -(-M_out // tm)
    tm = _round_up(-(-M_out // n_m), 8)
    M_pad = n_m * tm
    extra = _round_up(ks - 1, 8)  # halo rows over-read per tile

    # ---- activation: NHWC, zero-pad, flatten spatial (single pad/copy) ------
    rows_needed = M_pad + (ks - 1) * Wp8 + extra
    extra_rows = max(1, -(-(rows_needed - Hp * Wp8) // Wp8))
    M_in = (Hp + extra_rows) * Wp8
    x_nhwc = jnp.transpose(x, (0, 2, 3, 1)).astype(jnp.float32)
    xp = jnp.pad(x_nhwc, ((0, 0),
                          (padding, padding + extra_rows),
                          (padding, padding + Wp8 - Wp),
                          (0, 0)))
    x_flat = xp.reshape(N, M_in, Cin)

    # ---- BN (inference): scale-free bf16 weights, f32 scale/bias in epilogue -
    scale = gamma / jnp.sqrt(running_var + eps)                # (Cout,)
    bias = beta - running_mean * scale                         # (Cout,)
    w_taps = jnp.transpose(weight, (2, 3, 1, 0)).reshape(ks * ks, Cin, Cout)
    w_taps = jnp.pad(w_taps, ((0, 0), (0, 0), (0, Cout_pad - Cout))).astype(jnp.bfloat16)
    scale_p = jnp.pad(scale, (0, Cout_pad - Cout)).reshape(1, Cout_pad).astype(jnp.float32)
    bias_p = jnp.pad(bias, (0, Cout_pad - Cout)).reshape(1, Cout_pad).astype(jnp.float32)

    kernel = functools.partial(_convbnrelu_kernel, tm=tm, wp=Wp8, ks=ks, extra=extra)

    # Single-buffer the resident image: its block index only changes with the batch
    # axis, so the default double buffer only duplicated the dominant VMEM slab.
    img_kwargs = {}
    if image_buffers == 1:
        img_kwargs["pipeline_mode"] = pl.Buffered(1)
    img_spec = pl.BlockSpec((1, M_in, Cin), lambda b, j, m: (b, 0, 0), **img_kwargs)

    out_flat = pl.pallas_call(
        kernel,
        out_shape=jax.ShapeDtypeStruct((N, M_pad, Cout_pad), jnp.float32),
        grid_spec=pltpu.PrefetchScalarGridSpec(
            num_scalar_prefetch=0,
            grid=(N, Cout_pad // tcn, M_pad // tm),   # batch outermost (megacore-friendly)
            in_specs=[
                img_spec,                                              # resident image
                pl.BlockSpec((ks * ks, Cin, tcn), lambda b, j, m: (0, 0, j)),
                pl.BlockSpec((1, tcn), lambda b, j, m: (0, j)),        # BN scale
                pl.BlockSpec((1, tcn), lambda b, j, m: (0, j)),        # BN bias
            ],
            out_specs=pl.BlockSpec((1, tm, tcn), lambda b, j, m: (b, m, j)),
        ),
        compiler_params=pltpu.CompilerParams(
            dimension_semantics=("parallel", "parallel", "parallel"),
            vmem_limit_bytes=_vmem_limit_bytes(),
        ),
    )(x_flat, w_taps, scale_p, bias_p)

    # (N, M_pad, Cout_pad) -> (N, Hout, Wout, Cout) -> NCHW
    out = out_flat[:, :M_out, :Cout].reshape(N, Hout, Wp8, Cout)[:, :, :Wout, :]
    return jnp.transpose(out, (0, 3, 1, 2))


# ---------------------------------------------------------------------------
# Deterministic parameter init (mirrors the PyTorch __init__ / init_weight)
# ---------------------------------------------------------------------------
def init_params(key, in_chan, out_chan, ks=3):
    # kaiming_normal_(a=1): gain = sqrt(2 / (1 + 1^2)) = 1, fan_in = Cin*ks*ks
    fan_in = in_chan * ks * ks
    std = 1.0 / jnp.sqrt(jnp.float32(fan_in))
    weight = jax.random.normal(key, (out_chan, in_chan, ks, ks), jnp.float32) * std
    gamma = jnp.ones((out_chan,), jnp.float32)
    beta = jnp.zeros((out_chan,), jnp.float32)
    running_mean = jnp.zeros((out_chan,), jnp.float32)
    running_var = jnp.ones((out_chan,), jnp.float32)
    return weight, gamma, beta, running_mean, running_var


if __name__ == "__main__":
    key = jax.random.PRNGKey(0)
    k_x, k_w = jax.random.split(key)

    N, Cin, H, W = 2, 4, 16, 16
    Cout, ks, stride, padding = 8, 3, 1, 1

    x = jax.random.normal(k_x, (N, Cin, H, W), jnp.float32)
    weight, gamma, beta, rmean, rvar = init_params(k_w, Cin, Cout, ks)

    fwd = jax.jit(functools.partial(conv_bn_relu, stride=stride, padding=padding))
    try:
        out = jax.block_until_ready(fwd(x, weight, gamma, beta, rmean, rvar))
    except Exception:
        # Fallback: if this Pallas build rejects single-buffering via pl.Buffered(1),
        # rerun with the default double-buffered resident image (same math).
        fwd = jax.jit(functools.partial(conv_bn_relu, stride=stride, padding=padding,
                                        image_buffers=2))
        out = jax.block_until_ready(fwd(x, weight, gamma, beta, rmean, rvar))

    # Pure-JAX reference (no Pallas).
    ref_conv = jax.lax.conv_general_dilated(
        x, weight, window_strides=(stride, stride),
        padding=[(padding, padding), (padding, padding)],
        dimension_numbers=("NCHW", "OIHW", "NCHW"),
    )
    scale = gamma / jnp.sqrt(rvar + 1e-5)
    ref = jnp.maximum(ref_conv * scale[None, :, None, None]
                      + (beta - rmean * scale)[None, :, None, None], 0.0)

    assert out.shape == (N, Cout, H, W), out.shape
    # bf16 MXU operands (f32 accumulation) -> slightly looser tolerance vs f32 ref.
    assert jnp.allclose(out, ref, atol=2e-2, rtol=2e-2), \
        float(jnp.max(jnp.abs(out - ref)))

    print("KERNEL_OK")
</pallas_src>

<mosaic_0001>
module attributes {stable_mosaic.version = 11 : i64} {
  func.func @_convbnrelu_kernel(%arg0: i32, %arg1: i32, %arg2: i32, %arg3: memref<1x456x4xf32, #tpu.memory_space<vmem>>, %arg4: memref<9x4x128xbf16, #tpu.memory_space<vmem>>, %arg5: memref<1x128xf32, #tpu.memory_space<vmem>>, %arg6: memref<1x128xf32, #tpu.memory_space<vmem>>, %arg7: memref<1x192x128xf32, #tpu.memory_space<vmem>>) attributes {dimension_semantics = [#tpu.dimension_semantics<parallel>, #tpu.dimension_semantics<parallel>, #tpu.dimension_semantics<parallel>], iteration_bounds = array<i64: 2, 1, 2>, scalar_prefetch = 0 : i64, scratch_operands = 0 : i64, tpu.core_type = #tpu.core_type<tc>, window_params = [{pipeline_mode = #tpu.pipeline_mode<synchronous>, transform_indices = @transform_0, window_bounds = array<i64: 1, 456, 4>}, {transform_indices = @transform_1, window_bounds = array<i64: 9, 4, 128>}, {transform_indices = @transform_2, window_bounds = array<i64: 1, 128>}, {transform_indices = @transform_3, window_bounds = array<i64: 1, 128>}, {transform_indices = @transform_4, window_bounds = array<i64: 1, 192, 128>}]} {
    %c192_i32 = arith.constant 192 : i32
    %0 = arith.muli %arg2, %c192_i32 : i32
    %1 = tpu.assume_multiple %0, 8 : i32
    %c0_i32 = arith.constant 0 : i32
    %2 = arith.addi %1, %c0_i32 : i32
    %3 = tpu.assume_multiple %2, 8 : i32
    %c0 = arith.constant 0 : index
    %4 = arith.index_cast %3 : i32 to index
    %c0_0 = arith.constant 0 : index
    %5 = vector.load %arg3[%c0, %4, %c0_0] : memref<1x456x4xf32, #tpu.memory_space<vmem>>, vector<1x200x4xf32>
    %6 = vector.shape_cast %5 : vector<1x200x4xf32> to vector<200x4xf32>
    %7 = vector.extract_strided_slice %6 {offsets = [0, 0], sizes = [192, 4], strides = [1, 1]} : vector<200x4xf32> to vector<192x4xf32>
    %8 = arith.truncf %7 : vector<192x4xf32> to vector<192x4xbf16>
    %c0_1 = arith.constant 0 : index
    %c0_2 = arith.constant 0 : index
    %c0_3 = arith.constant 0 : index
    %9 = vector.load %arg4[%c0_1, %c0_2, %c0_3] : memref<9x4x128xbf16, #tpu.memory_space<vmem>>, vector<1x4x128xbf16>
    %10 = vector.shape_cast %9 : vector<1x4x128xbf16> to vector<4x128xbf16>
    %cst = arith.constant dense<0.000000e+00> : vector<192x128xf32>
    %11 = tpu.matmul %8, %10, %cst {dimension_numbers = #tpu.dot_dimension_numbers<[1], [0], [0], [1], [0, 0, 1, 1], [], []>} : vector<192x4xbf16>, vector<4x128xbf16>, vector<192x128xf32> -> vector<192x128xf32>
    %12 = vector.extract_strided_slice %6 {offsets = [1, 0], sizes = [192, 4], strides = [1, 1]} : vector<200x4xf32> to vector<192x4xf32>
    %13 = arith.truncf %12 : vector<192x4xf32> to vector<192x4xbf16>
    %c1 = arith.constant 1 : index
    %c0_4 = arith.constant 0 : index
    %c0_5 = arith.constant 0 : index
    %14 = vector.load %arg4[%c1, %c0_4, %c0_5] : memref<9x4x128xbf16, #tpu.memory_space<vmem>>, vector<1x4x128xbf16>
    %15 = vector.shape_cast %14 : vector<1x4x128xbf16> to vector<4x128xbf16>
    %cst_6 = arith.constant dense<0.000000e+00> : vector<192x128xf32>
    %16 = tpu.matmul %13, %15, %cst_6 {dimension_numbers = #tpu.dot_dimension_numbers<[1], [0], [0], [1], [0, 0, 1, 1], [], []>} : vector<192x4xbf16>, vector<4x128xbf16>, vector<192x128xf32> -> vector<192x128xf32>
    %17 = arith.addf %11, %16 : vector<192x128xf32>
    %18 = vector.extract_strided_slice %6 {offsets = [2, 0], sizes = [192, 4], strides = [1, 1]} : vector<200x4xf32> to vector<192x4xf32>
    %19 = arith.truncf %18 : vector<192x4xf32> to vector<192x4xbf16>
    %c2 = arith.constant 2 : index
    %c0_7 = arith.constant 0 : index
    %c0_8 = arith.constant 0 : index
    %20 = vector.load %arg4[%c2, %c0_7, %c0_8] : memref<9x4x128xbf16, #tpu.memory_space<vmem>>, vector<1x4x128xbf16>
    %21 = vector.shape_cast %20 : vector<1x4x128xbf16> to vector<4x128xbf16>
    %cst_9 = arith.constant dense<0.000000e+00> : vector<192x128xf32>
    %22 = tpu.matmul %19, %21, %cst_9 {dimension_numbers = #tpu.dot_dimension_numbers<[1], [0], [0], [1], [0, 0, 1, 1], [], []>} : vector<192x4xbf16>, vector<4x128xbf16>, vector<192x128xf32> -> vector<192x128xf32>
    %23 = arith.addf %17, %22 : vector<192x128xf32>
    %c24_i32 = arith.constant 24 : i32
    %24 = arith.addi %1, %c24_i32 : i32
    %25 = tpu.assume_multiple %24, 8 : i32
    %c0_10 = arith.constant 0 : index
    %26 = arith.index_cast %25 : i32 to index
    %c0_11 = arith.constant 0 : index
    %27 = vector.load %arg3[%c0_10, %26, %c0_11] : memref<1x456x4xf32, #tpu.memory_space<vmem>>, vector<1x200x4xf32>
    %28 = vector.shape_cast %27 : vector<1x200x4xf32> to vector<200x4xf32>
    %29 = vector.extract_strided_slice %28 {offsets = [0, 0], sizes = [192, 4], strides = [1, 1]} : vector<200x4xf32> to vector<192x4xf32>
    %30 = arith.truncf %29 : vector<192x4xf32> to vector<192x4xbf16>
    %c3 = arith.constant 3 : index
    %c0_12 = arith.constant 0 : index
    %c0_13 = arith.constant 0 : index
    %31 = vector.load %arg4[%c3, %c0_12, %c0_13] : memref<9x4x128xbf16, #tpu.memory_space<vmem>>, vector<1x4x128xbf16>
    %32 = vector.shape_cast %31 : vector<1x4x128xbf16> to vector<4x128xbf16>
    %cst_14 = arith.constant dense<0.000000e+00> : vector<192x128xf32>
    %33 = tpu.matmul %30, %32, %cst_14 {dimension_numbers = #tpu.dot_dimension_numbers<[1], [0], [0], [1], [0, 0, 1, 1], [], []>} : vector<192x4xbf16>, vector<4x128xbf16>, vector<192x128xf32> -> vector<192x128xf32>
    %34 = arith.addf %23, %33 : vector<192x128xf32>
    %35 = vector.extract_strided_slice %28 {offsets = [1, 0], sizes = [192, 4], strides = [1, 1]} : vector<200x4xf32> to vector<192x4xf32>
    %36 = arith.truncf %35 : vector<192x4xf32> to vector<192x4xbf16>
    %c4 = arith.constant 4 : index
    %c0_15 = arith.constant 0 : index
    %c0_16 = arith.constant 0 : index
    %37 = vector.load %arg4[%c4, %c0_15, %c0_16] : memref<9x4x128xbf16, #tpu.memory_space<vmem>>, vector<1x4x128xbf16>
    %38 = vector.shape_cast %37 : vector<1x4x128xbf16> to vector<4x128xbf16>
    %cst_17 = arith.constant dense<0.000000e+00> : vector<192x128xf32>
    %39 = tpu.matmul %36, %38, %cst_17 {dimension_numbers = #tpu.dot_dimension_numbers<[1], [0], [0], [1], [0, 0, 1, 1], [], []>} : vector<192x4xbf16>, vector<4x128xbf16>, vector<192x128xf32> -> vector<192x128xf32>
    %40 = arith.addf %34, %39 : vector<192x128xf32>
    %41 = vector.extract_strided_slice %28 {offsets = [2, 0], sizes = [192, 4], strides = [1, 1]} : vector<200x4xf32> to vector<192x4xf32>
    %42 = arith.truncf %41 : vector<192x4xf32> to vector<192x4xbf16>
    %c5 = arith.constant 5 : index
    %c0_18 = arith.constant 0 : index
    %c0_19 = arith.constant 0 : index
    %43 = vector.load %arg4[%c5, %c0_18, %c0_19] : memref<9x4x128xbf16, #tpu.memory_space<vmem>>, vector<1x4x128xbf16>
    %44 = vector.shape_cast %43 : vector<1x4x128xbf16> to vector<4x128xbf16>
    %cst_20 = arith.constant dense<0.000000e+00> : vector<192x128xf32>
    %45 = tpu.matmul %42, %44, %cst_20 {dimension_numbers = #tpu.dot_dimension_numbers<[1], [0], [0], [1], [0, 0, 1, 1], [], []>} : vector<192x4xbf16>, vector<4x128xbf16>, vector<192x128xf32> -> vector<192x128xf32>
    %46 = arith.addf %40, %45 : vector<192x128xf32>
    %c48_i32 = arith.constant 48 : i32
    %47 = arith.addi %1, %c48_i32 : i32
    %48 = tpu.assume_multiple %47, 8 : i32
    %c0_21 = arith.constant 0 : index
    %49 = arith.index_cast %48 : i32 to index
    %c0_22 = arith.constant 0 : index
    %50 = vector.load %arg3[%c0_21, %49, %c0_22] : memref<1x456x4xf32, #tpu.memory_space<vmem>>, vector<1x200x4xf32>
    %51 = vector.shape_cast %50 : vector<1x200x4xf32> to vector<200x4xf32>
    %52 = vector.extract_strided_slice %51 {offsets = [0, 0], sizes = [192, 4], strides = [1, 1]} : vector<200x4xf32> to vector<192x4xf32>
    %53 = arith.truncf %52 : vector<192x4xf32> to vector<192x4xbf16>
    %c6 = arith.constant 6 : index
    %c0_23 = arith.constant 0 : index
    %c0_24 = arith.constant 0 : index
    %54 = vector.load %arg4[%c6, %c0_23, %c0_24] : memref<9x4x128xbf16, #tpu.memory_space<vmem>>, vector<1x4x128xbf16>
    %55 = vector.shape_cast %54 : vector<1x4x128xbf16> to vector<4x128xbf16>
    %cst_25 = arith.constant dense<0.000000e+00> : vector<192x128xf32>
    %56 = tpu.matmul %53, %55, %cst_25 {dimension_numbers = #tpu.dot_dimension_numbers<[1], [0], [0], [1], [0, 0, 1, 1], [], []>} : vector<192x4xbf16>, vector<4x128xbf16>, vector<192x128xf32> -> vector<192x128xf32>
    %57 = arith.addf %46, %56 : vector<192x128xf32>
    %58 = vector.extract_strided_slice %51 {offsets = [1, 0], sizes = [192, 4], strides = [1, 1]} : vector<200x4xf32> to vector<192x4xf32>
    %59 = arith.truncf %58 : vector<192x4xf32> to vector<192x4xbf16>
    %c7 = arith.constant 7 : index
    %c0_26 = arith.constant 0 : index
    %c0_27 = arith.constant 0 : index
    %60 = vector.load %arg4[%c7, %c0_26, %c0_27] : memref<9x4x128xbf16, #tpu.memory_space<vmem>>, vector<1x4x128xbf16>
    %61 = vector.shape_cast %60 : vector<1x4x128xbf16> to vector<4x128xbf16>
    %cst_28 = arith.constant dense<0.000000e+00> : vector<192x128xf32>
    %62 = tpu.matmul %59, %61, %cst_28 {dimension_numbers = #tpu.dot_dimension_numbers<[1], [0], [0], [1], [0, 0, 1, 1], [], []>} : vector<192x4xbf16>, vector<4x128xbf16>, vector<192x128xf32> -> vector<192x128xf32>
    %63 = arith.addf %57, %62 : vector<192x128xf32>
    %64 = vector.extract_strided_slice %51 {offsets = [2, 0], sizes = [192, 4], strides = [1, 1]} : vector<200x4xf32> to vector<192x4xf32>
    %65 = arith.truncf %64 : vector<192x4xf32> to vector<192x4xbf16>
    %c8 = arith.constant 8 : index
    %c0_29 = arith.constant 0 : index
    %c0_30 = arith.constant 0 : index
    %66 = vector.load %arg4[%c8, %c0_29, %c0_30] : memref<9x4x128xbf16, #tpu.memory_space<vmem>>, vector<1x4x128xbf16>
    %67 = vector.shape_cast %66 : vector<1x4x128xbf16> to vector<4x128xbf16>
    %cst_31 = arith.constant dense<0.000000e+00> : vector<192x128xf32>
    %68 = tpu.matmul %65, %67, %cst_31 {dimension_numbers = #tpu.dot_dimension_numbers<[1], [0], [0], [1], [0, 0, 1, 1], [], []>} : vector<192x4xbf16>, vector<4x128xbf16>, vector<192x128xf32> -> vector<192x128xf32>
    %69 = arith.addf %63, %68 : vector<192x128xf32>
    %c0_32 = arith.constant 0 : index
    %c0_33 = arith.constant 0 : index
    %70 = vector.load %arg5[%c0_32, %c0_33] : memref<1x128xf32, #tpu.memory_space<vmem>>, vector<1x128xf32>
    %71 = vector.broadcast %70 : vector<1x128xf32> to vector<192x128xf32>
    %72 = arith.mulf %69, %71 : vector<192x128xf32>
    %c0_34 = arith.constant 0 : index
    %c0_35 = arith.constant 0 : index
    %73 = vector.load %arg6[%c0_34, %c0_35] : memref<1x128xf32, #tpu.memory_space<vmem>>, vector<1x128xf32>
    %74 = vector.broadcast %73 : vector<1x128xf32> to vector<192x128xf32>
    %75 = arith.addf %72, %74 : vector<192x128xf32>
    %cst_36 = arith.constant 0.000000e+00 : f32
    %76 = vector.broadcast %cst_36 : f32 to vector<192x128xf32>
    %77 = arith.maximumf %75, %76 : vector<192x128xf32>
    %78 = vector.shape_cast %77 : vector<192x128xf32> to vector<1x192x128xf32>
    %c0_37 = arith.constant 0 : index
    %c0_38 = arith.constant 0 : index
    %c0_39 = arith.constant 0 : index
    %79 = vector.load %arg7[%c0_37, %c0_38, %c0_39] : memref<1x192x128xf32, #tpu.memory_space<vmem>>, vector<1x192x128xf32>
    tpu.vector_store %arg7[%c0_37, %c0_38, %c0_39], %78 {strides = array<i32>} : memref<1x192x128xf32, #tpu.memory_space<vmem>>, vector<1x192x128xf32>,
    return
  }
  func.func @transform_0(%arg0: i32, %arg1: i32, %arg2: i32) -> (i32, i32, i32) {
    %c0_i32 = arith.constant 0 : i32
    %c0_i32_0 = arith.constant 0 : i32
    %c0_i32_1 = arith.constant 0 : i32
    return %arg0, %c0_i32, %c0_i32_0 : i32, i32, i32
  }
  func.func @transform_1(%arg0: i32, %arg1: i32, %arg2: i32) -> (i32, i32, i32) {
    %c0_i32 = arith.constant 0 : i32
    %c0_i32_0 = arith.constant 0 : i32
    %c0_i32_1 = arith.constant 0 : i32
    return %c0_i32, %c0_i32_0, %arg1 : i32, i32, i32
  }
  func.func @transform_2(%arg0: i32, %arg1: i32, %arg2: i32) -> (i32, i32) {
    %c0_i32 = arith.constant 0 : i32
    %c0_i32_0 = arith.constant 0 : i32
    return %c0_i32, %arg1 : i32, i32
  }
  func.func @transform_3(%arg0: i32, %arg1: i32, %arg2: i32) -> (i32, i32) {
    %c0_i32 = arith.constant 0 : i32
    %c0_i32_0 = arith.constant 0 : i32
    return %c0_i32, %arg1 : i32, i32
  }
  func.func @transform_4(%arg0: i32, %arg1: i32, %arg2: i32) -> (i32, i32, i32) {
    %c0_i32 = arith.constant 0 : i32
    return %arg0, %arg2, %arg1 : i32, i32, i32
  }
}

module attributes {stable_mosaic.version = 11 : i64} {
  func.func @_convbnrelu_kernel(%arg0: i32, %arg1: i32, %arg2: i32, %arg3: memref<1x456x4xf32, #tpu.memory_space<vmem>>, %arg4: memref<9x4x128xbf16, #tpu.memory_space<vmem>>, %arg5: memref<1x128xf32, #tpu.memory_space<vmem>>, %arg6: memref<1x128xf32, #tpu.memory_space<vmem>>, %arg7: memref<1x192x128xf32, #tpu.memory_space<vmem>>) attributes {dimension_semantics = [#tpu.dimension_semantics<parallel>, #tpu.dimension_semantics<parallel>, #tpu.dimension_semantics<parallel>], iteration_bounds = array<i64: 2, 1, 2>, scalar_prefetch = 0 : i64, scratch_operands = 0 : i64, tpu.core_type = #tpu.core_type<tc>, window_params = [{transform_indices = @transform_0, window_bounds = array<i64: 1, 456, 4>}, {transform_indices = @transform_1, window_bounds = array<i64: 9, 4, 128>}, {transform_indices = @transform_2, window_bounds = array<i64: 1, 128>}, {transform_indices = @transform_3, window_bounds = array<i64: 1, 128>}, {transform_indices = @transform_4, window_bounds = array<i64: 1, 192, 128>}]} {
    %c192_i32 = arith.constant 192 : i32
    %0 = arith.muli %arg2, %c192_i32 : i32
    %1 = tpu.assume_multiple %0, 8 : i32
    %c0_i32 = arith.constant 0 : i32
    %2 = arith.addi %1, %c0_i32 : i32
    %3 = tpu.assume_multiple %2, 8 : i32
    %c0 = arith.constant 0 : index
    %4 = arith.index_cast %3 : i32 to index
    %c0_0 = arith.constant 0 : index
    %5 = vector.load %arg3[%c0, %4, %c0_0] : memref<1x456x4xf32, #tpu.memory_space<vmem>>, vector<1x200x4xf32>
    %6 = vector.shape_cast %5 : vector<1x200x4xf32> to vector<200x4xf32>
    %7 = vector.extract_strided_slice %6 {offsets = [0, 0], sizes = [192, 4], strides = [1, 1]} : vector<200x4xf32> to vector<192x4xf32>
    %8 = arith.truncf %7 : vector<192x4xf32> to vector<192x4xbf16>
    %c0_1 = arith.constant 0 : index
    %c0_2 = arith.constant 0 : index
    %c0_3 = arith.constant 0 : index
    %9 = vector.load %arg4[%c0_1, %c0_2, %c0_3] : memref<9x4x128xbf16, #tpu.memory_space<vmem>>, vector<1x4x128xbf16>
    %10 = vector.shape_cast %9 : vector<1x4x128xbf16> to vector<4x128xbf16>
    %cst = arith.constant dense<0.000000e+00> : vector<192x128xf32>
    %11 = tpu.matmul %8, %10, %cst {dimension_numbers = #tpu.dot_dimension_numbers<[1], [0], [0], [1], [0, 0, 1, 1], [], []>} : vector<192x4xbf16>, vector<4x128xbf16>, vector<192x128xf32> -> vector<192x128xf32>
    %12 = vector.extract_strided_slice %6 {offsets = [1, 0], sizes = [192, 4], strides = [1, 1]} : vector<200x4xf32> to vector<192x4xf32>
    %13 = arith.truncf %12 : vector<192x4xf32> to vector<192x4xbf16>
    %c1 = arith.constant 1 : index
    %c0_4 = arith.constant 0 : index
    %c0_5 = arith.constant 0 : index
    %14 = vector.load %arg4[%c1, %c0_4, %c0_5] : memref<9x4x128xbf16, #tpu.memory_space<vmem>>, vector<1x4x128xbf16>
    %15 = vector.shape_cast %14 : vector<1x4x128xbf16> to vector<4x128xbf16>
    %cst_6 = arith.constant dense<0.000000e+00> : vector<192x128xf32>
    %16 = tpu.matmul %13, %15, %cst_6 {dimension_numbers = #tpu.dot_dimension_numbers<[1], [0], [0], [1], [0, 0, 1, 1], [], []>} : vector<192x4xbf16>, vector<4x128xbf16>, vector<192x128xf32> -> vector<192x128xf32>
    %17 = arith.addf %11, %16 : vector<192x128xf32>
    %18 = vector.extract_strided_slice %6 {offsets = [2, 0], sizes = [192, 4], strides = [1, 1]} : vector<200x4xf32> to vector<192x4xf32>
    %19 = arith.truncf %18 : vector<192x4xf32> to vector<192x4xbf16>
    %c2 = arith.constant 2 : index
    %c0_7 = arith.constant 0 : index
    %c0_8 = arith.constant 0 : index
    %20 = vector.load %arg4[%c2, %c0_7, %c0_8] : memref<9x4x128xbf16, #tpu.memory_space<vmem>>, vector<1x4x128xbf16>
    %21 = vector.shape_cast %20 : vector<1x4x128xbf16> to vector<4x128xbf16>
    %cst_9 = arith.constant dense<0.000000e+00> : vector<192x128xf32>
    %22 = tpu.matmul %19, %21, %cst_9 {dimension_numbers = #tpu.dot_dimension_numbers<[1], [0], [0], [1], [0, 0, 1, 1], [], []>} : vector<192x4xbf16>, vector<4x128xbf16>, vector<192x128xf32> -> vector<192x128xf32>
    %23 = arith.addf %17, %22 : vector<192x128xf32>
    %c24_i32 = arith.constant 24 : i32
    %24 = arith.addi %1, %c24_i32 : i32
    %25 = tpu.assume_multiple %24, 8 : i32
    %c0_10 = arith.constant 0 : index
    %26 = arith.index_cast %25 : i32 to index
    %c0_11 = arith.constant 0 : index
    %27 = vector.load %arg3[%c0_10, %26, %c0_11] : memref<1x456x4xf32, #tpu.memory_space<vmem>>, vector<1x200x4xf32>
    %28 = vector.shape_cast %27 : vector<1x200x4xf32> to vector<200x4xf32>
    %29 = vector.extract_strided_slice %28 {offsets = [0, 0], sizes = [192, 4], strides = [1, 1]} : vector<200x4xf32> to vector<192x4xf32>
    %30 = arith.truncf %29 : vector<192x4xf32> to vector<192x4xbf16>
    %c3 = arith.constant 3 : index
    %c0_12 = arith.constant 0 : index
    %c0_13 = arith.constant 0 : index
    %31 = vector.load %arg4[%c3, %c0_12, %c0_13] : memref<9x4x128xbf16, #tpu.memory_space<vmem>>, vector<1x4x128xbf16>
    %32 = vector.shape_cast %31 : vector<1x4x128xbf16> to vector<4x128xbf16>
    %cst_14 = arith.constant dense<0.000000e+00> : vector<192x128xf32>
    %33 = tpu.matmul %30, %32, %cst_14 {dimension_numbers = #tpu.dot_dimension_numbers<[1], [0], [0], [1], [0, 0, 1, 1], [], []>} : vector<192x4xbf16>, vector<4x128xbf16>, vector<192x128xf32> -> vector<192x128xf32>
    %34 = arith.addf %23, %33 : vector<192x128xf32>
    %35 = vector.extract_strided_slice %28 {offsets = [1, 0], sizes = [192, 4], strides = [1, 1]} : vector<200x4xf32> to vector<192x4xf32>
    %36 = arith.truncf %35 : vector<192x4xf32> to vector<192x4xbf16>
    %c4 = arith.constant 4 : index
    %c0_15 = arith.constant 0 : index
    %c0_16 = arith.constant 0 : index
    %37 = vector.load %arg4[%c4, %c0_15, %c0_16] : memref<9x4x128xbf16, #tpu.memory_space<vmem>>, vector<1x4x128xbf16>
    %38 = vector.shape_cast %37 : vector<1x4x128xbf16> to vector<4x128xbf16>
    %cst_17 = arith.constant dense<0.000000e+00> : vector<192x128xf32>
    %39 = tpu.matmul %36, %38, %cst_17 {dimension_numbers = #tpu.dot_dimension_numbers<[1], [0], [0], [1], [0, 0, 1, 1], [], []>} : vector<192x4xbf16>, vector<4x128xbf16>, vector<192x128xf32> -> vector<192x128xf32>
    %40 = arith.addf %34, %39 : vector<192x128xf32>
    %41 = vector.extract_strided_slice %28 {offsets = [2, 0], sizes = [192, 4], strides = [1, 1]} : vector<200x4xf32> to vector<192x4xf32>
    %42 = arith.truncf %41 : vector<192x4xf32> to vector<192x4xbf16>
    %c5 = arith.constant 5 : index
    %c0_18 = arith.constant 0 : index
    %c0_19 = arith.constant 0 : index
    %43 = vector.load %arg4[%c5, %c0_18, %c0_19] : memref<9x4x128xbf16, #tpu.memory_space<vmem>>, vector<1x4x128xbf16>
    %44 = vector.shape_cast %43 : vector<1x4x128xbf16> to vector<4x128xbf16>
    %cst_20 = arith.constant dense<0.000000e+00> : vector<192x128xf32>
    %45 = tpu.matmul %42, %44, %cst_20 {dimension_numbers = #tpu.dot_dimension_numbers<[1], [0], [0], [1], [0, 0, 1, 1], [], []>} : vector<192x4xbf16>, vector<4x128xbf16>, vector<192x128xf32> -> vector<192x128xf32>
    %46 = arith.addf %40, %45 : vector<192x128xf32>
    %c48_i32 = arith.constant 48 : i32
    %47 = arith.addi %1, %c48_i32 : i32
    %48 = tpu.assume_multiple %47, 8 : i32
    %c0_21 = arith.constant 0 : index
    %49 = arith.index_cast %48 : i32 to index
    %c0_22 = arith.constant 0 : index
    %50 = vector.load %arg3[%c0_21, %49, %c0_22] : memref<1x456x4xf32, #tpu.memory_space<vmem>>, vector<1x200x4xf32>
    %51 = vector.shape_cast %50 : vector<1x200x4xf32> to vector<200x4xf32>
    %52 = vector.extract_strided_slice %51 {offsets = [0, 0], sizes = [192, 4], strides = [1, 1]} : vector<200x4xf32> to vector<192x4xf32>
    %53 = arith.truncf %52 : vector<192x4xf32> to vector<192x4xbf16>
    %c6 = arith.constant 6 : index
    %c0_23 = arith.constant 0 : index
    %c0_24 = arith.constant 0 : index
    %54 = vector.load %arg4[%c6, %c0_23, %c0_24] : memref<9x4x128xbf16, #tpu.memory_space<vmem>>, vector<1x4x128xbf16>
    %55 = vector.shape_cast %54 : vector<1x4x128xbf16> to vector<4x128xbf16>
    %cst_25 = arith.constant dense<0.000000e+00> : vector<192x128xf32>
    %56 = tpu.matmul %53, %55, %cst_25 {dimension_numbers = #tpu.dot_dimension_numbers<[1], [0], [0], [1], [0, 0, 1, 1], [], []>} : vector<192x4xbf16>, vector<4x128xbf16>, vector<192x128xf32> -> vector<192x128xf32>
    %57 = arith.addf %46, %56 : vector<192x128xf32>
    %58 = vector.extract_strided_slice %51 {offsets = [1, 0], sizes = [192, 4], strides = [1, 1]} : vector<200x4xf32> to vector<192x4xf32>
    %59 = arith.truncf %58 : vector<192x4xf32> to vector<192x4xbf16>
    %c7 = arith.constant 7 : index
    %c0_26 = arith.constant 0 : index
    %c0_27 = arith.constant 0 : index
    %60 = vector.load %arg4[%c7, %c0_26, %c0_27] : memref<9x4x128xbf16, #tpu.memory_space<vmem>>, vector<1x4x128xbf16>
    %61 = vector.shape_cast %60 : vector<1x4x128xbf16> to vector<4x128xbf16>
    %cst_28 = arith.constant dense<0.000000e+00> : vector<192x128xf32>
    %62 = tpu.matmul %59, %61, %cst_28 {dimension_numbers = #tpu.dot_dimension_numbers<[1], [0], [0], [1], [0, 0, 1, 1], [], []>} : vector<192x4xbf16>, vector<4x128xbf16>, vector<192x128xf32> -> vector<192x128xf32>
    %63 = arith.addf %57, %62 : vector<192x128xf32>
    %64 = vector.extract_strided_slice %51 {offsets = [2, 0], sizes = [192, 4], strides = [1, 1]} : vector<200x4xf32> to vector<192x4xf32>
    %65 = arith.truncf %64 : vector<192x4xf32> to vector<192x4xbf16>
    %c8 = arith.constant 8 : index
    %c0_29 = arith.constant 0 : index
    %c0_30 = arith.constant 0 : index
    %66 = vector.load %arg4[%c8, %c0_29, %c0_30] : memref<9x4x128xbf16, #tpu.memory_space<vmem>>, vector<1x4x128xbf16>
    %67 = vector.shape_cast %66 : vector<1x4x128xbf16> to vector<4x128xbf16>
    %cst_31 = arith.constant dense<0.000000e+00> : vector<192x128xf32>
    %68 = tpu.matmul %65, %67, %cst_31 {dimension_numbers = #tpu.dot_dimension_numbers<[1], [0], [0], [1], [0, 0, 1, 1], [], []>} : vector<192x4xbf16>, vector<4x128xbf16>, vector<192x128xf32> -> vector<192x128xf32>
    %69 = arith.addf %63, %68 : vector<192x128xf32>
    %c0_32 = arith.constant 0 : index
    %c0_33 = arith.constant 0 : index
    %70 = vector.load %arg5[%c0_32, %c0_33] : memref<1x128xf32, #tpu.memory_space<vmem>>, vector<1x128xf32>
    %71 = vector.broadcast %70 : vector<1x128xf32> to vector<192x128xf32>
    %72 = arith.mulf %69, %71 : vector<192x128xf32>
    %c0_34 = arith.constant 0 : index
    %c0_35 = arith.constant 0 : index
    %73 = vector.load %arg6[%c0_34, %c0_35] : memref<1x128xf32, #tpu.memory_space<vmem>>, vector<1x128xf32>
    %74 = vector.broadcast %73 : vector<1x128xf32> to vector<192x128xf32>
    %75 = arith.addf %72, %74 : vector<192x128xf32>
    %cst_36 = arith.constant 0.000000e+00 : f32
    %76 = vector.broadcast %cst_36 : f32 to vector<192x128xf32>
    %77 = arith.maximumf %75, %76 : vector<192x128xf32>
    %78 = vector.shape_cast %77 : vector<192x128xf32> to vector<1x192x128xf32>
    %c0_37 = arith.constant 0 : index
    %c0_38 = arith.constant 0 : index
    %c0_39 = arith.constant 0 : index
    %79 = vector.load %arg7[%c0_37, %c0_38, %c0_39] : memref<1x192x128xf32, #tpu.memory_space<vmem>>, vector<1x192x128xf32>
    tpu.vector_store %arg7[%c0_37, %c0_38, %c0_39], %78 {strides = array<i32>} : memref<1x192x128xf32, #tpu.memory_space<vmem>>, vector<1x192x128xf32>,
    return
  }
  func.func @transform_0(%arg0: i32, %arg1: i32, %arg2: i32) -> (i32, i32, i32) {
    %c0_i32 = arith.constant 0 : i32
    %c0_i32_0 = arith.constant 0 : i32
    %c0_i32_1 = arith.constant 0 : i32
    return %arg0, %c0_i32, %c0_i32_0 : i32, i32, i32
  }
  func.func @transform_1(%arg0: i32, %arg1: i32, %arg2: i32) -> (i32, i32, i32) {
    %c0_i32 = arith.constant 0 : i32
    %c0_i32_0 = arith.constant 0 : i32
    %c0_i32_1 = arith.constant 0 : i32
    return %c0_i32, %c0_i32_0, %arg1 : i32, i32, i32
  }
  func.func @transform_2(%arg0: i32, %arg1: i32, %arg2: i32) -> (i32, i32) {
    %c0_i32 = arith.constant 0 : i32
    %c0_i32_0 = arith.constant 0 : i32
    return %c0_i32, %arg1 : i32, i32
  }
  func.func @transform_3(%arg0: i32, %arg1: i32, %arg2: i32) -> (i32, i32) {
    %c0_i32 = arith.constant 0 : i32
    %c0_i32_0 = arith.constant 0 : i32
    return %c0_i32, %arg1 : i32, i32
  }
  func.func @transform_4(%arg0: i32, %arg1: i32, %arg2: i32) -> (i32, i32, i32) {
    %c0_i32 = arith.constant 0 : i32
    return %arg0, %arg2, %arg1 : i32, i32, i32
  }
}

</mosaic_0001>

<bundles_post_ra>
// kernel: conv_bn_relu.1
= control target key start
LH: loop header
LB: loop body
LE: loop exit
PB: predicated region body
PF: predicated region fallthrough
CT: control target
= control target key end

     0   :  { %s4799_s0 = inlined_call_operand.hbm [shape: f32[2,456,4], index: 0, kind: input, shape index: {}]   ;;  %s4800_s1 = inlined_call_operand.hbm [shape: bf16[9,4,128], index: 1, kind: input, shape index: {}]   ;;  %s4801_s2 = inlined_call_operand.hbm [shape: f32[1,128], index: 2, kind: input, shape index: {}]   ;;  %s4802_s3 = inlined_call_operand.hbm [shape: f32[1,128], index: 3, kind: input, shape index: {}]   ;;  %s4803_s4 = inlined_call_operand.hbm [shape: f32[2,384,128], index: 4, kind: output, shape index: {}]  }
   0x1   :  { %4822 = sst [smem:[#allocation24_spill]] %s4799_s0 }
   0x2   :  { %4823 = sst [smem:[#allocation25_spill]] %s4800_s1 }
   0x3   :  { %9 = vsyncpa [#allocation3], 0 }
   0x4   :  { %10 = vsyncpa [#allocation6], 0 }
   0x5   :  { %11 = vsyncpa [#allocation9], 0 }
   0x6   :  { %12 = vsyncpa [#allocation4], 0 }
   0x7   :  { %14 = vsyncpa [#allocation4 + $0x1], 0  ;;  %s3888_s15 = smov 0   ;;  %s3890_s16 = smov 0  }
   0x8   :  { %s3892_s17 = smov 0   ;;  %s3894_s18 = smov 0  }
   0x9   :  { %s3896_s19 = smov 0   ;;  %s3898_s20 = smov 0  }
   0xa   :  { %s3900_s21 = smov 0   ;;  %s3902_s22 = smov 0  }
   0xb   :  { %s3904_s23 = smov 0   ;;  %s3906_s24 = smov 0  }
   0xc   :  { %s3908_s25 = smov 0  }
   0xd LB: > { %4824 = sst [smem:[#allocation15_spill]] %s3818_s17  ;;  %s2736_s26 = sadd.s32 4294967295, %s3850_s25   ;;  %s3850_s25 = sphi %s3908_s25, %s20_s25   ;;  %s3846_s24 = sphi %s3906_s24, %s4859_s24   ;;  %s3842_s23 = sphi %s3904_s23, %s4858_s23   ;;  %s3838_s22 = sphi %s3902_s22, %s4857_s22   ;;  %s3834_s21 = sphi %s3900_s21, %s4856_s21   ;;  %s3830_s20 = sphi %s3898_s20, %s4855_s20   ;;  %s3826_s19 = sphi %s3896_s19, %s4854_s19   ;;  %s3822_s18 = sphi %s3894_s18, %s4853_s18   ;;  %s3818_s17 = sphi %s3892_s17, %s4852_s17   ;;  %s3814_s16 = sphi %s3890_s16, %s4861_s16   ;;  %s3810_s15 = sphi %s3888_s15, %s4860_s15  }
   0xe   : > { %4825 = sst [smem:[#allocation16_spill]] %s3826_s19  ;;  %s2737_s27 = sadd.s32 4294967294, %s3850_s25  }
   0xf   : > { %4826 = sst [smem:[#allocation17_spill]] %s3830_s20  ;;  %s32_s28 = sadd.s32 1, %s3842_s23 }
  0x10   : > { %4827 = sst [smem:[#allocation18_spill]] %s3842_s23  ;;  %s39_s29 = sadd.s32 1, %s3846_s24 }
  0x11   : > { %4828 = sst [smem:[#allocation19_spill]] %s3846_s24  ;;  %p33_p0 = scmp.ge.s32.totalorder %s32_s28, 2 }
  0x12   : > { %s46_s30 = sadd.s32 1, %s3830_s20  ;;  %p59_p1 = scmp.ne.s32.totalorder %s3826_s19, %s3822_s18 }
  0x13   : > { %p3947_p2 = scmp.eq.s32.totalorder %s2736_s26, 0  ;;  %s4863_s28 = smov (%p33_p0, %s32_s28), 0 }
  0x14   : > { %4830 = sst [smem:[#allocation20_spill]] %s4863_s28  ;;  %s4865_s29 = smov (!%p33_p0, %s39_s29), %s3846_s24 }
  0x15   : > { %s4829_s5 = scalar_select %p3947_p2, 1, 0 }
  0x16   : > { %p3956_p3 = por %p3947_p2, %p59_p1  ;;  %s148_s7 = ssub.s32 %s3842_s23, %s4863_s28 }
  0x17   : > { %p41_p4 = scmp.ge.s32.totalorder %s4865_s29, 2  ;;  %s154_s8 = sadd.s32 1, %s3818_s17 }
  0x18   : > { %s4831_s6 = scalar_select %p3956_p3, 1, 0 }
  0x19   : > { %p164_p5 = scmp.ne.s32.totalorder %s3818_s17, %s3814_s16  ;;  %p165_p6 = scmp.eq.s32.totalorder %s2736_s26, 3 }
  0x1a   : > { %s4867_s29 = smov (%p41_p4, %s4865_s29), 0  ;;  %p170_p8 = scmp.ne.s32.totalorder %s3814_s16, %s3810_s15 }
  0x1b   : > { %4832 = sst [smem:[#allocation21_spill]] %s4867_s29  ;;  %p3967_p7 = por %p165_p6, %p164_p5 }
  0x1c   : > { %s43_s10 = ssub.s32 %s3846_s24, %s4867_s29  ;;  %p171_p9 = scmp.eq.s32.totalorder %s2737_s27, 3 }
  0x1d   : > { %s4833_s9 = scalar_select %p3967_p7, 1, 0 }
  0x1e   : > { %p44_p10 = scmp.eq.s32.totalorder %s43_s10, 0  ;;  %s149_s11 = sor.u32 %s148_s7, %s43_s10 }
  0x1f   : > { %p152_p11 = scmp.eq.s32.totalorder %s149_s11, 0  ;;  %p3975_p12 = por %p171_p9, %p170_p8 }
  0x20   : > { %s3980_s13 = scalar_select %p44_p10, %s3830_s20, %s46_s30  }
  0x21   : > { %s4834_s12 = scalar_select %p3975_p12, 1, 0 }
  0x22   : > { %4835 = sst [smem:[#allocation22_spill]] %s3980_s13  ;;  %p2738_p13 = scmp.ge.s32.totalorder %s3850_s25, 1 }
  0x23   : > { %s3983_s14 = scalar_select %p152_p11, %s3818_s17, %s154_s8  }
  0x24   : > { %p178_p0 = scmp.lt.s32.totalorder %s3850_s25, 5  ;;  %s3852_s26 = smov [#allocation5]  }
  0x25   : > { %4836 = sst [smem:[#allocation23_spill]] %s3983_s14  ;;  %s208_s27 = sshll.u32 %s3852_s26, 4  ;;  %s209_s27 = int_to_ptr.vmem [resolvable:$true] %s208_s27 }
  0x26   : > { %p3987_p1 = pnand %p2738_p13, %p178_p0  ;;  %s4840_s1 = sld [smem:[#allocation25_spill]] }
  0x28   : > { %s4837_s18 = scalar_select %p3987_p1, 1, 0 }
  0x29   : > { %p3484_p4 = pneg %p3987_p1 }
  0x2b   : > { %p3995_p5 = pnand %p3484_p4, %p3956_p3  ;;  %p4001_p6 = pnand %p3484_p4, %p3947_p2 }
  0x2c   : > { %s3606_s11 = scalar_lea.hbm %s4840_s1, 288 }
  0x2d   : > { %s4838_s7 = scalar_select %p3995_p5, 1, 0 }
  0x2e   : > { %s4839_s30 = scalar_select %p4001_p6, 1, 0 }
  0x2f   : > { %p3607_p8 = scmp.ne.s32.totalorder %s4840_s1, %s3606_s11  ;;  %p4013_p9 = pneg %p4001_p6 }
  0x30   : > { %p3613_p13 = scmp.lt.u32.totalorder %s3606_s11, %s4840_s1 }
  0x31   : > { %s4841_s28 = scalar_select %p4013_p9, 1, 0 }
  0x32   : > { %p3609_p10 = pnand %p4013_p9, %p3607_p8 }
  0x34   : > { %p3610_p11 = pneg %p3609_p10 }
  0x36   : > { %p3615_p0 = pnand %p3613_p13, %p3610_p11 }
  0x38   : > { %3618 = shalt.err (!%p3615_p0)
}
  0x39   : > { %s3619_s8 = scalar_lea.vmem %s209_s27, 288  ;;  %p3627_p2 = scmp.lt.s32.totalorder %s209_s27, %s209_s27 }
  0x3a   : > { %p3620_p4 = scmp.ne.s32.totalorder %s209_s27, %s3619_s8  ;;  %p3628_p3 = scmp.lt.s32.totalorder %s3619_s8, %s3619_s8 }
  0x3c   : > { %p3622_p12 = pnand %p3620_p4, %p4013_p9  ;;  %p3629_p1 = por %p3628_p3, %p3627_p2 }
  0x3e   : > { %p3623_p7 = pneg %p3622_p12 }
  0x40   : > { %p3630_p5 = pnand %p3629_p1, %p3623_p7 }
  0x42   : > { %3633 = shalt.err (!%p3630_p5)
}
  0x43   : > { %s3853_s29 = smov 32   ;;  %s3854_s23 = smov 2  }
  0x44   : > { %3490 = dma.hbm_to_vmem [thread:$0]  (!%p4001_p6), %s4840_s1, 288, %s209_s27, [#allocation6], %s3853_s29, %s3853_s29, %s3854_s23  }
  0x45   : > { %s3465_s11 = smul.u32 7296, %s3838_s22  ;;  %s3855_s26 = smov [#allocation2]  }
  0x46   : > { %s193_s13 = sshll.u32 %s3855_s26, 4  ;;  %s4842_s0 = sld [smem:[#allocation24_spill]]  ;;  %s194_s13 = int_to_ptr.vmem [resolvable:$true] %s193_s13 }
  0x47   : > { %p4843_p3 = scmp.ne.s32.totalorder %s4838_s7, 0 }
  0x49   : > { %p3636_p7 = pneg %p4843_p3 }
  0x4c   : > { %s4033_s8 = scalar_lea.hbm %s4842_s0, %s3465_s11  ;;  %s3639_s23 = scalar_lea.hbm %s4842_s0, 14592 }
  0x4d   : > { %s3634_s14 = scalar_lea.hbm %s4033_s8, 7296  ;;  %p3640_p5 = scmp.lt.u32.totalorder %s4033_s8, %s4842_s0 }
  0x4e   : > { %p3635_p2 = scmp.ne.s32.totalorder %s4033_s8, %s3634_s14  ;;  %p3641_p8 = scmp.lt.u32.totalorder %s3639_s23, %s3634_s14 }
  0x4f   : > { %p3643_p11 = scmp.lt.u32.totalorder %s3634_s14, %s4033_s8 }
  0x50   : > { %p3637_p12 = pnand %p3636_p7, %p3635_p2  ;;  %p3642_p10 = por %p3641_p8, %p3640_p5 }
  0x52   : > { %p3638_p1 = pneg %p3637_p12  ;;  %p3644_p13 = por %p3643_p11, %p3642_p10 }
  0x54   : > { %p3645_p0 = pnand %p3644_p13, %p3638_p1 }
  0x56   : > { %3648 = shalt.err (!%p3645_p0)
}
  0x57   : > { %s3649_s24 = scalar_lea.vmem %s194_s13, 7296  ;;  %p3657_p6 = scmp.lt.s32.totalorder %s194_s13, %s194_s13 }
  0x58   : > { %p3650_p4 = scmp.ne.s32.totalorder %s194_s13, %s3649_s24  ;;  %p3658_p9 = scmp.lt.s32.totalorder %s3649_s24, %s3649_s24 }
  0x5a   : > { %p3652_p2 = pnand %p3650_p4, %p3636_p7  ;;  %p3659_p5 = por %p3658_p9, %p3657_p6 }
  0x5c   : > { %p3653_p12 = pneg %p3652_p2 }
  0x5e   : > { %p3660_p8 = pnand %p3659_p5, %p3653_p12 }
  0x60   : > { %3663 = shalt.err (!%p3660_p8)
}
  0x61   : > { %s3856_s10 = smov 128   ;;  %s3857_s14 = smov 8  }
  0x62   : > { %3487 = dma.hbm_to_vmem [thread:$0]  (!%p4843_p3), %s4033_s8, 7296, %s194_s13, [#allocation3], %s3856_s10, %s3856_s10, %s3857_s14  }
  0x63   : > { %s3858_s11 = smov [#allocation7]   ;;  %s3859_s27 = smov [#allocation8]  }
  0x64   : > { %s224_s26 = sshll.u32 %s3858_s11, 4  ;;  %s237_s29 = sshll.u32 %s3859_s27, 4  ;;  %s225_s26 = int_to_ptr.vmem [resolvable:$true] %s224_s26  ;;  %s238_s29 = int_to_ptr.vmem [resolvable:$true] %s237_s29 }
  0x65   : > { %s3664_s20 = scalar_lea.hbm %s4801_s2, 16  ;;  %p4844_p9 = scmp.ne.s32.totalorder %s4841_s28, 0 }
  0x66   : > { %p3665_p6 = scmp.ne.s32.totalorder %s4801_s2, %s3664_s20  ;;  %p3671_p3 = scmp.lt.u32.totalorder %s3664_s20, %s4801_s2 }
  0x68   : > { %p3667_p7 = pnand %p3665_p6, %p4844_p9 }
  0x6a   : > { %p3668_p1 = pneg %p3667_p7 }
  0x6c   : > { %p3673_p10 = pnand %p3671_p3, %p3668_p1 }
  0x6e   : > { %3676 = shalt.err (!%p3673_p10)
}
  0x6f   : > { %s3677_s13 = scalar_lea.vmem %s225_s26, 16  ;;  %s3684_s7 = scalar_lea.vmem %s225_s26, 32 }
  0x70   : > { %p3678_p11 = scmp.ne.s32.totalorder %s225_s26, %s3677_s13  ;;  %p3685_p4 = scmp.lt.s32.totalorder %s225_s26, %s225_s26 }
  0x71   : > { %p3686_p2 = scmp.lt.s32.totalorder %s3684_s7, %s3677_s13 }
  0x72   : > { %p3680_p13 = pnand %p3678_p11, %p4844_p9 }
  0x73   : > { %p3687_p12 = por %p3686_p2, %p3685_p4 }
  0x74   : > { %p3681_p0 = pneg %p3680_p13 }
  0x76   : > { %p3688_p5 = pnand %p3687_p12, %p3681_p0 }
  0x78   : > { %3691 = shalt.err (!%p3688_p5)
}
  0x79   : > { %p4845_p8 = scmp.ne.s32.totalorder %s4839_s30, 0  ;;  %s3692_s10 = scalar_lea.hbm %s4802_s3, 16 }
  0x7a   : > { %p3693_p6 = scmp.ne.s32.totalorder %s4802_s3, %s3692_s10  ;;  %p3699_p3 = scmp.lt.u32.totalorder %s3692_s10, %s4802_s3 }
  0x7b   : > { %3493 = dma.hbm_to_vmem [thread:$0]  (!%p4845_p8), %s4801_s2, 16, %s225_s26, [#allocation6]  }
  0x7c   : > { %p3695_p7 = pnand %p3693_p6, %p4844_p9 }
  0x7e   : > { %p3696_p1 = pneg %p3695_p7 }
  0x80   : > { %p3701_p10 = pnand %p3699_p3, %p3696_p1 }
  0x82   : > { %3704 = shalt.err (!%p3701_p10)
}
  0x83   : > { %s3705_s19 = scalar_lea.vmem %s238_s29, 16  ;;  %s3712_s26 = scalar_lea.vmem %s238_s29, 32 }
  0x84   : > { %p3706_p11 = scmp.ne.s32.totalorder %s238_s29, %s3705_s19  ;;  %p3713_p4 = scmp.lt.s32.totalorder %s238_s29, %s238_s29 }
  0x85   : > { %p3714_p2 = scmp.lt.s32.totalorder %s3712_s26, %s3705_s19 }
  0x86   : > { %p3708_p13 = pnand %p3706_p11, %p4844_p9 }
  0x87   : > { %p3715_p12 = por %p3714_p2, %p3713_p4 }
  0x88   : > { %p3709_p0 = pneg %p3708_p13 }
  0x8a   : > { %p3716_p5 = pnand %p3715_p12, %p3709_p0 }
  0x8c   : > { %3719 = shalt.err (!%p3716_p5)
}
  0x8d   : > { %3496 = dma.hbm_to_vmem [thread:$0]  (!%p4845_p8), %s4802_s3, 16, %s238_s29, [#allocation9]  }
  0x8e   : > { %p4846_p6 = scmp.ne.s32.totalorder %s4837_s18, 0 }
  0x8f   : > { %p4847_p7 = scmp.ne.s32.totalorder (!%p4846_p6), %s4831_s6, 0 }
  0x90   : > { %250 = sbr.rel (%p4846_p6) target bundleno = 619 (0x26b), region = 36 }
  0x97   : > { %3793 = dma.done.wait (%p4847_p7), [#allocation3], 7296  }
  0x98   : > { %3795 = vsyncadd (%p4847_p7), [#allocation3], 4294960000  ;;  %p4848_p9 = scmp.ne.s32.totalorder %s4829_s5, 0 }
  0x9a   : > { %3797 = dma.done.wait (%p4848_p9), [#allocation6], 304  }
  0x9b   : > { %3799 = vsyncadd (%p4848_p9), [#allocation6], 4294966992 }
  0x9c   : > { %3801 = dma.done.wait (%p4848_p9), [#allocation9], 16  }
  0x9d   : > { %3803 = vsyncadd (%p4848_p9), [#allocation9], 4294967280  ;;  %s285_s28 = smul.u32 192, %s3834_s21  ;;  %vm466_vm0 = vcmask 1041408   ;;  %v327_v0 = vld [vmem:[#allocation5 + $0x2] sm:$0x3] }
  0x9e   : > { %v4107_v1 = vld [vmem:[#allocation5 + $0x8] sm:$0x3]  ;;  %3455 = vmatprep.subr.msk.bf16.mxu1 %vm466_vm0, %v327_v0  ;;  %v468_v3 = vsel %vm466_vm0, %v327_v0, 0  ;;  %vm328_vm1 = vsmask.f32 7424  ;;  %vm429_vm2 = vcmask 31744  }
  0x9f   : > { %s4109_s6 = scalar_lea.vmem [#allocation2], %s285_s28  ;;  %3459 = vmatprep.subr.msk.bf16.mxu0 %vm466_vm0, %v4107_v1  ;;  %v4118_v4 = vsel %vm466_vm0, %v4107_v1, 0  ;;  %3028 = vmatpush3.bf16.msra.mxu1 %v468_v3  ;;  %v324_v10 = vld [vmem:[#allocation5] sm:$0x3]  ;;  %v1505_v15 = vld [vmem:[#allocation5 + $0xa] sm:$0x3] }
  0xa0   : > { %v287_v2 = vld [vmem:[%s4109_s6] sm:$0xff]  ;;  %v288_v5 = vld [vmem:[%s4109_s6 + $0x8] sm:$0xff]  ;;  %v289_v6 = vld [vmem:[%s4109_s6 + $0x10] sm:$0xff]  ;;  %3132 = vmatpush3.bf16.msra.mxu0 %v4118_v4  ;;  %3456 = vmatprep.subr.msk.bf16.mxu1 %vm466_vm0, %v324_v10  ;;  %v624_v17 = vsel %vm466_vm0, %v324_v10, 0  ;;  %v1581_v31 = vsel %vm466_vm0, %v1505_v15, 0  ;;  %vm770_vm3 = vcmask 1046528  }
  0xa1   : > { %v290_v7 = vld [vmem:[%s4109_s6 + $0x18] sm:$0xff]  ;;  %v4124_v8 = vpack.c.bf16 %v288_v5, %v287_v2  ;;  %v2784_v11 = vld [vmem:[%s4109_s6 + $0x20] sm:$0xff]  ;;  %v2785_v12 = vld [vmem:[%s4109_s6 + $0x28] sm:$0xff]  ;;  %3461 = vmatprep.subr.msk.bf16.mxu0 %vm466_vm0, %v1505_v15  ;;  %s280_s5 = sand.u32 1, %s3814_s16   ;;  %s2602_s29 = smul.u32 24, %s3834_s21 }
  0xa2   : > { %v4126_v9 = vpack.c.bf16 %v290_v7, %v289_v6  ;;  %v2786_v13 = vld [vmem:[%s4109_s6 + $0x30] sm:$0xff]  ;;  %v4132_v14 = vpack.c.bf16 %v2784_v11, %v290_v7  ;;  %v4134_v16 = vpack.c.bf16 %v2785_v12, %v2784_v11  ;;  %v2787_v18 = vld [vmem:[%s4109_s6 + $0x38] sm:$0xff]  ;;  %v2788_v23 = vld [vmem:[%s4109_s6 + $0x40] sm:$0xff]  ;;  %s3466_s18 = smul.u32 192, %s280_s5  ;;  %s4738_s17 = scalar_lea.sflag [#allocation4], %s280_s5 }
  0xa3   : > { %v330_v19 = vshrl.u32 %v4124_v8, 16  ;;  %v332_v20 = vshll.u32 %v4124_v8, 16  ;;  %v4144_v24 = vpack.c.bf16 %v2786_v13, %v2785_v12  ;;  %v4149_v30 = vpack.c.bf16 %v2788_v23, %v2787_v18  ;;  %v2789_v32 = vld [vmem:[%s4109_s6 + $0x48] sm:$0xff]  ;;  %v2790_v33 = vld [vmem:[%s4109_s6 + $0x50] sm:$0xff]  ;;  %v2791_v50 = vld [vmem:[%s4109_s6 + $0x58] sm:$0xff]  ;;  %s3467_s13 = smul.u32 48, %s3838_s22 }
  0xa4   : > { %v337_v21 = vshll.u32 %v4126_v9, 16  ;;  %v341_v22 = vshrl.u32 %v4126_v9, 16  ;;  %v1224_v25 = vshrl.u32 %v4132_v14, 16  ;;  %v1226_v26 = vshll.u32 %v4132_v14, 16  ;;  %v2792_v51 = vld [vmem:[%s4109_s6 + $0x60] sm:$0xff]  ;;  %v2793_v61 = vld [vmem:[%s4109_s6 + $0x68] sm:$0xff] }
  0xa5   : > { %v345_v27 = vshll.u32 %v4134_v16, 16  ;;  %v334_v28 = vrot.slane %v332_v20, 1  ;;  %v1230_v35 = vshll.u32 %v4144_v24, 16  ;;  %v1234_v36 = vshrl.u32 %v4144_v24, 16  ;;  %v4170_v56 = vld [vmem:[#allocation5 + $0x4] sm:$0x3]  ;;  %s2608_s21 = sadd.s32 %s3467_s13, %s2602_s29 }
  0xa6   : > { %v339_v29 = vrot.slane %v337_v21, 1  ;;  %v1228_v34 = vrot.slane %v1226_v26, 1  ;;  %v1237_v40 = vshll.u32 %v4149_v30, 16  ;;  %v4157_v41 = vpack.c.bf16 %v2787_v18, %v2786_v13  ;;  %v2794_v62 = vld [vmem:[%s4109_s6 + $0x70] sm:$0xff]  ;;  %v2795_v18 = vld [vmem:[%s4109_s6 + $0x78] sm:$0xff]  ;;  %s4659_s30 = scalar_lea.vmem [#allocation10], %s3466_s18 }
  0xa7   : > { %v347_v37 = vrot.slane %v345_v27, 1  ;;  %v335_v38 = vor.u32 %v334_v28, %v330_v19  ;;  %v1232_v43 = vrot.slane %v1230_v35, 1  ;;  %v349_v44 = vshrl.u32 %v4134_v16, 16  ;;  %v4184_v5 = vld [vmem:[#allocation5 + $0xc] sm:$0x3]  ;;  %v2796_v19 = vld [vmem:[%s4109_s6 + $0x80] sm:$0xff] }
  0xa8   : > { %v343_v39 = vor.u32 %v341_v22, %v339_v29  ;;  %v1229_v42 = vor.u32 %v1228_v34, %v1224_v25  ;;  %v4160_v45 = vpack.c.bf16 %v2790_v33, %v2789_v32  ;;  %v1239_v48 = vrot.slane %v1237_v40, 1  ;;  %s2907_s22 = sshll.u32 %s2608_s21, 7  ;;  %s2611_s7 = sshll.u32 %s4659_s30, 4  ;;  %s4731_s7 = int_to_ptr.vmem [resolvable:$true] %s2611_s7 }
  0xa9   : > { %v340_v46 = vsel %vm328_vm1, %v335_v38, %v339_v29  ;;  %v353_v49 = vshll.u32 %v4157_v41, 16  ;;  %v1236_v53 = vor.u32 %v1234_v36, %v1232_v43  ;;  %v351_v54 = vor.u32 %v349_v44, %v347_v37  ;;  %s4729_s1 = scalar_lea.hbm %s4803_s4, %s2907_s22  ;;  %s3720_s10 = scalar_lea.vmem %s4731_s7, 3072 }
  0xaa   : > { %v348_v47 = vsel %vm328_vm1, %v343_v39, %v347_v37  ;;  %3029 = vmatprep.mubr.msk.bf16.mxu1 %vm429_vm2, %v340_v46  ;;  %v1233_v52 = vsel %vm328_vm1, %v1229_v42, %v1232_v43  ;;  %v1241_v55 = vshrl.u32 %v4149_v30, 16  ;;  %v1244_v58 = vshll.u32 %v4160_v45, 16  ;;  %v4224_v43 = vld [vmem:[%s4109_s6 + $0x88] sm:$0xff]  ;;  %p3721_p8 = scmp.ne.s32.totalorder %s4731_s7, %s3720_s10  ;;  %p4849_p1 = scmp.ne.s32.totalorder %s4833_s9, 0 }
  0xab   : > { %3133 = vmatprep.mubr.msk.bf16.mxu0 %vm429_vm2, %v1233_v52  ;;  %3030 = vmatmul.mubr.msk.bf16.vlgmr.msra.gmra.mrb[0].mxu1 %vm429_vm2, %v348_v47  ;;  %v355_v57 = vrot.slane %v353_v49, 1  ;;  %v4175_v59 = vpack.c.bf16 %v2789_v32, %v2788_v23  ;;  %v357_v60 = vshrl.u32 %v4157_v41, 16  ;;  %v1240_v63 = vsel %vm328_vm1, %v1236_v53, %v1239_v48  ;;  %s3860_s14 = smov [#allocation10]  }
  0xac   : > { %3054 = vmatpush3.bf16.msra.mxu1 %v624_v17  ;;  %v1243_v0 = vor.u32 %v1241_v55, %v1239_v48  ;;  %v4181_v2 = vpack.c.bf16 %v2792_v51, %v2791_v50  ;;  %v1248_v3 = vshrl.u32 %v4160_v45, 16  ;;  %3134 = vmatmul.mubr.msk.bf16.vlgmr.msra.gmra.mrb[0].mxu0 %vm429_vm2, %v1240_v63  ;;  %v1246_v7 = vrot.slane %v1244_v58, 1  ;;  %v4245_v55 = vld [vmem:[%s4109_s6 + $0x98] sm:$0xff]  ;;  %p3722_p3 = pnand %p3721_p8, %p4849_p1  ;;  %s3724_s11 = sshll.u32 %s3860_s14, 4  ;;  %s3725_s11 = int_to_ptr.vmem [resolvable:$false] %s3724_s11 }
  0xad   : > { %v356_v6 = vsel %vm328_vm1, %v351_v54, %v355_v57  ;;  %v359_v10 = vor.u32 %v357_v60, %v355_v57  ;;  %v361_v11 = vshll.u32 %v4175_v59, 16  ;;  %3457 = vmatprep.subr.msk.bf16.mxu1 %vm466_vm0, %v4170_v56  ;;  %3158 = vmatpush3.bf16.msra.mxu0 %v1581_v31  ;;  %v4193_v13 = vpack.c.bf16 %v2791_v50, %v2790_v33  ;;  %v4242_v54 = vld [vmem:[%s4109_s6 + $0x90] sm:$0xff]  ;;  %s3726_s27 = scalar_lea.vmem %s3725_s11, 6144  ;;  %p3727_p11 = scmp.lt.s32.totalorder %s4731_s7, %s3725_s11 }
  0xae   : > { %3033 = vmatprep.mubr.msk.bf16.mxu1 %vm429_vm2, %v356_v6  ;;  %v1251_v12 = vshll.u32 %v4181_v2, 16  ;;  %v365_v15 = vshrl.u32 %v4175_v59, 16  ;;  %v4196_v17 = vpack.c.bf16 %v2794_v62, %v2793_v61  ;;  %v1247_v20 = vsel %vm328_vm1, %v1243_v0, %v1246_v7  ;;  %3462 = vmatprep.subr.msk.bf16.mxu0 %vm466_vm0, %v4184_v5  ;;  %v4258_v6 = vld [vmem:[%s4109_s6 + $0xa8] sm:$0xff]  ;;  %p3723_p10 = pneg %p3722_p3  ;;  %p3728_p13 = scmp.lt.s32.totalorder %s3726_s27, %s3720_s10 }
  0xaf   : > { %v363_v21 = vrot.slane %v361_v11, 1  ;;  %v1250_v22 = vor.u32 %v1248_v3, %v1246_v7  ;;  %v1255_v23 = vshrl.u32 %v4181_v2, 16  ;;  %3137 = vmatprep.mubr.msk.bf16.mxu0 %vm429_vm2, %v1247_v20  ;;  %v369_v26 = vshll.u32 %v4193_v13, 16  ;;  %v4255_v3 = vld [vmem:[%s4109_s6 + $0xa0] sm:$0xff] }
  0xb0   : > { %v1253_v25 = vrot.slane %v1251_v12, 1  ;;  %v1258_v27 = vshll.u32 %v4196_v17, 16  ;;  %v4207_v28 = vpack.c.bf16 %v2793_v61, %v2792_v51  ;;  %v373_v32 = vshrl.u32 %v4193_v13, 16  ;;  %p3729_p0 = por %p3728_p13, %p3727_p11 }
  0xb1   : > { %v4210_v29 = vsel %vm328_vm1, %v359_v10, %v363_v21  ;;  %v367_v31 = vor.u32 %v365_v15, %v363_v21  ;;  %v4213_v33 = vpack.c.bf16 %v2796_v19, %v2795_v18  ;;  %v371_v35 = vrot.slane %v369_v26, 1  ;;  %v4271_v15 = vld [vmem:[%s4109_s6 + $0xb0] sm:$0xff] }
  0xb2   : > { %v1254_v34 = vsel %vm328_vm1, %v1250_v22, %v1253_v25  ;;  %v1257_v36 = vor.u32 %v1255_v23, %v1253_v25  ;;  %v1260_v37 = vrot.slane %v1258_v27, 1  ;;  %v377_v38 = vshll.u32 %v4207_v28, 16  ;;  %p3730_p4 = pnand %p3729_p0, %p3723_p10 }
  0xb3   : > { %3034 = vmatmul.mubr.msk.bf16.gmra.mrb[4].mxu1 %vm429_vm2, %v4210_v29  ;;  %v1262_v39 = vshrl.u32 %v4196_v17, 16  ;;  %v1265_v40 = vshll.u32 %v4213_v33, 16  ;;  %v4221_v42 = vpack.c.bf16 %v2795_v18, %v2794_v62  ;;  %v4227_v44 = vsel %vm328_vm1, %v367_v31, %v371_v35  ;;  %v4274_v18 = vld [vmem:[%s4109_s6 + $0xb8] sm:$0xff] }
  0xb4   : > { %v1261_v46 = vsel %vm328_vm1, %v1257_v36, %v1260_v37  ;;  %v375_v47 = vor.u32 %v373_v32, %v371_v35  ;;  %v381_v48 = vshrl.u32 %v4207_v28, 16  ;;  %3138 = vmatmul.mubr.msk.bf16.gmra.mrb[4].mxu0 %vm429_vm2, %v1254_v34  ;;  %3037 = vmatprep.mubr.msk.bf16.mxu1 %vm429_vm2, %v4227_v44  ;;  %v379_v49 = vrot.slane %v377_v38, 1 }
  0xb5   : > { %v385_v50 = vshll.u32 %v4221_v42, 16  ;;  %3141 = vmatprep.mubr.msk.bf16.mxu0 %vm429_vm2, %v1261_v46  ;;  %v1264_v51 = vor.u32 %v1262_v39, %v1260_v37  ;;  %v4236_v52 = vrot.slane %v1265_v40, 1  ;;  %v4239_v53 = vpack.c.bf16 %v4224_v43, %v2796_v19  ;;  %v311_v40 = vld [vmem:[%s4109_s6 + $0xc0] sm:$0xff] }
  0xb6   : > { %v383_v57 = vor.u32 %v381_v48, %v379_v49  ;;  %v1519_v60 = vrot.slane %v4132_v14, 1  ;;  %v1520_v61 = vrot.slane %v4144_v24, 1  ;;  %v4250_v62 = vsel %vm328_vm1, %v375_v47, %v379_v49 }
  0xb7   : > { %v387_v58 = vrot.slane %v385_v50, 1  ;;  %v389_v63 = vshrl.u32 %v4221_v42, 16  ;;  %v393_v0 = vshll.u32 %v4239_v53, 16  ;;  %v4265_v10 = vpack.c.bf16 %v4245_v55, %v4242_v54 }
  0xb8   : > { %v397_v11 = vshrl.u32 %v4239_v53, 16  ;;  %v1268_v12 = vsel %vm328_vm1, %v1264_v51, %v4236_v52  ;;  %v1521_v19 = vsel %vm770_vm3, %v1519_v60, %v1520_v61  ;;  %v4282_v22 = vpack.c.bf16 %v4258_v6, %v4255_v3 }
  0xb9   : > { %v4261_v7 = vsel %vm328_vm1, %v383_v57, %v387_v58  ;;  %v395_v20 = vrot.slane %v393_v0, 1  ;;  %v401_v21 = vshll.u32 %v4265_v10, 16  ;;  %v391_v23 = vor.u32 %v389_v63, %v387_v58  ;;  %v4315_v57 = vld [vmem:[#allocation5 + $0xe] sm:$0x3] }
  0xba   : > { %v4289_v27 = vpack.c.bf16 %v4274_v18, %v4271_v15  ;;  %v1522_v31 = vrot.slane %v4149_v30, 1  ;;  %v1524_v32 = vrot.slane %v4160_v45, 1  ;;  %v409_v34 = vshll.u32 %v4282_v22, 16 }
  0xbb   : > { %3038 = vmatmul.mubr.msk.bf16.gmra.mrb[8].mxu1 %vm429_vm2, %v4250_v62  ;;  %v399_v25 = vor.u32 %v397_v11, %v395_v20  ;;  %v403_v26 = vrot.slane %v401_v21, 1  ;;  %v4296_v35 = vsel %vm328_vm1, %v391_v23, %v395_v20  ;;  %v405_v36 = vshrl.u32 %v4265_v10, 16  ;;  %v2805_v21 = vld [vmem:[%s4109_s6 + $0xc8] sm:$0xff] }
  0xbc   : > { %3041 = vmatprep.mubr.msk.bf16.mxu1 %vm429_vm2, %v4261_v7  ;;  %3142 = vmatmul.mubr.msk.bf16.gmra.mrb[8].mxu0 %vm429_vm2, %v1268_v12  ;;  %v413_v38 = vshrl.u32 %v4282_v22, 16  ;;  %v417_v39 = vshll.u32 %v4289_v27, 16  ;;  %v1523_v46 = vsel %vm770_vm3, %v1520_v61, %v1522_v31  ;;  %v1814_v47 = vsel %vm466_vm0, %v4184_v5, 0 }
  0xbd   : > { %3159 = vmatprep.mubr.msk.bf16.mxu0 %vm429_vm2, %v1521_v19  ;;  %v4300_v37 = vsel %vm328_vm1, %v399_v25, %v403_v26  ;;  %v1525_v48 = vsel %vm770_vm3, %v1522_v31, %v1524_v32  ;;  %v411_v49 = vrot.slane %v409_v34, 1  ;;  %v407_v50 = vor.u32 %v405_v36, %v403_v26 }
  0xbe   : > { %v4313_v51 = vpack.c.bf16 %v311_v40, %v311_v40  ;;  %v419_v60 = vrot.slane %v417_v39, 1  ;;  %v1526_v5 = vrot.slane %v4181_v2, 1  ;;  %v771_v61 = vrot.slane %v4124_v8, 1 }
  0xbf   : > { %v415_v58 = vor.u32 %v413_v38, %v411_v49  ;;  %v772_v63 = vrot.slane %v4126_v9, 1  ;;  %v774_v0 = vrot.slane %v4134_v16, 1  ;;  %v1528_v11 = vrot.slane %v4196_v17, 1 }
  0xc0   : > { %v421_v12 = vshrl.u32 %v4289_v27, 16  ;;  %v4328_v19 = vsel %vm328_vm1, %v407_v50, %v411_v49  ;;  %v425_v20 = vshll.u32 %v4313_v51, 16  ;;  %v4343_v31 = vpack.c.bf16 %v2805_v21, %v311_v40 }
  0xc1   : > { %v4333_v23 = vsel %vm770_vm3, %v771_v61, %v772_v63  ;;  %v4338_v25 = vsel %vm770_vm3, %v772_v63, %v774_v0  ;;  %v4341_v26 = vsel %vm328_vm1, %v415_v58, %v419_v60  ;;  %v1527_v34 = vsel %vm770_vm3, %v1524_v32, %v1526_v5 }
  0xc2   : > { %v1529_v36 = vsel %vm770_vm3, %v1526_v5, %v1528_v11  ;;  %v4351_v38 = vpack.c.bf16 %v4242_v54, %v4224_v43  ;;  %v4355_v39 = vor.u32 %v421_v12, %v419_v60  ;;  %v1530_v32 = vrot.slane %v4213_v33, 1 }
  0xc3   : > { %3042 = vmatmul.mubr.msk.bf16.gmra.mrb[12].mxu1 %vm429_vm2, %v4296_v35  ;;  %v4366_v54 = vpack.c.bf16 %v4255_v3, %v4245_v55  ;;  %v4372_v50 = vpack.c.bf16 %v4271_v15, %v4258_v6  ;;  %v2806_v3 = vld [vmem:[%s4109_s6 + $0xd0] sm:$0xff]  ;;  %v833_v60 = vsel %vm466_vm0, %v4170_v56, 0  ;;  %v4385_v6 = vpack.c.bf16 %v311_v40, %v4274_v18  ;;  %v1028_v15 = vld [vmem:[#allocation5 + $0x6] sm:$0x3]  ;;  %v2807_v40 = vld [vmem:[%s4109_s6 + $0xd8] sm:$0xff] }
  0xc4   : > { %3045 = vmatprep.mubr.msk.bf16.mxu1 %vm429_vm2, %v4300_v37  ;;  %3160 = vmatmul.mubr.msk.bf16.vlgmr.msra.gmra.mrb[0].mxu0 %vm429_vm2, %v1523_v46  ;;  %v427_v46 = vrot.slane %v425_v20, 1  ;;  %v1531_v43 = vsel %vm770_vm3, %v1528_v11, %v1530_v32  ;;  %v4390_v61 = vpack.c.bf16 %v2806_v3, %v2805_v21  ;;  %v4401_v63 = vpack.c.bf16 %v2807_v40, %v2807_v40 }
  0xc5   : > { %3184 = vmatpush3.bf16.msra.mxu0 %v1814_v47  ;;  %3163 = vmatprep.mubr.msk.bf16.mxu0 %vm429_vm2, %v1525_v48  ;;  %v1532_v47 = vrot.slane %v4351_v38, 1  ;;  %v1534_v58 = vrot.slane %v4366_v54, 1  ;;  %v1536_v55 = vrot.slane %v4372_v50, 1  ;;  %v1538_v56 = vrot.slane %v4385_v6, 1 }
  0xc6   : > { %3463 = vmatprep.subr.msk.bf16.mxu0 %vm466_vm0, %v4315_v57  ;;  %v428_v48 = vsel %vm328_vm1, %v4355_v39, %v427_v46  ;;  %v1540_v18 = vrot.slane %v4390_v61, 1  ;;  %v1542_v12 = vrot.slane %v4401_v63, 1  ;;  %v2097_v21 = vsel %vm466_vm0, %v4315_v57, 0 }
  0xc7   : > { %v1533_v49 = vsel %vm770_vm3, %v1530_v32, %v1532_v47  ;;  %v1535_v5 = vsel %vm770_vm3, %v1532_v47, %v1534_v58  ;;  %v776_v57 = vrot.slane %v4157_v41, 1  ;;  %v2867_v32 = vld [vmem:[%s4109_s6 + $0xe8] sm:$0xff] }
  0xc8   : > { %v1541_v11 = vsel %vm770_vm3, %v1538_v56, %v1540_v18  ;;  %v1543_v20 = vsel %vm770_vm3, %v1540_v18, %v1542_v12 }
  0xc9   : > { %v777_v46 = vsel %vm770_vm3, %v774_v0, %v776_v57 }
  0xcb   : > { %3046 = vmatmul.mubr.msk.bf16.gmra.mrb[16].mxu1 %vm429_vm2, %v4328_v19 }
  0xcc   : > { %3049 = vmatprep.mubr.msk.bf16.mxu1 %vm429_vm2, %v4341_v26  ;;  %3164 = vmatmul.mubr.msk.bf16.gmra.mrb[4].mxu0 %vm429_vm2, %v1527_v34  ;;  %v2253_v34 = vld [vmem:[#allocation5 + $0x10] sm:$0x3] }
  0xcd   : > { %3167 = vmatprep.mubr.msk.bf16.mxu0 %vm429_vm2, %v1529_v36  ;;  %v1066_v36 = vsel %vm466_vm0, %v1028_v15, 0 }
  0xd3   : > { %3050 = vmatmul.mubr.msk.bf16.gmra.mrb[20].mxu1 %vm429_vm2, %v428_v48 }
  0xd4   : > { %3055 = vmatprep.mubr.msk.bf16.mxu1 %vm429_vm2, %v4124_v8  ;;  %3168 = vmatmul.mubr.msk.bf16.gmra.mrb[8].mxu0 %vm429_vm2, %v1531_v43  ;;  %v1537_v8 = vsel %vm770_vm3, %v1534_v58, %v1536_v55 }
  0xd5   : > { %3171 = vmatprep.mubr.msk.bf16.mxu0 %vm429_vm2, %v1533_v49 }
  0xdb   : > { %3056 = vmatmul.mubr.msk.bf16.vlgmr.msra.gmra.mrb[0].mxu1 %vm429_vm2, %v4126_v9  ;;  %v1539_v9 = vsel %vm770_vm3, %v1536_v55, %v1538_v56  ;;  %v2329_v55 = vsel %vm466_vm0, %v2253_v34, 0 }
  0xdc   : > { %3080 = vmatpush3.bf16.msra.mxu1 %v833_v60  ;;  %3059 = vmatprep.mubr.msk.bf16.mxu1 %vm429_vm2, %v4134_v16 }
  0xdd   : > { %3172 = vmatmul.mubr.msk.bf16.gmra.mrb[12].mxu0 %vm429_vm2, %v1535_v5  ;;  %3458 = vmatprep.subr.msk.bf16.mxu1 %vm466_vm0, %v1028_v15  ;;  %v2868_v5 = vld [vmem:[%s4109_s6 + $0xf0] sm:$0xff] }
  0xde   : > { %3175 = vmatprep.mubr.msk.bf16.mxu0 %vm429_vm2, %v1537_v8 }
  0xe3   : > { %3060 = vmatmul.mubr.msk.bf16.gmra.mrb[4].mxu1 %vm429_vm2, %v4157_v41 }
  0xe4   : > { %3063 = vmatprep.mubr.msk.bf16.mxu1 %vm429_vm2, %v4175_v59 }
  0xe5   : > { %3176 = vmatmul.mubr.msk.bf16.gmra.mrb[16].mxu0 %vm429_vm2, %v1539_v9 }
  0xe6   : > { %3179 = vmatprep.mubr.msk.bf16.mxu0 %vm429_vm2, %v1541_v11  ;;  %v1279_v11 = vshll.u32 %v4366_v54, 16 }
  0xeb   : > { %3064 = vmatmul.mubr.msk.bf16.gmra.mrb[8].mxu1 %vm429_vm2, %v4193_v13 }
  0xec   : > { %3067 = vmatprep.mubr.msk.bf16.mxu1 %vm429_vm2, %v4207_v28 }
  0xed   : > { %3180 = vmatmul.mubr.msk.bf16.gmra.mrb[20].mxu0 %vm429_vm2, %v1543_v20  ;;  %v1283_v20 = vshrl.u32 %v4366_v54, 16 }
  0xee   : > { %3185 = vmatprep.mubr.msk.bf16.mxu0 %vm429_vm2, %v4157_v41  ;;  %v780_v41 = vrot.slane %v4193_v13, 1 }
  0xf3   : > { %3068 = vmatmul.mubr.msk.bf16.gmra.mrb[12].mxu1 %vm429_vm2, %v4221_v42 }
  0xf4   : > { %3071 = vmatprep.mubr.msk.bf16.mxu1 %vm429_vm2, %v4239_v53 }
  0xf5   : > { %3186 = vmatmul.mubr.msk.bf16.vlgmr.msra.gmra.mrb[0].mxu0 %vm429_vm2, %v4175_v59 }
  0xf6   : > { %3210 = vmatpush3.bf16.msra.mxu0 %v2097_v21  ;;  %3189 = vmatprep.mubr.msk.bf16.mxu0 %vm429_vm2, %v4193_v13  ;;  %v2866_v13 = vld [vmem:[%s4109_s6 + $0xe0] sm:$0xff]  ;;  %v1286_v21 = vshll.u32 %v4372_v50, 16 }
  0xf7   : > { %3464 = vmatprep.subr.msk.bf16.mxu0 %vm466_vm0, %v2253_v34  ;;  %v4485_v48 = vpack.c.bf16 %v2867_v32, %v2866_v13  ;;  %v1281_v34 = vrot.slane %v1279_v11, 1 }
  0xf9   : > { %v2052_v56 = vshrl.u32 %v4485_v48, 16  ;;  %v2288_v32 = vrot.slane %v4485_v48, 1 }
  0xfb   : > { %3072 = vmatmul.mubr.msk.bf16.gmra.mrb[16].mxu1 %vm429_vm2, %v4265_v10 }
  0xfc   : > { %3075 = vmatprep.mubr.msk.bf16.mxu1 %vm429_vm2, %v4282_v22 }
  0xfd   : > { %3190 = vmatmul.mubr.msk.bf16.gmra.mrb[4].mxu0 %vm429_vm2, %v4207_v28 }
  0xfe   : > { %3193 = vmatprep.mubr.msk.bf16.mxu0 %vm429_vm2, %v4221_v42 }
 0x103   : > { %3076 = vmatmul.mubr.msk.bf16.gmra.mrb[20].mxu1 %vm429_vm2, %v4289_v27 }
 0x104   : > { %3081 = vmatprep.mubr.msk.bf16.mxu1 %vm429_vm2, %v4333_v23  ;;  %v778_v23 = vrot.slane %v4175_v59, 1  ;;  %v782_v59 = vrot.slane %v4207_v28, 1  ;;  %v786_v28 = vrot.slane %v4239_v53, 1 }
 0x105   : > { %3194 = vmatmul.mubr.msk.bf16.gmra.mrb[8].mxu0 %vm429_vm2, %v4239_v53  ;;  %v790_v53 = vrot.slane %v4282_v22, 1 }
 0x106   : > { %3197 = vmatprep.mubr.msk.bf16.mxu0 %vm429_vm2, %v4265_v10  ;;  %v4463_v16 = vsel %vm770_vm3, %v776_v57, %v778_v23  ;;  %v4466_v0 = vsel %vm770_vm3, %v778_v23, %v780_v41  ;;  %v4483_v47 = vsel %vm770_vm3, %v780_v41, %v782_v59  ;;  %v1290_v23 = vshrl.u32 %v4372_v50, 16 }
 0x10b   : > { %3082 = vmatmul.mubr.msk.bf16.vlgmr.msra.gmra.mrb[0].mxu1 %vm429_vm2, %v4338_v25  ;;  %v4468_v25 = vpack.c.bf16 %v2807_v40, %v2806_v3 }
 0x10c   : > { %3106 = vmatpush3.bf16.msra.mxu1 %v1066_v36  ;;  %3085 = vmatprep.mubr.msk.bf16.mxu1 %vm429_vm2, %v777_v46  ;;  %v1288_v36 = vrot.slane %v1286_v21, 1 }
 0x10d   : > { %3198 = vmatmul.mubr.msk.bf16.gmra.mrb[12].mxu0 %vm429_vm2, %v4282_v22  ;;  %3460 = vmatprep.subr.msk.bf16.mxu1 %vm466_vm0, %v4107_v1  ;;  %v784_v1 = vrot.slane %v4221_v42, 1  ;;  %v788_v42 = vrot.slane %v4265_v10, 1  ;;  %v2034_v22 = vshll.u32 %v4343_v31, 16  ;;  %v2045_v60 = vshrl.u32 %v4468_v25, 16 }
 0x10e   : > { %3201 = vmatprep.mubr.msk.bf16.mxu0 %vm429_vm2, %v4289_v27 }
 0x10f   : > { %v4488_v43 = vsel %vm770_vm3, %v782_v59, %v784_v1  ;;  %v4501_v49 = vsel %vm770_vm3, %v784_v1, %v786_v28  ;;  %v4504_v58 = vsel %vm770_vm3, %v786_v28, %v788_v42  ;;  %v4520_v10 = vsel %vm770_vm3, %v788_v42, %v790_v53 }
 0x110   : > { %v1308_v28 = vshll.u32 %v4401_v63, 16 }
 0x113   : > { %3086 = vmatmul.mubr.msk.bf16.gmra.mrb[4].mxu1 %vm429_vm2, %v4463_v16 }
 0x114   : > { %3089 = vmatprep.mubr.msk.bf16.mxu1 %vm429_vm2, %v4466_v0 }
 0x115   : > { %3202 = vmatmul.mubr.msk.bf16.gmra.mrb[16].mxu0 %vm429_vm2, %v4343_v31 }
 0x116   : > { %3205 = vmatprep.mubr.msk.bf16.mxu0 %vm429_vm2, %v4468_v25 }
 0x11b   : > { %3090 = vmatmul.mubr.msk.bf16.gmra.mrb[8].mxu1 %vm429_vm2, %v4483_v47 }
 0x11c   : > { %3093 = vmatprep.mubr.msk.bf16.mxu1 %vm429_vm2, %v4488_v43 }
 0x11d   : > { %3206 = vmatmul.mubr.msk.bf16.gmra.mrb[20].mxu0 %vm429_vm2, %v4485_v48 }
 0x11e   : > { %3211 = vmatprep.mubr.msk.bf16.mxu0 %vm429_vm2, %v4210_v29  ;;  %v4515_v29 = vrot.slane %v4289_v27, 1  ;;  %v2041_v27 = vshll.u32 %v4468_v25, 16 }
 0x120   : > { %v4524_v3 = vsel %vm770_vm3, %v790_v53, %v4515_v29 }
 0x123   : > { %3094 = vmatmul.mubr.msk.bf16.gmra.mrb[12].mxu1 %vm429_vm2, %v4501_v49 }
 0x124   : > { %3097 = vmatprep.mubr.msk.bf16.mxu1 %vm429_vm2, %v4504_v58 }
 0x125   : > { %3212 = vmatmul.mubr.msk.bf16.vlgmr.msra.gmra.mrb[0].mxu0 %vm429_vm2, %v4227_v44  ;;  %v794_v44 = vrot.slane %v4313_v51, 1 }
 0x126   : > { %3236 = vmatpush3.bf16.msra.mxu0 %v2329_v55  ;;  %3215 = vmatprep.mubr.msk.bf16.mxu0 %vm429_vm2, %v4250_v62 }
 0x127   : > { %v795_v62 = vsel %vm770_vm3, %v4515_v29, %v794_v44 }
 0x12b   : > { %3098 = vmatmul.mubr.msk.bf16.gmra.mrb[16].mxu1 %vm429_vm2, %v4520_v10 }
 0x12c   : > { %3101 = vmatprep.mubr.msk.bf16.mxu1 %vm429_vm2, %v4524_v3 }
 0x12d   : > { %3216 = vmatmul.mubr.msk.bf16.gmra.mrb[4].mxu0 %vm429_vm2, %v4261_v7  ;;  %v2036_v7 = vrot.slane %v2034_v22, 1 }
 0x12e   : > { %3219 = vmatprep.mubr.msk.bf16.mxu0 %vm429_vm2, %v4296_v35  ;;  %v2038_v35 = vshrl.u32 %v4343_v31, 16 }
 0x12f   : > { %v2037_v51 = vsel %vm328_vm1, %v4355_v39, %v2036_v7 }
 0x133   : > { %3102 = vmatmul.mubr.msk.bf16.gmra.mrb[20].mxu1 %vm429_vm2, %v795_v62 }
 0x134   : > { %3107 = vmatprep.mubr.msk.bf16.mxu1 %vm429_vm2, %v4132_v14  ;;  %v2048_v14 = vshll.u32 %v4485_v48, 16 }
 0x135   : > { %3220 = vmatmul.mubr.msk.bf16.gmra.mrb[8].mxu0 %vm429_vm2, %v4300_v37  ;;  %v2043_v37 = vrot.slane %v2041_v27, 1 }
 0x136   : > { %3223 = vmatprep.mubr.msk.bf16.mxu0 %vm429_vm2, %v4328_v19  ;;  %v4560_v19 = vpack.c.bf16 %v2868_v5, %v2868_v5  ;;  %v2050_v15 = vrot.slane %v2048_v14, 1  ;;  %v4645_v5 = vld [vmem:[#allocation7] ss:$0 sm:$0xff] }
 0x137   : > { %v2047_v39 = vor.u32 %v2045_v60, %v2043_v37 }
 0x13b   : > { %3108 = vmatmul.mubr.msk.bf16.vlgmr.msra.gmra.mrb[0].mxu1 %vm429_vm2, %v4144_v24  ;;  %v2040_v24 = vor.u32 %v2038_v35, %v2036_v7 }
 0x13c   : > { %3262 = vmatpush3.bf16.msra.mxu1 %v4118_v4  ;;  %3111 = vmatprep.mubr.msk.bf16.mxu1 %vm429_vm2, %v4149_v30  ;;  %v2056_v4 = vshll.u32 %v4560_v19, 16  ;;  %v2051_v30 = vsel %vm328_vm1, %v2047_v39, %v2050_v15 }
 0x13d   : > { %3224 = vmatmul.mubr.msk.bf16.gmra.mrb[12].mxu0 %vm429_vm2, %v4341_v26  ;;  %v2044_v8 = vsel %vm328_vm1, %v2040_v24, %v2043_v37  ;;  %v2054_v26 = vor.u32 %v2052_v56, %v2050_v15 }
 0x13e   : > { %3227 = vmatprep.mubr.msk.bf16.mxu0 %vm429_vm2, %v2037_v51  ;;  %v2058_v18 = vrot.slane %v2056_v4, 1 }
 0x140   : > { %v2059_v40 = vsel %vm328_vm1, %v2054_v26, %v2058_v18 }
 0x143   : > { %3112 = vmatmul.mubr.msk.bf16.gmra.mrb[4].mxu1 %vm429_vm2, %v4160_v45  ;;  %v1269_v45 = vshrl.u32 %v4213_v33, 16 }
 0x144   : > { %3115 = vmatprep.mubr.msk.bf16.mxu1 %vm429_vm2, %v4181_v2  ;;  %v1272_v2 = vshll.u32 %v4351_v38, 16 }
 0x145   : > { %3228 = vmatmul.mubr.msk.bf16.gmra.mrb[16].mxu0 %vm429_vm2, %v2044_v8 }
 0x146   : > { %3231 = vmatprep.mubr.msk.bf16.mxu0 %vm429_vm2, %v2051_v30  ;;  %v1274_v9 = vrot.slane %v1272_v2, 1 }
 0x14b   : > { %3116 = vmatmul.mubr.msk.bf16.gmra.mrb[8].mxu1 %vm429_vm2, %v4196_v17  ;;  %v1271_v17 = vor.u32 %v1269_v45, %v4236_v52  ;;  %v1285_v52 = vor.u32 %v1283_v20, %v1281_v34 }
 0x14c   : > { %3119 = vmatprep.mubr.msk.bf16.mxu1 %vm429_vm2, %v4213_v33  ;;  %v1276_v33 = vshrl.u32 %v4351_v38, 16 }
 0x14d   : > { %3232 = vmatmul.mubr.msk.bf16.gmra.mrb[20].mxu0 %vm429_vm2, %v2059_v40  ;;  %v1275_v12 = vsel %vm328_vm1, %v1271_v17, %v1274_v9  ;;  %v1289_v41 = vsel %vm328_vm1, %v1285_v52, %v1288_v36 }
 0x14e   : > { %3237 = vmatprep.mubr.msk.bf16.mxu0 %vm429_vm2, %v4463_v16  ;;  %v1278_v57 = vor.u32 %v1276_v33, %v1274_v9  ;;  %v1297_v16 = vshrl.u32 %v4385_v6, 16 }
 0x150   : > { %v1282_v46 = vsel %vm328_vm1, %v1278_v57, %v1281_v34 }
 0x153   : > { %3120 = vmatmul.mubr.msk.bf16.gmra.mrb[12].mxu1 %vm429_vm2, %v4351_v38  ;;  %v2284_v38 = vrot.slane %v4343_v31, 1  ;;  %v1292_v31 = vor.u32 %v1290_v23, %v1288_v36 }
 0x154   : > { %3123 = vmatprep.mubr.msk.bf16.mxu1 %vm429_vm2, %v4366_v54  ;;  %v1293_v54 = vshll.u32 %v4385_v6, 16 }
 0x155   : > { %3238 = vmatmul.mubr.msk.bf16.vlgmr.msra.gmra.mrb[0].mxu0 %vm429_vm2, %v4466_v0  ;;  %v1300_v0 = vshll.u32 %v4390_v61, 16  ;;  %v2285_v59 = vsel %vm770_vm3, %v4515_v29, %v2284_v38 }
 0x156   : > { %3241 = vmatprep.mubr.msk.bf16.mxu0 %vm429_vm2, %v4483_v47  ;;  %v1295_v1 = vrot.slane %v1293_v54, 1 }
 0x158   : > { %v1299_v13 = vor.u32 %v1297_v16, %v1295_v1  ;;  %v1296_v47 = vsel %vm328_vm1, %v1292_v31, %v1295_v1 }
 0x15b   : > { %3124 = vmatmul.mubr.msk.bf16.gmra.mrb[16].mxu1 %vm429_vm2, %v4372_v50  ;;  %v1302_v50 = vrot.slane %v1300_v0, 1 }
 0x15c   : > { %3127 = vmatprep.mubr.msk.bf16.mxu1 %vm429_vm2, %v4385_v6  ;;  %v2286_v6 = vrot.slane %v4468_v25, 1  ;;  %v1310_v25 = vrot.slane %v1308_v28, 1 }
 0x15d   : > { %3242 = vmatmul.mubr.msk.bf16.gmra.mrb[4].mxu0 %vm429_vm2, %v4488_v43  ;;  %v1304_v43 = vshrl.u32 %v4390_v61, 16  ;;  %v1303_v42 = vsel %vm328_vm1, %v1299_v13, %v1302_v50 }
 0x15e   : > { %3245 = vmatprep.mubr.msk.bf16.mxu0 %vm429_vm2, %v4501_v49  ;;  %v2287_v49 = vsel %vm770_vm3, %v2284_v38, %v2286_v6 }
 0x15f   : > { %v1306_v55 = vor.u32 %v1304_v43, %v1302_v50 }
 0x161   : > { %v1311_v63 = vsel %vm328_vm1, %v1306_v55, %v1310_v25 }
 0x163   : > { %3128 = vmatmul.mubr.msk.bf16.gmra.mrb[20].mxu1 %vm429_vm2, %v4390_v61  ;;  %v2290_v61 = vrot.slane %v4560_v19, 1  ;;  %v4649_v19 = vld [vmem:[#allocation8] ss:$0 sm:$0xff] }
 0x164   : > { %3145 = vmatprep.mubr.msk.bf16.mxu1 %vm429_vm2, %v1275_v12 }
 0x165   : > { %3246 = vmatmul.mubr.msk.bf16.gmra.mrb[8].mxu0 %vm429_vm2, %v4504_v58  ;;  %v2289_v58 = vsel %vm770_vm3, %v2286_v6, %v2288_v32  ;;  %v2291_v48 = vsel %vm770_vm3, %v2288_v32, %v2290_v61 }
 0x166   : > { %3249 = vmatprep.mubr.msk.bf16.mxu0 %vm429_vm2, %v4520_v10 }
 0x16b   : > { %3146 = vmatmul.mubr.msk.bf16.vlgmr.msra.gmra.mrb[12].mxu1 %vm429_vm2, %v1282_v46 }
 0x16c   : > { %3149 = vmatprep.mubr.msk.bf16.mxu1 %vm429_vm2, %v1289_v41 }
 0x16d   : > { %3250 = vmatmul.mubr.msk.bf16.gmra.mrb[12].mxu0 %vm429_vm2, %v4524_v3 }
 0x16e   : > { %3253 = vmatprep.mubr.msk.bf16.mxu0 %vm429_vm2, %v2285_v59 }
 0x173   : > { %3150 = vmatmul.mubr.msk.bf16.gmra.mrb[16].mxu1 %vm429_vm2, %v1296_v47 }
 0x174   : > { %3153 = vmatprep.mubr.msk.bf16.mxu1 %vm429_vm2, %v1303_v42 }
 0x175   : > { %3254 = vmatmul.mubr.msk.bf16.gmra.mrb[16].mxu0 %vm429_vm2, %v2287_v49 }
 0x176   : > { %3257 = vmatprep.mubr.msk.bf16.mxu0 %vm429_vm2, %v2289_v58 }
 0x17b   : > { %3154 = vmatmul.mubr.msk.bf16.gmra.mrb[20].mxu1 %vm429_vm2, %v1311_v63 }
 0x17d   : > { %3258 = vmatmul.mubr.msk.bf16.gmra.mrb[20].mxu0 %vm429_vm2, %v2291_v48 }
 0x20e   : > { %v3109_v53 = vpop.f32.mrb[0].mxu1 }
 0x20f   : > { %v1102_v29 = vpop.f32.mrb[1].mxu1 }
 0x210   : > { %v3110_v10 = vpop.f32.mrb[2].mxu1 }
 0x211   : > { %v1105_v3 = vpop.f32.mrb[3].mxu1 }
 0x216   : > { %v3113_v44 = vpop.f32.mrb[4].mxu1 }
 0x217   : > { %v1118_v62 = vpop.f32.mrb[5].mxu1 }
 0x218   : > { %v3114_v22 = vpop.f32.mrb[6].mxu1 }
 0x219   : > { %v1121_v7 = vpop.f32.mrb[7].mxu1 }
 0x21e   : > { %v3117_v27 = vpop.f32.mrb[8].mxu1 }
 0x21f   : > { %v1134_v35 = vpop.f32.mrb[9].mxu1 }
 0x220   : > { %v3118_v51 = vpop.f32.mrb[10].mxu1 }
 0x221   : > { %v4642_v60 = vpop.f32.mrb[11].mxu1 }
 0x228   : > { %v3239_v14 = vpop.f32.mrb[0].mxu0 }
 0x229   : > { %v3263_v37 = vadd.f32 %v3239_v14, %v3109_v53  ;;  %v2365_v24 = vpop.f32.mrb[1].mxu0 }
 0x22a   : > { %v3264_v39 = vadd.f32 %v2365_v24, %v1102_v29  ;;  %v3240_v15 = vpop.f32.mrb[2].mxu0 }
 0x22b   : > { %v2493_v8 = vmul.f32 %v3263_v37, %v4645_v5  ;;  %v3265_v56 = vadd.f32 %v3240_v15, %v3110_v10  ;;  %v2368_v4 = vpop.f32.mrb[3].mxu0 }
 0x22c   : > { %v2491_v30 = vmul.f32 %v3264_v39, %v4645_v5  ;;  %v3266_v26 = vadd.f32 %v2368_v4, %v1105_v3 }
 0x22d   : > { %v2524_v18 = vadd.f32 %v4649_v19, %v2493_v8  ;;  %v2494_v40 = vmul.f32 %v3265_v56, %v4645_v5 }
 0x22e   : > { %v2522_v45 = vadd.f32 %v4649_v19, %v2491_v30  ;;  %v2492_v2 = vmul.f32 %v3266_v26, %v4645_v5 }
 0x22f   : > { %v2548_v17 = vmax.f32 %v2524_v18, 0.0  ;;  %v2525_v9 = vadd.f32 %v4649_v19, %v2494_v40 }
 0x230   : > { %v2546_v11 = vmax.f32 %v2522_v45, 0.0  ;;  %v2523_v33 = vadd.f32 %v4649_v19, %v2492_v2  ;;  %v3243_v12 = vpop.f32.mrb[4].mxu0 }
 0x231   : > { %2572 = vst [vmem:[%s4659_s30 + $0x10] sm:$0xff] %v2548_v17  ;;  %v2549_v20 = vmax.f32 %v2525_v9, 0.0  ;;  %v3267_v21 = vadd.f32 %v3243_v12, %v3113_v44  ;;  %v2381_v34 = vpop.f32.mrb[5].mxu0 }
 0x232   : > { %2570 = vst [vmem:[%s4659_s30] sm:$0xff] %v2546_v11  ;;  %v2547_v57 = vmax.f32 %v2523_v33, 0.0  ;;  %v3268_v52 = vadd.f32 %v2381_v34, %v1118_v62  ;;  %v3244_v36 = vpop.f32.mrb[6].mxu0 }
 0x233   : > { %2573 = vst [vmem:[%s4659_s30 + $0x18] sm:$0xff] %v2549_v20  ;;  %v2497_v38 = vmul.f32 %v3267_v21, %v4645_v5  ;;  %v3269_v54 = vadd.f32 %v3244_v36, %v3114_v22  ;;  %v2384_v46 = vpop.f32.mrb[7].mxu0 }
 0x234   : > { %2571 = vst [vmem:[%s4659_s30 + $0x8] sm:$0xff] %v2547_v57  ;;  %v2495_v23 = vmul.f32 %v3268_v52, %v4645_v5  ;;  %v3270_v41 = vadd.f32 %v2384_v46, %v1121_v7 }
 0x235   : > { %v2528_v16 = vadd.f32 %v4649_v19, %v2497_v38  ;;  %v2498_v0 = vmul.f32 %v3269_v54, %v4645_v5 }
 0x236   : > { %v2526_v59 = vadd.f32 %v4649_v19, %v2495_v23  ;;  %v2496_v1 = vmul.f32 %v3270_v41, %v4645_v5 }
 0x237   : > { %v2552_v31 = vmax.f32 %v2528_v16, 0.0  ;;  %v2529_v13 = vadd.f32 %v4649_v19, %v2498_v0 }
 0x238   : > { %v2550_v50 = vmax.f32 %v2526_v59, 0.0  ;;  %v2527_v6 = vadd.f32 %v4649_v19, %v2496_v1  ;;  %v3247_v32 = vpop.f32.mrb[8].mxu0 }
 0x239   : > { %2576 = vst [vmem:[%s4659_s30 + $0x30] sm:$0xff] %v2552_v31  ;;  %v2553_v47 = vmax.f32 %v2529_v13, 0.0  ;;  %v3271_v43 = vadd.f32 %v3247_v32, %v3117_v27  ;;  %v2397_v28 = vpop.f32.mrb[9].mxu0 }
 0x23a   : > { %2574 = vst [vmem:[%s4659_s30 + $0x20] sm:$0xff] %v2550_v50  ;;  %v2551_v42 = vmax.f32 %v2527_v6, 0.0  ;;  %v3272_v49 = vadd.f32 %v2397_v28, %v1134_v35  ;;  %v3248_v58 = vpop.f32.mrb[10].mxu0 }
 0x23b   : > { %2577 = vst [vmem:[%s4659_s30 + $0x38] sm:$0xff] %v2553_v47  ;;  %v2501_v55 = vmul.f32 %v3271_v43, %v4645_v5  ;;  %v3273_v25 = vadd.f32 %v3248_v58, %v3118_v51  ;;  %v2400_v61 = vpop.f32.mrb[11].mxu0 }
 0x23c   : > { %2575 = vst [vmem:[%s4659_s30 + $0x28] sm:$0xff] %v2551_v42  ;;  %v2499_v63 = vmul.f32 %v3272_v49, %v4645_v5  ;;  %v3274_v48 = vadd.f32 %v2400_v61, %v4642_v60 }
 0x23d   : > { %v2532_v53 = vadd.f32 %v4649_v19, %v2501_v55  ;;  %v2502_v29 = vmul.f32 %v3273_v25, %v4645_v5 }
 0x23e   : > { %v2530_v10 = vadd.f32 %v4649_v19, %v2499_v63  ;;  %v2500_v3 = vmul.f32 %v3274_v48, %v4645_v5  ;;  %v3147_v44 = vpop.f32.mrb[12].mxu1 }
 0x23f   : > { %v2556_v62 = vmax.f32 %v2532_v53, 0.0  ;;  %v2533_v22 = vadd.f32 %v4649_v19, %v2502_v29  ;;  %v1433_v7 = vpop.f32.mrb[13].mxu1 }
 0x240   : > { %v2554_v27 = vmax.f32 %v2530_v10, 0.0  ;;  %v2531_v35 = vadd.f32 %v4649_v19, %v2500_v3  ;;  %v3251_v51 = vpop.f32.mrb[12].mxu0  ;;  %v3148_v60 = vpop.f32.mrb[14].mxu1 }
 0x241   : > { %2580 = vst [vmem:[%s4659_s30 + $0x50] sm:$0xff] %v2556_v62  ;;  %v2557_v14 = vmax.f32 %v2533_v22, 0.0  ;;  %v3275_v37 = vadd.f32 %v3251_v51, %v3147_v44  ;;  %v2413_v24 = vpop.f32.mrb[13].mxu0  ;;  %v1436_v39 = vpop.f32.mrb[15].mxu1 }
 0x242   : > { %2578 = vst [vmem:[%s4659_s30 + $0x40] sm:$0xff] %v2554_v27  ;;  %v2555_v15 = vmax.f32 %v2531_v35, 0.0  ;;  %v3276_v8 = vadd.f32 %v2413_v24, %v1433_v7  ;;  %v3252_v56 = vpop.f32.mrb[14].mxu0 }
 0x243   : > { %2581 = vst [vmem:[%s4659_s30 + $0x58] sm:$0xff] %v2557_v14  ;;  %v2505_v4 = vmul.f32 %v3275_v37, %v4645_v5  ;;  %v3277_v30 = vadd.f32 %v3252_v56, %v3148_v60  ;;  %v2416_v26 = vpop.f32.mrb[15].mxu0 }
 0x244   : > { %2579 = vst [vmem:[%s4659_s30 + $0x48] sm:$0xff] %v2555_v15  ;;  %v2503_v18 = vmul.f32 %v3276_v8, %v4645_v5  ;;  %v3278_v40 = vadd.f32 %v2416_v26, %v1436_v39 }
 0x245   : > { %v2536_v45 = vadd.f32 %v4649_v19, %v2505_v4  ;;  %v2506_v2 = vmul.f32 %v3277_v30, %v4645_v5 }
 0x246   : > { %v2534_v17 = vadd.f32 %v4649_v19, %v2503_v18  ;;  %v2504_v9 = vmul.f32 %v3278_v40, %v4645_v5  ;;  %v3151_v11 = vpop.f32.mrb[16].mxu1 }
 0x247   : > { %v2560_v33 = vmax.f32 %v2536_v45, 0.0  ;;  %v2537_v12 = vadd.f32 %v4649_v19, %v2506_v2  ;;  %v1449_v20 = vpop.f32.mrb[17].mxu1 }
 0x248   : > { %v2558_v21 = vmax.f32 %v2534_v17, 0.0  ;;  %v2535_v34 = vadd.f32 %v4649_v19, %v2504_v9  ;;  %v3255_v57 = vpop.f32.mrb[16].mxu0  ;;  %v3152_v52 = vpop.f32.mrb[18].mxu1 }
 0x249   : > { %2584 = vst [vmem:[%s4659_s30 + $0x70] sm:$0xff] %v2560_v33  ;;  %v2561_v36 = vmax.f32 %v2537_v12, 0.0  ;;  %v3279_v38 = vadd.f32 %v3255_v57, %v3151_v11  ;;  %v2429_v54 = vpop.f32.mrb[17].mxu0  ;;  %v1452_v46 = vpop.f32.mrb[19].mxu1 }
 0x24a   : > { %2582 = vst [vmem:[%s4659_s30 + $0x60] sm:$0xff] %v2558_v21  ;;  %v2559_v23 = vmax.f32 %v2535_v34, 0.0  ;;  %v3280_v41 = vadd.f32 %v2429_v54, %v1449_v20  ;;  %v3256_v16 = vpop.f32.mrb[18].mxu0 }
 0x24b   : > { %2585 = vst [vmem:[%s4659_s30 + $0x78] sm:$0xff] %v2561_v36  ;;  %v2509_v0 = vmul.f32 %v3279_v38, %v4645_v5  ;;  %v3281_v59 = vadd.f32 %v3256_v16, %v3152_v52  ;;  %v2432_v1 = vpop.f32.mrb[19].mxu0 }
 0x24c   : > { %2583 = vst [vmem:[%s4659_s30 + $0x68] sm:$0xff] %v2559_v23  ;;  %v2507_v31 = vmul.f32 %v3280_v41, %v4645_v5  ;;  %v3282_v13 = vadd.f32 %v2432_v1, %v1452_v46 }
 0x24d   : > { %v2540_v50 = vadd.f32 %v4649_v19, %v2509_v0  ;;  %v2510_v6 = vmul.f32 %v3281_v59, %v4645_v5 }
 0x24e   : > { %v2538_v32 = vadd.f32 %v4649_v19, %v2507_v31  ;;  %v2508_v47 = vmul.f32 %v3282_v13, %v4645_v5  ;;  %v3155_v43 = vpop.f32.mrb[20].mxu1 }
 0x24f   : > { %v2564_v28 = vmax.f32 %v2540_v50, 0.0  ;;  %v2541_v42 = vadd.f32 %v4649_v19, %v2510_v6  ;;  %v1465_v49 = vpop.f32.mrb[21].mxu1 }
 0x250   : > { %v2562_v58 = vmax.f32 %v2538_v32, 0.0  ;;  %v2539_v55 = vadd.f32 %v4649_v19, %v2508_v47  ;;  %v3259_v25 = vpop.f32.mrb[20].mxu0  ;;  %v3156_v61 = vpop.f32.mrb[22].mxu1 }
 0x251   : > { %2588 = vst [vmem:[%s4659_s30 + $0x90] sm:$0xff] %v2564_v28  ;;  %v2565_v63 = vmax.f32 %v2541_v42, 0.0  ;;  %v3283_v48 = vadd.f32 %v3259_v25, %v3155_v43  ;;  %v2445_v53 = vpop.f32.mrb[21].mxu0  ;;  %v1468_v29 = vpop.f32.mrb[23].mxu1 }
 0x252   : > { %2586 = vst [vmem:[%s4659_s30 + $0x80] sm:$0xff] %v2562_v58  ;;  %v2563_v10 = vmax.f32 %v2539_v55, 0.0  ;;  %v3284_v3 = vadd.f32 %v2445_v53, %v1465_v49  ;;  %v3260_v44 = vpop.f32.mrb[22].mxu0 }
 0x253   : > { %2589 = vst [vmem:[%s4659_s30 + $0x98] sm:$0xff] %v2565_v63  ;;  %v2513_v62 = vmul.f32 %v3283_v48, %v4645_v5  ;;  %v3285_v22 = vadd.f32 %v3260_v44, %v3156_v61  ;;  %v2448_v7 = vpop.f32.mrb[23].mxu0 }
 0x254   : > { %2587 = vst [vmem:[%s4659_s30 + $0x88] sm:$0xff] %v2563_v10  ;;  %v2511_v27 = vmul.f32 %v3284_v3, %v4645_v5  ;;  %v3286_v35 = vadd.f32 %v2448_v7, %v1468_v29 }
 0x255   : > { %v2544_v51 = vadd.f32 %v4649_v19, %v2513_v62  ;;  %v2514_v60 = vmul.f32 %v3285_v22, %v4645_v5 }
 0x256   : > { %v2542_v14 = vadd.f32 %v4649_v19, %v2511_v27  ;;  %v2512_v37 = vmul.f32 %v3286_v35, %v4645_v5 }
 0x257   : > { %v2568_v24 = vmax.f32 %v2544_v51, 0.0  ;;  %v2545_v39 = vadd.f32 %v4649_v19, %v2514_v60 }
 0x258   : > { %v2566_v15 = vmax.f32 %v2542_v14, 0.0  ;;  %v2543_v8 = vadd.f32 %v4649_v19, %v2512_v37 }
 0x259   : > { %2592 = vst [vmem:[%s4659_s30 + $0xb0] sm:$0xff] %v2568_v24  ;;  %v2569_v56 = vmax.f32 %v2545_v39, 0.0 }
 0x25a   : > { %2590 = vst [vmem:[%s4659_s30 + $0xa0] sm:$0xff] %v2566_v15  ;;  %v2567_v5 = vmax.f32 %v2543_v8, 0.0 }
 0x25b   : > { %2593 = vst [vmem:[%s4659_s30 + $0xb8] sm:$0xff] %v2569_v56 }
 0x25c   : > { %2591 = vst [vmem:[%s4659_s30 + $0xa8] sm:$0xff] %v2567_v5 }
 0x25d   : > { %3733 = shalt.err (!%p3730_p4)
}
 0x25e   : > { %s3734_s23 = scalar_lea.hbm %s4729_s1, 3072  ;;  %s3738_s20 = scalar_lea.hbm %s4803_s4, 12288 }
 0x25f   : > { %p3735_p2 = scmp.ne.s32.totalorder %s4729_s1, %s3734_s23  ;;  %p3739_p6 = scmp.lt.u32.totalorder %s4729_s1, %s4803_s4 }
 0x260   : > { %p3740_p7 = scmp.lt.u32.totalorder %s3738_s20, %s3734_s23  ;;  %p3742_p8 = scmp.lt.u32.totalorder %s3734_s23, %s4729_s1 }
 0x261   : > { %p3736_p12 = pnand %p3735_p2, %p4849_p1 }
 0x262   : > { %p3741_p9 = por %p3740_p7, %p3739_p6 }
 0x263   : > { %p3737_p5 = pneg %p3736_p12 }
 0x264   : > { %p3743_p3 = por %p3742_p8, %p3741_p9 }
 0x266   : > { %p3744_p10 = pnand %p3743_p3, %p3737_p5 }
 0x268   : > { %3747 = shalt.err (!%p3744_p10)
}
 0x269   : > { %s3861_s6 = smov 128   ;;  %s3862_s5 = smov 8  }
 0x26a   : > { %3482 = dma.vmem_to_hbm [thread:$0]  (%p4849_p1), %s4731_s7, 3072, %s4729_s1, %s4738_s17, %s3861_s6, %s3861_s6, %s3862_s5  }
 0x26b PF: > { %p3507_p11 = scmp.ge.s32.totalorder %s3850_s25, 2  ;;  %s2626_s18 = sand.u32 1, %s3810_s15  }
 0x26c   : > { %p4850_p13 = scmp.ne.s32.totalorder %s4834_s12, 0  ;;  %s2627_s30 = scalar_lea.sflag [#allocation4], %s2626_s18 }
 0x26e   : > { %p3498_p0 = pnand %p3507_p11, %p4850_p13 }
 0x270   : > { %3805 = dma.done.wait (!%p3498_p0), %s2627_s30, 3072  }
 0x271   : > { %3807 = vsyncadd (!%p3498_p0), %s2627_s30, 4294964224  ;;  %s20_s25 = sadd.s32 1, %s3850_s25   ;;  %s4851_s29 = sld [smem:[#allocation15_spill]] }
 0x272   : > { %p17_p4 = scmp.ge.s32.totalorder %s20_s25, 6   ;;  %s4852_s17 = sld [smem:[#allocation23_spill]] }
 0x273   : > { %s4853_s18 = sld [smem:[#allocation16_spill]]  ;;  %s4854_s19 = sld [smem:[#allocation17_spill]] }
 0x274   : > { %s4855_s20 = sld [smem:[#allocation22_spill]]  ;;  %s4856_s21 = sld [smem:[#allocation18_spill]] }
 0x275   : > { %s4857_s22 = sld [smem:[#allocation19_spill]]  ;;  %s4858_s23 = sld [smem:[#allocation20_spill]] }
 0x276   : > { %s4859_s24 = sld [smem:[#allocation21_spill]]  ;;  %s4860_s15 = smov %s3814_s16 }
 0x277   : > { %s4861_s16 = smov %s4851_s29  ;;  %19 = sbr.rel (!%p17_p4) target bundleno = 13 (0xd), region = 100 }
 0x27e   :  { %2632 = vsyncpa [#allocation3], 1 }
 0x27f   :  { %2634 = vsyncpa [#allocation3 + $0x1], 1 }
 0x280   :  { %2635 = vsyncpa [#allocation6], 1 }
 0x281   :  { %2636 = vsyncpa [#allocation9], 1 }
 0x282   :  { %2637 = vsyncpa [#allocation4], 1 }
 0x283   :  { %2639 = vsyncpa [#allocation4 + $0x1], 1 }

// kernel: conv_bn_relu.1
= control target key start
LH: loop header
LB: loop body
LE: loop exit
PB: predicated region body
PF: predicated region fallthrough
CT: control target
= control target key end

     0   :  { %s4870_s0 = inlined_call_operand.hbm [shape: f32[2,456,4], index: 0, kind: input, shape index: {}]   ;;  %s4871_s1 = inlined_call_operand.hbm [shape: bf16[9,4,128], index: 1, kind: input, shape index: {}]   ;;  %s4872_s2 = inlined_call_operand.hbm [shape: f32[1,128], index: 2, kind: input, shape index: {}]   ;;  %s4873_s3 = inlined_call_operand.hbm [shape: f32[1,128], index: 3, kind: input, shape index: {}]   ;;  %s4874_s4 = inlined_call_operand.hbm [shape: f32[2,384,128], index: 4, kind: output, shape index: {}]  }
   0x1   :  { %4885 = sst [smem:[#allocation19_spill]] %s4871_s1 }
   0x2   :  { %4886 = sst [smem:[#allocation20_spill]] %s4872_s2 }
   0x3   :  { %4887 = sst [smem:[#allocation21_spill]] %s4874_s4 }
   0x4   :  { %9 = vsyncpa [#allocation3], 0 }
   0x5   :  { %11 = vsyncpa [#allocation3 + $0x1], 0 }
   0x6   :  { %12 = vsyncpa [#allocation6], 0 }
   0x7   :  { %13 = vsyncpa [#allocation9], 0 }
   0x8   :  { %14 = vsyncpa [#allocation4], 0 }
   0x9   :  { %16 = vsyncpa [#allocation4 + $0x1], 0  ;;  %s3918_s15 = smov 0   ;;  %s3920_s16 = smov 0  }
   0xa   :  { %s3922_s17 = smov 0   ;;  %s3924_s18 = smov 0  }
   0xb   :  { %s3926_s19 = smov 0   ;;  %s3928_s20 = smov 0  }
   0xc   :  { %s3930_s21 = smov 0   ;;  %s3932_s22 = smov 0  }
   0xd   :  { %s3934_s23 = smov 0   ;;  %s3936_s24 = smov 0  }
   0xe   :  { %s3938_s25 = smov 0  }
   0xf LB: > { %4888 = sst [smem:[#allocation15_spill]] %s3840_s15  ;;  %s2762_s26 = sadd.s32 4294967295, %s3880_s25   ;;  %s3880_s25 = sphi %s3938_s25, %s22_s25   ;;  %s3876_s24 = sphi %s3936_s24, %s4925_s24   ;;  %s3872_s23 = sphi %s3934_s23, %s4924_s23   ;;  %s3868_s22 = sphi %s3932_s22, %s4923_s22   ;;  %s3864_s21 = sphi %s3930_s21, %s4922_s21   ;;  %s3860_s20 = sphi %s3928_s20, %s4921_s20   ;;  %s3856_s19 = sphi %s3926_s19, %s4920_s19   ;;  %s3852_s18 = sphi %s3924_s18, %s4919_s18   ;;  %s3848_s17 = sphi %s3922_s17, %s4918_s17   ;;  %s3844_s16 = sphi %s3920_s16, %s4917_s16   ;;  %s3840_s15 = sphi %s3918_s15, %s4916_s15  }
  0x10   : > { %4889 = sst [smem:[#allocation16_spill]] %s3868_s22  ;;  %s2763_s27 = sadd.s32 4294967294, %s3880_s25  }
  0x11   : > { %p61_p0 = scmp.ne.s32.totalorder %s3856_s19, %s3852_s18  ;;  %p3974_p1 = scmp.eq.s32.totalorder %s2762_s26, 0 }
  0x12   : > { %p166_p2 = scmp.ne.s32.totalorder %s3848_s17, %s3844_s16  ;;  %p167_p4 = scmp.eq.s32.totalorder %s2762_s26, 3 }
  0x13   : > { %s4890_s28 = scalar_select %p3974_p1, 1, 0 }
  0x14   : > { %p3983_p3 = por %p3974_p1, %p61_p0  ;;  %p172_p5 = scmp.ne.s32.totalorder %s3844_s16, %s3840_s15 }
  0x15   : > { %p173_p6 = scmp.eq.s32.totalorder %s2763_s27, 3  ;;  %p3989_p7 = por %p167_p4, %p166_p2 }
  0x16   : > { %s4891_s30 = scalar_select %p3983_p3, 1, 0 }
  0x17   : > { %s4892_s5 = scalar_select %p3989_p7, 1, 0 }
  0x18   : > { %p2764_p8 = scmp.ge.s32.totalorder %s3880_s25, 1  ;;  %p3994_p9 = por %p173_p6, %p172_p5 }
  0x19   : > { %4893 = sst [smem:[#allocation17_spill]] %s4892_s5  ;;  %p180_p10 = scmp.lt.s32.totalorder %s3880_s25, 5 }
  0x1a   : > { %s4894_s6 = scalar_select %p3994_p9, 1, 0 }
  0x1b   : > { %p3999_p11 = pnand %p2764_p8, %p180_p10  ;;  %s3882_s8 = smov [#allocation5]  }
  0x1c   : > { %4895 = sst [smem:[#allocation18_spill]] %s4894_s6  ;;  %s194_s9 = sshll.u32 %s3882_s8, 4  ;;  %s4003_s9 = int_to_ptr.vmem [resolvable:$true] %s194_s9 }
  0x1d   : > { %s4896_s7 = scalar_select %p3999_p11, 1, 0 }
  0x1e   : > { %p3513_p12 = pneg %p3999_p11  ;;  %s3883_s11 = smov [#allocation7]  }
  0x1f   : > { %s210_s12 = sshll.u32 %s3883_s11, 4  ;;  %s3884_s13 = smov [#allocation8]   ;;  %s4013_s12 = int_to_ptr.vmem [resolvable:$true] %s210_s12 }
  0x20   : > { %p4009_p13 = pnand %p3513_p12, %p3974_p1  ;;  %s4015_s14 = sshll.u32 %s3884_s13, 4  ;;  %s224_s14 = int_to_ptr.vmem [resolvable:$true] %s4015_s14 }
  0x21   : > { %s4898_s1 = sld [smem:[#allocation19_spill]] }
  0x22   : > { %p4025_p2 = pneg %p4009_p13 }
  0x27   : > { %s3636_s27 = scalar_lea.hbm %s4898_s1, 288 }
  0x28   : > { %p3637_p0 = scmp.ne.s32.totalorder %s4898_s1, %s3636_s27  ;;  %p3643_p6 = scmp.lt.u32.totalorder %s3636_s27, %s4898_s1 }
  0x2a   : > { %p3639_p4 = pnand %p4025_p2, %p3637_p0 }
  0x2c   : > { %p3640_p5 = pneg %p3639_p4 }
  0x2e   : > { %p3645_p8 = pnand %p3643_p6, %p3640_p5 }
  0x30   : > { %3648 = shalt.err (!%p3645_p8)
}
  0x31   : > { %s3649_s29 = scalar_lea.vmem %s4003_s9, 288  ;;  %p3657_p7 = scmp.lt.s32.totalorder %s4003_s9, %s4003_s9 }
  0x32   : > { %p3650_p10 = scmp.ne.s32.totalorder %s4003_s9, %s3649_s29  ;;  %p3658_p1 = scmp.lt.s32.totalorder %s3649_s29, %s3649_s29 }
  0x34   : > { %p3652_p12 = pnand %p3650_p10, %p4025_p2  ;;  %p3659_p0 = por %p3658_p1, %p3657_p7 }
  0x36   : > { %p3653_p9 = pneg %p3652_p12 }
  0x38   : > { %p3660_p4 = pnand %p3659_p0, %p3653_p9 }
  0x3a   : > { %3663 = shalt.err (!%p3660_p4)
}
  0x3b   : > { %s3885_s18 = smov 32   ;;  %s3886_s26 = smov 2  }
  0x3c   : > { %3516 = dma.hbm_to_vmem [thread:$0]  (!%p4009_p13), %s4898_s1, 288, %s4003_s9, [#allocation6], %s3885_s18, %s3885_s18, %s3886_s26  }
  0x3d   : > { %s4900_s2 = sld [smem:[#allocation20_spill]] }
  0x43   : > { %s3664_s15 = scalar_lea.hbm %s4900_s2, 16 }
  0x44   : > { %p3665_p1 = scmp.ne.s32.totalorder %s4900_s2, %s3664_s15  ;;  %p3671_p5 = scmp.lt.u32.totalorder %s3664_s15, %s4900_s2 }
  0x46   : > { %p3667_p7 = pnand %p3665_p1, %p4025_p2 }
  0x48   : > { %p3668_p9 = pneg %p3667_p7 }
  0x4a   : > { %p3673_p6 = pnand %p3671_p5, %p3668_p9 }
  0x4c   : > { %3676 = shalt.err (!%p3673_p6)
}
  0x4d   : > { %s3677_s9 = scalar_lea.vmem %s4013_s12, 16  ;;  %s3684_s4 = scalar_lea.vmem %s4013_s12, 32 }
  0x4e   : > { %p3678_p8 = scmp.ne.s32.totalorder %s4013_s12, %s3677_s9  ;;  %p3685_p0 = scmp.lt.s32.totalorder %s4013_s12, %s4013_s12 }
  0x4f   : > { %p3686_p4 = scmp.lt.s32.totalorder %s3684_s4, %s3677_s9 }
  0x50   : > { %p3680_p10 = pnand %p3678_p8, %p4025_p2 }
  0x51   : > { %p3687_p1 = por %p3686_p4, %p3685_p0 }
  0x52   : > { %p3681_p12 = pneg %p3680_p10 }
  0x54   : > { %p3688_p7 = pnand %p3687_p1, %p3681_p12 }
  0x56   : > { %3691 = shalt.err (!%p3688_p7)
}
  0x57   : > { %3519 = dma.hbm_to_vmem [thread:$0]  (!%p4009_p13), %s4900_s2, 16, %s4013_s12, [#allocation6]  }
  0x58   : > { %s3692_s26 = scalar_lea.hbm %s4873_s3, 16 }
  0x59   : > { %p3693_p9 = scmp.ne.s32.totalorder %s4873_s3, %s3692_s26  ;;  %p3699_p8 = scmp.lt.u32.totalorder %s3692_s26, %s4873_s3 }
  0x5b   : > { %p3695_p5 = pnand %p3693_p9, %p4025_p2 }
  0x5d   : > { %p3696_p6 = pneg %p3695_p5 }
  0x5f   : > { %p3701_p10 = pnand %p3699_p8, %p3696_p6 }
  0x61   : > { %3704 = shalt.err (!%p3701_p10)
}
  0x62   : > { %s3705_s29 = scalar_lea.vmem %s224_s14, 16  ;;  %s3712_s12 = scalar_lea.vmem %s224_s14, 32 }
  0x63   : > { %p3706_p12 = scmp.ne.s32.totalorder %s224_s14, %s3705_s29  ;;  %p3713_p1 = scmp.lt.s32.totalorder %s224_s14, %s224_s14 }
  0x64   : > { %p3714_p7 = scmp.lt.s32.totalorder %s3712_s12, %s3705_s29 }
  0x65   : > { %p3708_p0 = pnand %p3706_p12, %p4025_p2 }
  0x66   : > { %p3715_p3 = por %p3714_p7, %p3713_p1 }
  0x67   : > { %p3709_p4 = pneg %p3708_p0 }
  0x69   : > { %p3716_p11 = pnand %p3715_p3, %p3709_p4 }
  0x6b   : > { %3719 = shalt.err (!%p3716_p11)
}
  0x6c   : > { %3522 = dma.hbm_to_vmem [thread:$0]  (!%p4009_p13), %s4873_s3, 16, %s224_s14, [#allocation9]  }
  0x6d   : > { %s34_s6 = sadd.s32 1, %s3872_s23  ;;  %s41_s15 = sadd.s32 1, %s3876_s24 }
  0x6e   : > { %p35_p3 = scmp.ge.s32.totalorder %s34_s6, 2  ;;  %s48_s10 = sadd.s32 1, %s3860_s20 }
  0x6f   : > { %p55_p11 = scmp.ne.s32.totalorder %s3860_s20, %s3856_s19  ;;  %p56_p2 = scmp.eq.s32.totalorder %s3880_s25, 0 }
  0x70   : > { %s4927_s6 = smov (%p35_p3, %s34_s6), 0  ;;  %s4929_s15 = smov (!%p35_p3, %s41_s15), %s3876_s24 }
  0x71   : > { %s150_s22 = ssub.s32 %s3872_s23, %s4927_s6  ;;  %p43_p9 = scmp.ge.s32.totalorder %s4929_s15, 2 }
  0x72   : > { %p3534_p5 = scmp.lt.s32.totalorder %s3880_s25, 4  ;;  %p4101_p13 = por %p56_p2, %p55_p11 }
  0x73   : > { %s234_s5 = sand.u32 1, %s3860_s20   ;;  %s4931_s15 = smov (%p43_p9, %s4929_s15), 0 }
  0x74   : > { %s3492_s18 = smul.u32 456, %s234_s5  ;;  %s45_s26 = ssub.s32 %s3876_s24, %s4931_s15 }
  0x75   : > { %s3493_s27 = smul.u32 7296, %s3876_s24  ;;  %p46_p6 = scmp.eq.s32.totalorder %s45_s26, 0 }
  0x76   : > { %s151_s8 = sor.u32 %s150_s22, %s45_s26  ;;  %s4902_s13 = sadd.s32 1, %s3848_s17 }
  0x77   : > { %p154_p8 = scmp.eq.s32.totalorder %s151_s8, 0  ;;  %s4122_s4 = scalar_lea.hbm %s4870_s0, %s3493_s27 }
  0x78   : > { %s4112_s11 = scalar_select %p46_p6, %s3860_s20, %s48_s10  }
  0x79   : > { %s4117_s29 = scalar_select %p154_p8, %s3848_s17, %s4902_s13  }
  0x7a   : > { %s238_s1 = scalar_lea.vmem [#allocation2], %s3492_s18  ;;  %p4130_p10 = pnand %p3534_p5, %p4101_p13 }
  0x7b   : > { %s245_s2 = sshll.u32 %s238_s1, 4  ;;  %s4134_s22 = scalar_lea.sflag [#allocation3], %s234_s5  ;;  %s4124_s2 = int_to_ptr.vmem [resolvable:$true] %s245_s2 }
  0x7c   : > { %s3720_s26 = scalar_lea.hbm %s4122_s4, 7296  ;;  %p3722_p0 = pneg %p4130_p10 }
  0x7d   : > { %p3721_p12 = scmp.ne.s32.totalorder %s4122_s4, %s3720_s26  ;;  %s3725_s14 = scalar_lea.hbm %s4870_s0, 14592 }
  0x7e   : > { %p3726_p7 = scmp.lt.u32.totalorder %s4122_s4, %s4870_s0  ;;  %p3727_p3 = scmp.lt.u32.totalorder %s3725_s14, %s3720_s26 }
  0x7f   : > { %p3723_p4 = pnand %p3722_p0, %p3721_p12  ;;  %p3729_p2 = scmp.lt.u32.totalorder %s3720_s26, %s4122_s4 }
  0x80   : > { %p3728_p11 = por %p3727_p3, %p3726_p7 }
  0x81   : > { %p3724_p1 = pneg %p3723_p4 }
  0x82   : > { %p3730_p9 = por %p3729_p2, %p3728_p11 }
  0x84   : > { %p3731_p5 = pnand %p3730_p9, %p3724_p1 }
  0x86   : > { %3734 = shalt.err (!%p3731_p5)
}
  0x87   : > { %s3735_s5 = scalar_lea.vmem %s4124_s2, 7296  ;;  %s3887_s13 = smov [#allocation2]  }
  0x88   : > { %p3736_p13 = scmp.ne.s32.totalorder %s4124_s2, %s3735_s5  ;;  %s3740_s12 = sshll.u32 %s3887_s13, 4  ;;  %s3741_s12 = int_to_ptr.vmem [resolvable:$false] %s3740_s12 }
  0x89   : > { %s3742_s9 = scalar_lea.vmem %s3741_s12, 14592  ;;  %p3743_p12 = scmp.lt.s32.totalorder %s4124_s2, %s3741_s12 }
  0x8a   : > { %p3738_p6 = pnand %p3736_p13, %p3722_p0  ;;  %p3744_p4 = scmp.lt.s32.totalorder %s3742_s9, %s3735_s5 }
  0x8c   : > { %p3739_p8 = pneg %p3738_p6  ;;  %p3745_p7 = por %p3744_p4, %p3743_p12 }
  0x8e   : > { %p3746_p3 = pnand %p3745_p7, %p3739_p8 }
  0x90   : > { %3749 = shalt.err (!%p3746_p3)
}
  0x91   : > { %s3888_s26 = smov 128   ;;  %s3889_s1 = smov 8  }
  0x92   : > { %3526 = dma.hbm_to_vmem [thread:$0]  (!%p4130_p10), %s4122_s4, 7296, %s4124_s2, %s4134_s22, %s3888_s26, %s3888_s26, %s3889_s1  }
  0x93   : > { %p4904_p0 = scmp.ne.s32.totalorder %s4896_s7, 0 }
  0x94   : > { %s259_s18 = sand.u32 (!%p4904_p0), 1, %s3856_s19   ;;  %p4905_p1 = scmp.ne.s32.totalorder (!%p4904_p0), %s4891_s30, 0 }
  0x95   : > { %257 = sbr.rel (%p4904_p0) target bundleno = 624 (0x270), region = 36  ;;  %s260_s27 = scalar_lea.sflag (!%p4904_p0), [#allocation3], %s259_s18 }
  0x96   : > { %s3494_s14 = smul.u32 (!%p4904_p0), 456, %s259_s18 }
  0x98   : > { %s263_s8 = scalar_lea.vmem (!%p4904_p0), [#allocation2], %s3494_s14 }
  0x9c   : > { %3823 = dma.done.wait (%p4905_p1), %s260_s27, 7296  }
  0x9d   : > { %3825 = vsyncadd (%p4905_p1), %s260_s27, 4294960000  ;;  %p4906_p11 = scmp.ne.s32.totalorder %s4890_s28, 0 }
  0x9f   : > { %3827 = dma.done.wait (%p4906_p11), [#allocation6], 304  }
  0xa0   : > { %3829 = vsyncadd (%p4906_p11), [#allocation6], 4294966992 }
  0xa1   : > { %3831 = dma.done.wait (%p4906_p11), [#allocation9], 16  }
  0xa2   : > { %3833 = vsyncadd (%p4906_p11), [#allocation9], 4294967280  ;;  %s302_s2 = smul.u32 192, %s3864_s21  ;;  %vm483_vm0 = vcmask 1041408   ;;  %v344_v0 = vld [vmem:[#allocation5 + $0x2] sm:$0x3] }
  0xa3   : > { %v4180_v1 = vld [vmem:[#allocation5 + $0x8] sm:$0x3]  ;;  %3482 = vmatprep.subr.msk.bf16.mxu1 %vm483_vm0, %v344_v0  ;;  %v485_v3 = vsel %vm483_vm0, %v344_v0, 0  ;;  %vm345_vm1 = vsmask.f32 7424  ;;  %vm446_vm2 = vcmask 31744  }
  0xa4   : > { %s4178_s7 = scalar_lea.vmem %s263_s8, %s302_s2 [#allocation2]  ;;  %3486 = vmatprep.subr.msk.bf16.mxu0 %vm483_vm0, %v4180_v1  ;;  %v4189_v4 = vsel %vm483_vm0, %v4180_v1, 0  ;;  %3055 = vmatpush3.bf16.msra.mxu1 %v485_v3  ;;  %v341_v10 = vld [vmem:[#allocation5] sm:$0x3]  ;;  %v1522_v15 = vld [vmem:[#allocation5 + $0xa] sm:$0x3]  ;;  %vm787_vm3 = vcmask 1046528  }
  0xa5   : > { %v304_v2 = vld [vmem:[%s4178_s7] sm:$0xff]  ;;  %v305_v5 = vld [vmem:[%s4178_s7 + $0x8] sm:$0xff]  ;;  %v306_v6 = vld [vmem:[%s4178_s7 + $0x10] sm:$0xff]  ;;  %3159 = vmatpush3.bf16.msra.mxu0 %v4189_v4  ;;  %3483 = vmatprep.subr.msk.bf16.mxu1 %vm483_vm0, %v341_v10  ;;  %v641_v17 = vsel %vm483_vm0, %v341_v10, 0  ;;  %v1598_v31 = vsel %vm483_vm0, %v1522_v15, 0  ;;  %s297_s28 = sand.u32 1, %s3844_s16  }
  0xa6   : > { %v307_v7 = vld [vmem:[%s4178_s7 + $0x18] sm:$0xff]  ;;  %v4195_v8 = vpack.c.bf16 %v305_v5, %v304_v2  ;;  %v2811_v11 = vld [vmem:[%s4178_s7 + $0x20] sm:$0xff]  ;;  %v2812_v12 = vld [vmem:[%s4178_s7 + $0x28] sm:$0xff]  ;;  %3488 = vmatprep.subr.msk.bf16.mxu0 %vm483_vm0, %v1522_v15  ;;  %s3495_s30 = smul.u32 192, %s297_s28  ;;  %s4907_s10 = sld [smem:[#allocation16_spill]] }
  0xa7   : > { %v4197_v9 = vpack.c.bf16 %v307_v7, %v306_v6  ;;  %v2813_v13 = vld [vmem:[%s4178_s7 + $0x30] sm:$0xff]  ;;  %v4203_v14 = vpack.c.bf16 %v2811_v11, %v307_v7  ;;  %v4205_v16 = vpack.c.bf16 %v2812_v12, %v2811_v11  ;;  %v2814_v18 = vld [vmem:[%s4178_s7 + $0x38] sm:$0xff]  ;;  %v2815_v23 = vld [vmem:[%s4178_s7 + $0x40] sm:$0xff]  ;;  %s2619_s22 = smul.u32 24, %s3864_s21  ;;  %s4908_s9 = sld [smem:[#allocation17_spill]] }
  0xa8   : > { %v347_v19 = vshrl.u32 %v4195_v8, 16  ;;  %v349_v20 = vshll.u32 %v4195_v8, 16  ;;  %v4215_v24 = vpack.c.bf16 %v2813_v13, %v2812_v12  ;;  %v4220_v30 = vpack.c.bf16 %v2815_v23, %v2814_v18  ;;  %v2816_v32 = vld [vmem:[%s4178_s7 + $0x48] sm:$0xff]  ;;  %v2817_v33 = vld [vmem:[%s4178_s7 + $0x50] sm:$0xff]  ;;  %v2818_v50 = vld [vmem:[%s4178_s7 + $0x58] sm:$0xff]  ;;  %s4730_s4 = scalar_lea.vmem [#allocation10], %s3495_s30 }
  0xa9   : > { %v354_v21 = vshll.u32 %v4197_v9, 16  ;;  %v358_v22 = vshrl.u32 %v4197_v9, 16  ;;  %v1241_v25 = vshrl.u32 %v4203_v14, 16  ;;  %v1243_v26 = vshll.u32 %v4203_v14, 16  ;;  %v2819_v51 = vld [vmem:[%s4178_s7 + $0x60] sm:$0xff]  ;;  %v2820_v61 = vld [vmem:[%s4178_s7 + $0x68] sm:$0xff] }
  0xaa   : > { %v362_v27 = vshll.u32 %v4205_v16, 16  ;;  %v351_v28 = vrot.slane %v349_v20, 1  ;;  %v1247_v35 = vshll.u32 %v4215_v24, 16  ;;  %v1251_v36 = vshrl.u32 %v4215_v24, 16  ;;  %v4241_v56 = vld [vmem:[#allocation5 + $0x4] sm:$0x3] }
  0xab   : > { %v356_v29 = vrot.slane %v354_v21, 1  ;;  %v1245_v34 = vrot.slane %v1243_v26, 1  ;;  %v1254_v40 = vshll.u32 %v4220_v30, 16  ;;  %v4228_v41 = vpack.c.bf16 %v2814_v18, %v2813_v13  ;;  %v2821_v62 = vld [vmem:[%s4178_s7 + $0x70] sm:$0xff]  ;;  %v4255_v5 = vld [vmem:[#allocation5 + $0xc] sm:$0x3] }
  0xac   : > { %v364_v37 = vrot.slane %v362_v27, 1  ;;  %v352_v38 = vor.u32 %v351_v28, %v347_v19  ;;  %v1249_v43 = vrot.slane %v1247_v35, 1  ;;  %v366_v44 = vshrl.u32 %v4205_v16, 16  ;;  %v2822_v18 = vld [vmem:[%s4178_s7 + $0x78] sm:$0xff]  ;;  %v2823_v19 = vld [vmem:[%s4178_s7 + $0x80] sm:$0xff]  ;;  %s3496_s5 = smul.u32 48, %s4907_s10 }
  0xad   : > { %v360_v39 = vor.u32 %v358_v22, %v356_v29  ;;  %v1246_v42 = vor.u32 %v1245_v34, %v1241_v25  ;;  %v4231_v45 = vpack.c.bf16 %v2817_v33, %v2816_v32  ;;  %v1256_v48 = vrot.slane %v1254_v40, 1  ;;  %s2628_s12 = sshll.u32 %s4730_s4, 4  ;;  %s4909_s18 = sld [smem:[#allocation21_spill]]  ;;  %s4802_s12 = int_to_ptr.vmem [resolvable:$true] %s2628_s12 }
  0xae   : > { %v357_v46 = vsel %vm345_vm1, %v352_v38, %v356_v29  ;;  %v370_v49 = vshll.u32 %v4228_v41, 16  ;;  %v1253_v53 = vor.u32 %v1251_v36, %v1249_v43  ;;  %v368_v54 = vor.u32 %v366_v44, %v364_v37  ;;  %s2625_s21 = sadd.s32 %s3496_s5, %s2619_s22  ;;  %s4809_s8 = scalar_lea.sflag [#allocation4], %s297_s28 }
  0xaf   : > { %v365_v47 = vsel %vm345_vm1, %v360_v39, %v364_v37  ;;  %3056 = vmatprep.mubr.msk.bf16.mxu1 %vm446_vm2, %v357_v46  ;;  %v1250_v52 = vsel %vm345_vm1, %v1246_v42, %v1249_v43  ;;  %v1258_v55 = vshrl.u32 %v4220_v30, 16  ;;  %v1261_v58 = vshll.u32 %v4231_v45, 16  ;;  %v4295_v43 = vld [vmem:[%s4178_s7 + $0x88] sm:$0xff]  ;;  %s2934_s13 = sshll.u32 %s2625_s21, 7  ;;  %s3750_s2 = scalar_lea.vmem %s4802_s12, 3072 }
  0xb0   : > { %3160 = vmatprep.mubr.msk.bf16.mxu0 %vm446_vm2, %v1250_v52  ;;  %3057 = vmatmul.mubr.msk.bf16.vlgmr.msra.gmra.mrb[0].mxu1 %vm446_vm2, %v365_v47  ;;  %v372_v57 = vrot.slane %v370_v49, 1  ;;  %v4246_v59 = vpack.c.bf16 %v2816_v32, %v2815_v23  ;;  %v374_v60 = vshrl.u32 %v4228_v41, 16  ;;  %v1257_v63 = vsel %vm345_vm1, %v1253_v53, %v1256_v48  ;;  %p3751_p10 = scmp.ne.s32.totalorder %s4802_s12, %s3750_s2  ;;  %p4911_p2 = scmp.ne.s32.totalorder %s4908_s9, 0 }
  0xb1   : > { %3081 = vmatpush3.bf16.msra.mxu1 %v641_v17  ;;  %v1260_v0 = vor.u32 %v1258_v55, %v1256_v48  ;;  %v4252_v2 = vpack.c.bf16 %v2819_v51, %v2818_v50  ;;  %v1265_v3 = vshrl.u32 %v4231_v45, 16  ;;  %3161 = vmatmul.mubr.msk.bf16.vlgmr.msra.gmra.mrb[0].mxu0 %vm446_vm2, %v1257_v63  ;;  %v1263_v7 = vrot.slane %v1261_v58, 1  ;;  %v4316_v55 = vld [vmem:[%s4178_s7 + $0x98] sm:$0xff] }
  0xb2   : > { %v373_v6 = vsel %vm345_vm1, %v368_v54, %v372_v57  ;;  %v376_v10 = vor.u32 %v374_v60, %v372_v57  ;;  %v378_v11 = vshll.u32 %v4246_v59, 16  ;;  %3484 = vmatprep.subr.msk.bf16.mxu1 %vm483_vm0, %v4241_v56  ;;  %3185 = vmatpush3.bf16.msra.mxu0 %v1598_v31  ;;  %v4264_v13 = vpack.c.bf16 %v2818_v50, %v2817_v33  ;;  %v4313_v54 = vld [vmem:[%s4178_s7 + $0x90] sm:$0xff]  ;;  %p3752_p9 = pnand %p3751_p10, %p4911_p2 }
  0xb3   : > { %3060 = vmatprep.mubr.msk.bf16.mxu1 %vm446_vm2, %v373_v6  ;;  %v1268_v12 = vshll.u32 %v4252_v2, 16  ;;  %v382_v15 = vshrl.u32 %v4246_v59, 16  ;;  %v4267_v17 = vpack.c.bf16 %v2821_v62, %v2820_v61  ;;  %v1264_v20 = vsel %vm345_vm1, %v1260_v0, %v1263_v7  ;;  %3489 = vmatprep.subr.msk.bf16.mxu0 %vm483_vm0, %v4255_v5  ;;  %v4329_v6 = vld [vmem:[%s4178_s7 + $0xa8] sm:$0xff]  ;;  %s4910_s14 = smov %s4909_s18  ;;  %s4800_s27 = scalar_lea.hbm %s4909_s18, %s2934_s13 }
  0xb4   : > { %v380_v21 = vrot.slane %v378_v11, 1  ;;  %v1267_v22 = vor.u32 %v1265_v3, %v1263_v7  ;;  %v1272_v23 = vshrl.u32 %v4252_v2, 16  ;;  %3164 = vmatprep.mubr.msk.bf16.mxu0 %vm446_vm2, %v1264_v20  ;;  %v386_v26 = vshll.u32 %v4264_v13, 16  ;;  %v4326_v3 = vld [vmem:[%s4178_s7 + $0xa0] sm:$0xff]  ;;  %p3753_p5 = pneg %p3752_p9 }
  0xb5   : > { %v1270_v25 = vrot.slane %v1268_v12, 1  ;;  %v1275_v27 = vshll.u32 %v4267_v17, 16  ;;  %v4278_v28 = vpack.c.bf16 %v2820_v61, %v2819_v51  ;;  %v390_v32 = vshrl.u32 %v4264_v13, 16 }
  0xb6   : > { %v4281_v29 = vsel %vm345_vm1, %v376_v10, %v380_v21  ;;  %v384_v31 = vor.u32 %v382_v15, %v380_v21  ;;  %v4284_v33 = vpack.c.bf16 %v2823_v19, %v2822_v18  ;;  %v388_v35 = vrot.slane %v386_v26, 1  ;;  %v4342_v15 = vld [vmem:[%s4178_s7 + $0xb0] sm:$0xff] }
  0xb7   : > { %v1271_v34 = vsel %vm345_vm1, %v1267_v22, %v1270_v25  ;;  %v1274_v36 = vor.u32 %v1272_v23, %v1270_v25  ;;  %v1277_v37 = vrot.slane %v1275_v27, 1  ;;  %v394_v38 = vshll.u32 %v4278_v28, 16 }
  0xb8   : > { %3061 = vmatmul.mubr.msk.bf16.gmra.mrb[4].mxu1 %vm446_vm2, %v4281_v29  ;;  %v1279_v39 = vshrl.u32 %v4267_v17, 16  ;;  %v1282_v40 = vshll.u32 %v4284_v33, 16  ;;  %v4292_v42 = vpack.c.bf16 %v2822_v18, %v2821_v62  ;;  %v4298_v44 = vsel %vm345_vm1, %v384_v31, %v388_v35  ;;  %v4345_v18 = vld [vmem:[%s4178_s7 + $0xb8] sm:$0xff] }
  0xb9   : > { %v1278_v46 = vsel %vm345_vm1, %v1274_v36, %v1277_v37  ;;  %v392_v47 = vor.u32 %v390_v32, %v388_v35  ;;  %v398_v48 = vshrl.u32 %v4278_v28, 16  ;;  %3165 = vmatmul.mubr.msk.bf16.gmra.mrb[4].mxu0 %vm446_vm2, %v1271_v34  ;;  %3064 = vmatprep.mubr.msk.bf16.mxu1 %vm446_vm2, %v4298_v44  ;;  %v396_v49 = vrot.slane %v394_v38, 1 }
  0xba   : > { %v402_v50 = vshll.u32 %v4292_v42, 16  ;;  %3168 = vmatprep.mubr.msk.bf16.mxu0 %vm446_vm2, %v1278_v46  ;;  %v1281_v51 = vor.u32 %v1279_v39, %v1277_v37  ;;  %v4307_v52 = vrot.slane %v1282_v40, 1  ;;  %v4310_v53 = vpack.c.bf16 %v4295_v43, %v2823_v19  ;;  %v328_v40 = vld [vmem:[%s4178_s7 + $0xc0] sm:$0xff] }
  0xbb   : > { %v400_v57 = vor.u32 %v398_v48, %v396_v49  ;;  %v1536_v60 = vrot.slane %v4203_v14, 1  ;;  %v1537_v61 = vrot.slane %v4215_v24, 1  ;;  %v4321_v62 = vsel %vm345_vm1, %v392_v47, %v396_v49 }
  0xbc   : > { %v404_v58 = vrot.slane %v402_v50, 1  ;;  %v406_v63 = vshrl.u32 %v4292_v42, 16  ;;  %v410_v0 = vshll.u32 %v4310_v53, 16  ;;  %v4336_v10 = vpack.c.bf16 %v4316_v55, %v4313_v54 }
  0xbd   : > { %v414_v11 = vshrl.u32 %v4310_v53, 16  ;;  %v1285_v12 = vsel %vm345_vm1, %v1281_v51, %v4307_v52  ;;  %v1538_v19 = vsel %vm787_vm3, %v1536_v60, %v1537_v61  ;;  %v4353_v22 = vpack.c.bf16 %v4329_v6, %v4326_v3 }
  0xbe   : > { %v4332_v7 = vsel %vm345_vm1, %v400_v57, %v404_v58  ;;  %v412_v20 = vrot.slane %v410_v0, 1  ;;  %v418_v21 = vshll.u32 %v4336_v10, 16  ;;  %v408_v23 = vor.u32 %v406_v63, %v404_v58  ;;  %v4386_v57 = vld [vmem:[#allocation5 + $0xe] sm:$0x3] }
  0xbf   : > { %v4360_v27 = vpack.c.bf16 %v4345_v18, %v4342_v15  ;;  %v1539_v31 = vrot.slane %v4220_v30, 1  ;;  %v1541_v32 = vrot.slane %v4231_v45, 1  ;;  %v426_v34 = vshll.u32 %v4353_v22, 16 }
  0xc0   : > { %3065 = vmatmul.mubr.msk.bf16.gmra.mrb[8].mxu1 %vm446_vm2, %v4321_v62  ;;  %v416_v25 = vor.u32 %v414_v11, %v412_v20  ;;  %v420_v26 = vrot.slane %v418_v21, 1  ;;  %v4367_v35 = vsel %vm345_vm1, %v408_v23, %v412_v20  ;;  %v422_v36 = vshrl.u32 %v4336_v10, 16  ;;  %v2832_v21 = vld [vmem:[%s4178_s7 + $0xc8] sm:$0xff] }
  0xc1   : > { %3068 = vmatprep.mubr.msk.bf16.mxu1 %vm446_vm2, %v4332_v7  ;;  %3169 = vmatmul.mubr.msk.bf16.gmra.mrb[8].mxu0 %vm446_vm2, %v1285_v12  ;;  %v430_v38 = vshrl.u32 %v4353_v22, 16  ;;  %v434_v39 = vshll.u32 %v4360_v27, 16  ;;  %v1540_v46 = vsel %vm787_vm3, %v1537_v61, %v1539_v31  ;;  %v1831_v47 = vsel %vm483_vm0, %v4255_v5, 0 }
  0xc2   : > { %3186 = vmatprep.mubr.msk.bf16.mxu0 %vm446_vm2, %v1538_v19  ;;  %v4371_v37 = vsel %vm345_vm1, %v416_v25, %v420_v26  ;;  %v1542_v48 = vsel %vm787_vm3, %v1539_v31, %v1541_v32  ;;  %v428_v49 = vrot.slane %v426_v34, 1  ;;  %v424_v50 = vor.u32 %v422_v36, %v420_v26 }
  0xc3   : > { %v4384_v51 = vpack.c.bf16 %v328_v40, %v328_v40  ;;  %v436_v60 = vrot.slane %v434_v39, 1  ;;  %v1543_v5 = vrot.slane %v4252_v2, 1  ;;  %v788_v61 = vrot.slane %v4195_v8, 1 }
  0xc4   : > { %v432_v58 = vor.u32 %v430_v38, %v428_v49  ;;  %v789_v63 = vrot.slane %v4197_v9, 1  ;;  %v791_v0 = vrot.slane %v4205_v16, 1  ;;  %v1545_v11 = vrot.slane %v4267_v17, 1 }
  0xc5   : > { %v438_v12 = vshrl.u32 %v4360_v27, 16  ;;  %v4399_v19 = vsel %vm345_vm1, %v424_v50, %v428_v49  ;;  %v442_v20 = vshll.u32 %v4384_v51, 16  ;;  %v4414_v31 = vpack.c.bf16 %v2832_v21, %v328_v40 }
  0xc6   : > { %v4404_v23 = vsel %vm787_vm3, %v788_v61, %v789_v63  ;;  %v4409_v25 = vsel %vm787_vm3, %v789_v63, %v791_v0  ;;  %v4412_v26 = vsel %vm345_vm1, %v432_v58, %v436_v60  ;;  %v1544_v34 = vsel %vm787_vm3, %v1541_v32, %v1543_v5 }
  0xc7   : > { %v1546_v36 = vsel %vm787_vm3, %v1543_v5, %v1545_v11  ;;  %v4422_v38 = vpack.c.bf16 %v4313_v54, %v4295_v43  ;;  %v4426_v39 = vor.u32 %v438_v12, %v436_v60  ;;  %v1547_v32 = vrot.slane %v4284_v33, 1 }
  0xc8   : > { %3069 = vmatmul.mubr.msk.bf16.gmra.mrb[12].mxu1 %vm446_vm2, %v4367_v35  ;;  %v4437_v54 = vpack.c.bf16 %v4326_v3, %v4316_v55  ;;  %v4443_v50 = vpack.c.bf16 %v4342_v15, %v4329_v6  ;;  %v2833_v3 = vld [vmem:[%s4178_s7 + $0xd0] sm:$0xff]  ;;  %v850_v60 = vsel %vm483_vm0, %v4241_v56, 0  ;;  %v4456_v6 = vpack.c.bf16 %v328_v40, %v4345_v18  ;;  %v2834_v40 = vld [vmem:[%s4178_s7 + $0xd8] sm:$0xff] }
  0xc9   : > { %3072 = vmatprep.mubr.msk.bf16.mxu1 %vm446_vm2, %v4371_v37  ;;  %3187 = vmatmul.mubr.msk.bf16.vlgmr.msra.gmra.mrb[0].mxu0 %vm446_vm2, %v1540_v46  ;;  %v444_v46 = vrot.slane %v442_v20, 1  ;;  %v1548_v43 = vsel %vm787_vm3, %v1545_v11, %v1547_v32  ;;  %v1045_v15 = vld [vmem:[#allocation5 + $0x6] sm:$0x3]  ;;  %v4461_v61 = vpack.c.bf16 %v2833_v3, %v2832_v21  ;;  %v4472_v63 = vpack.c.bf16 %v2834_v40, %v2834_v40 }
  0xca   : > { %3211 = vmatpush3.bf16.msra.mxu0 %v1831_v47  ;;  %3190 = vmatprep.mubr.msk.bf16.mxu0 %vm446_vm2, %v1542_v48  ;;  %v1549_v47 = vrot.slane %v4422_v38, 1  ;;  %v1551_v58 = vrot.slane %v4437_v54, 1  ;;  %v1553_v55 = vrot.slane %v4443_v50, 1  ;;  %v1555_v56 = vrot.slane %v4456_v6, 1 }
  0xcb   : > { %3490 = vmatprep.subr.msk.bf16.mxu0 %vm483_vm0, %v4386_v57  ;;  %v445_v48 = vsel %vm345_vm1, %v4426_v39, %v444_v46  ;;  %v1557_v18 = vrot.slane %v4461_v61, 1  ;;  %v1559_v12 = vrot.slane %v4472_v63, 1  ;;  %v2114_v21 = vsel %vm483_vm0, %v4386_v57, 0 }
  0xcc   : > { %v1550_v49 = vsel %vm787_vm3, %v1547_v32, %v1549_v47  ;;  %v1552_v5 = vsel %vm787_vm3, %v1549_v47, %v1551_v58  ;;  %v793_v57 = vrot.slane %v4228_v41, 1  ;;  %v2894_v32 = vld [vmem:[%s4178_s7 + $0xe8] sm:$0xff] }
  0xcd   : > { %v1558_v11 = vsel %vm787_vm3, %v1555_v56, %v1557_v18  ;;  %v1560_v20 = vsel %vm787_vm3, %v1557_v18, %v1559_v12 }
  0xce   : > { %v794_v46 = vsel %vm787_vm3, %v791_v0, %v793_v57 }
  0xd0   : > { %3073 = vmatmul.mubr.msk.bf16.gmra.mrb[16].mxu1 %vm446_vm2, %v4399_v19 }
  0xd1   : > { %3076 = vmatprep.mubr.msk.bf16.mxu1 %vm446_vm2, %v4412_v26  ;;  %3191 = vmatmul.mubr.msk.bf16.gmra.mrb[4].mxu0 %vm446_vm2, %v1544_v34  ;;  %v2270_v34 = vld [vmem:[#allocation5 + $0x10] sm:$0x3] }
  0xd2   : > { %3194 = vmatprep.mubr.msk.bf16.mxu0 %vm446_vm2, %v1546_v36  ;;  %v1083_v36 = vsel %vm483_vm0, %v1045_v15, 0 }
  0xd8   : > { %3077 = vmatmul.mubr.msk.bf16.gmra.mrb[20].mxu1 %vm446_vm2, %v445_v48 }
  0xd9   : > { %3082 = vmatprep.mubr.msk.bf16.mxu1 %vm446_vm2, %v4195_v8  ;;  %3195 = vmatmul.mubr.msk.bf16.gmra.mrb[8].mxu0 %vm446_vm2, %v1548_v43  ;;  %v1554_v8 = vsel %vm787_vm3, %v1551_v58, %v1553_v55 }
  0xda   : > { %3198 = vmatprep.mubr.msk.bf16.mxu0 %vm446_vm2, %v1550_v49 }
  0xe0   : > { %3083 = vmatmul.mubr.msk.bf16.vlgmr.msra.gmra.mrb[0].mxu1 %vm446_vm2, %v4197_v9  ;;  %v1556_v9 = vsel %vm787_vm3, %v1553_v55, %v1555_v56  ;;  %v2346_v55 = vsel %vm483_vm0, %v2270_v34, 0 }
  0xe1   : > { %3107 = vmatpush3.bf16.msra.mxu1 %v850_v60  ;;  %3086 = vmatprep.mubr.msk.bf16.mxu1 %vm446_vm2, %v4205_v16 }
  0xe2   : > { %3199 = vmatmul.mubr.msk.bf16.gmra.mrb[12].mxu0 %vm446_vm2, %v1552_v5  ;;  %3485 = vmatprep.subr.msk.bf16.mxu1 %vm483_vm0, %v1045_v15  ;;  %v2895_v5 = vld [vmem:[%s4178_s7 + $0xf0] sm:$0xff] }
  0xe3   : > { %3202 = vmatprep.mubr.msk.bf16.mxu0 %vm446_vm2, %v1554_v8 }
  0xe8   : > { %3087 = vmatmul.mubr.msk.bf16.gmra.mrb[4].mxu1 %vm446_vm2, %v4228_v41 }
  0xe9   : > { %3090 = vmatprep.mubr.msk.bf16.mxu1 %vm446_vm2, %v4246_v59 }
  0xea   : > { %3203 = vmatmul.mubr.msk.bf16.gmra.mrb[16].mxu0 %vm446_vm2, %v1556_v9 }
  0xeb   : > { %3206 = vmatprep.mubr.msk.bf16.mxu0 %vm446_vm2, %v1558_v11  ;;  %v1296_v11 = vshll.u32 %v4437_v54, 16 }
  0xf0   : > { %3091 = vmatmul.mubr.msk.bf16.gmra.mrb[8].mxu1 %vm446_vm2, %v4264_v13 }
  0xf1   : > { %3094 = vmatprep.mubr.msk.bf16.mxu1 %vm446_vm2, %v4278_v28 }
  0xf2   : > { %3207 = vmatmul.mubr.msk.bf16.gmra.mrb[20].mxu0 %vm446_vm2, %v1560_v20  ;;  %v1300_v20 = vshrl.u32 %v4437_v54, 16 }
  0xf3   : > { %3212 = vmatprep.mubr.msk.bf16.mxu0 %vm446_vm2, %v4228_v41  ;;  %v797_v41 = vrot.slane %v4264_v13, 1 }
  0xf8   : > { %3095 = vmatmul.mubr.msk.bf16.gmra.mrb[12].mxu1 %vm446_vm2, %v4292_v42 }
  0xf9   : > { %3098 = vmatprep.mubr.msk.bf16.mxu1 %vm446_vm2, %v4310_v53 }
  0xfa   : > { %3213 = vmatmul.mubr.msk.bf16.vlgmr.msra.gmra.mrb[0].mxu0 %vm446_vm2, %v4246_v59 }
  0xfb   : > { %3237 = vmatpush3.bf16.msra.mxu0 %v2114_v21  ;;  %3216 = vmatprep.mubr.msk.bf16.mxu0 %vm446_vm2, %v4264_v13  ;;  %v2893_v13 = vld [vmem:[%s4178_s7 + $0xe0] sm:$0xff]  ;;  %v1303_v21 = vshll.u32 %v4443_v50, 16  ;;  %s3890_s7 = smov [#allocation10]  }
  0xfc   : > { %3491 = vmatprep.subr.msk.bf16.mxu0 %vm483_vm0, %v2270_v34  ;;  %v4556_v48 = vpack.c.bf16 %v2894_v32, %v2893_v13  ;;  %v1298_v34 = vrot.slane %v1296_v11, 1  ;;  %s3754_s30 = sshll.u32 %s3890_s7, 4  ;;  %s3755_s30 = int_to_ptr.vmem [resolvable:$false] %s3754_s30 }
  0xfd   : > { %s3756_s10 = scalar_lea.vmem %s3755_s30, 6144  ;;  %p3757_p13 = scmp.lt.s32.totalorder %s4802_s12, %s3755_s30 }
  0xfe   : > { %v2069_v56 = vshrl.u32 %v4556_v48, 16  ;;  %v2305_v32 = vrot.slane %v4556_v48, 1  ;;  %p3758_p6 = scmp.lt.s32.totalorder %s3756_s10, %s3750_s2 }
 0x100   : > { %3099 = vmatmul.mubr.msk.bf16.gmra.mrb[16].mxu1 %vm446_vm2, %v4336_v10  ;;  %p3759_p8 = por %p3758_p6, %p3757_p13 }
 0x101   : > { %3102 = vmatprep.mubr.msk.bf16.mxu1 %vm446_vm2, %v4353_v22 }
 0x102   : > { %3217 = vmatmul.mubr.msk.bf16.gmra.mrb[4].mxu0 %vm446_vm2, %v4278_v28  ;;  %p3760_p12 = pnand %p3759_p8, %p3753_p5 }
 0x103   : > { %3220 = vmatprep.mubr.msk.bf16.mxu0 %vm446_vm2, %v4292_v42 }
 0x108   : > { %3103 = vmatmul.mubr.msk.bf16.gmra.mrb[20].mxu1 %vm446_vm2, %v4360_v27 }
 0x109   : > { %3108 = vmatprep.mubr.msk.bf16.mxu1 %vm446_vm2, %v4404_v23  ;;  %v795_v23 = vrot.slane %v4246_v59, 1  ;;  %v799_v59 = vrot.slane %v4278_v28, 1  ;;  %v803_v28 = vrot.slane %v4310_v53, 1 }
 0x10a   : > { %3221 = vmatmul.mubr.msk.bf16.gmra.mrb[8].mxu0 %vm446_vm2, %v4310_v53  ;;  %v807_v53 = vrot.slane %v4353_v22, 1 }
 0x10b   : > { %3224 = vmatprep.mubr.msk.bf16.mxu0 %vm446_vm2, %v4336_v10  ;;  %v4534_v16 = vsel %vm787_vm3, %v793_v57, %v795_v23  ;;  %v4537_v0 = vsel %vm787_vm3, %v795_v23, %v797_v41  ;;  %v4554_v47 = vsel %vm787_vm3, %v797_v41, %v799_v59  ;;  %v1307_v23 = vshrl.u32 %v4443_v50, 16 }
 0x110   : > { %3109 = vmatmul.mubr.msk.bf16.vlgmr.msra.gmra.mrb[0].mxu1 %vm446_vm2, %v4409_v25  ;;  %v4539_v25 = vpack.c.bf16 %v2834_v40, %v2833_v3 }
 0x111   : > { %3133 = vmatpush3.bf16.msra.mxu1 %v1083_v36  ;;  %3112 = vmatprep.mubr.msk.bf16.mxu1 %vm446_vm2, %v794_v46  ;;  %v1305_v36 = vrot.slane %v1303_v21, 1 }
 0x112   : > { %3225 = vmatmul.mubr.msk.bf16.gmra.mrb[12].mxu0 %vm446_vm2, %v4353_v22  ;;  %3487 = vmatprep.subr.msk.bf16.mxu1 %vm483_vm0, %v4180_v1  ;;  %v801_v1 = vrot.slane %v4292_v42, 1  ;;  %v805_v42 = vrot.slane %v4336_v10, 1  ;;  %v2051_v22 = vshll.u32 %v4414_v31, 16  ;;  %v2062_v60 = vshrl.u32 %v4539_v25, 16 }
 0x113   : > { %3228 = vmatprep.mubr.msk.bf16.mxu0 %vm446_vm2, %v4360_v27 }
 0x114   : > { %v4559_v43 = vsel %vm787_vm3, %v799_v59, %v801_v1  ;;  %v4572_v49 = vsel %vm787_vm3, %v801_v1, %v803_v28  ;;  %v4575_v58 = vsel %vm787_vm3, %v803_v28, %v805_v42  ;;  %v4591_v10 = vsel %vm787_vm3, %v805_v42, %v807_v53 }
 0x115   : > { %v1325_v28 = vshll.u32 %v4472_v63, 16 }
 0x118   : > { %3113 = vmatmul.mubr.msk.bf16.gmra.mrb[4].mxu1 %vm446_vm2, %v4534_v16 }
 0x119   : > { %3116 = vmatprep.mubr.msk.bf16.mxu1 %vm446_vm2, %v4537_v0 }
 0x11a   : > { %3229 = vmatmul.mubr.msk.bf16.gmra.mrb[16].mxu0 %vm446_vm2, %v4414_v31 }
 0x11b   : > { %3232 = vmatprep.mubr.msk.bf16.mxu0 %vm446_vm2, %v4539_v25 }
 0x120   : > { %3117 = vmatmul.mubr.msk.bf16.gmra.mrb[8].mxu1 %vm446_vm2, %v4554_v47 }
 0x121   : > { %3120 = vmatprep.mubr.msk.bf16.mxu1 %vm446_vm2, %v4559_v43 }
 0x122   : > { %3233 = vmatmul.mubr.msk.bf16.gmra.mrb[20].mxu0 %vm446_vm2, %v4556_v48 }
 0x123   : > { %3238 = vmatprep.mubr.msk.bf16.mxu0 %vm446_vm2, %v4281_v29  ;;  %v4586_v29 = vrot.slane %v4360_v27, 1  ;;  %v2058_v27 = vshll.u32 %v4539_v25, 16 }
 0x125   : > { %v4595_v3 = vsel %vm787_vm3, %v807_v53, %v4586_v29 }
 0x128   : > { %3121 = vmatmul.mubr.msk.bf16.gmra.mrb[12].mxu1 %vm446_vm2, %v4572_v49 }
 0x129   : > { %3124 = vmatprep.mubr.msk.bf16.mxu1 %vm446_vm2, %v4575_v58 }
 0x12a   : > { %3239 = vmatmul.mubr.msk.bf16.vlgmr.msra.gmra.mrb[0].mxu0 %vm446_vm2, %v4298_v44  ;;  %v811_v44 = vrot.slane %v4384_v51, 1 }
 0x12b   : > { %3263 = vmatpush3.bf16.msra.mxu0 %v2346_v55  ;;  %3242 = vmatprep.mubr.msk.bf16.mxu0 %vm446_vm2, %v4321_v62 }
 0x12c   : > { %v812_v62 = vsel %vm787_vm3, %v4586_v29, %v811_v44 }
 0x130   : > { %3125 = vmatmul.mubr.msk.bf16.gmra.mrb[16].mxu1 %vm446_vm2, %v4591_v10 }
 0x131   : > { %3128 = vmatprep.mubr.msk.bf16.mxu1 %vm446_vm2, %v4595_v3 }
 0x132   : > { %3243 = vmatmul.mubr.msk.bf16.gmra.mrb[4].mxu0 %vm446_vm2, %v4332_v7  ;;  %v2053_v7 = vrot.slane %v2051_v22, 1 }
 0x133   : > { %3246 = vmatprep.mubr.msk.bf16.mxu0 %vm446_vm2, %v4367_v35  ;;  %v2055_v35 = vshrl.u32 %v4414_v31, 16 }
 0x134   : > { %v2054_v51 = vsel %vm345_vm1, %v4426_v39, %v2053_v7 }
 0x138   : > { %3129 = vmatmul.mubr.msk.bf16.gmra.mrb[20].mxu1 %vm446_vm2, %v812_v62 }
 0x139   : > { %3134 = vmatprep.mubr.msk.bf16.mxu1 %vm446_vm2, %v4203_v14  ;;  %v2065_v14 = vshll.u32 %v4556_v48, 16 }
 0x13a   : > { %3247 = vmatmul.mubr.msk.bf16.gmra.mrb[8].mxu0 %vm446_vm2, %v4371_v37  ;;  %v2060_v37 = vrot.slane %v2058_v27, 1 }
 0x13b   : > { %3250 = vmatprep.mubr.msk.bf16.mxu0 %vm446_vm2, %v4399_v19  ;;  %v4631_v19 = vpack.c.bf16 %v2895_v5, %v2895_v5  ;;  %v2067_v15 = vrot.slane %v2065_v14, 1  ;;  %v4716_v5 = vld [vmem:[#allocation7] ss:$0 sm:$0xff] }
 0x13c   : > { %v2064_v39 = vor.u32 %v2062_v60, %v2060_v37 }
 0x140   : > { %3135 = vmatmul.mubr.msk.bf16.vlgmr.msra.gmra.mrb[0].mxu1 %vm446_vm2, %v4215_v24  ;;  %v2057_v24 = vor.u32 %v2055_v35, %v2053_v7 }
 0x141   : > { %3289 = vmatpush3.bf16.msra.mxu1 %v4189_v4  ;;  %3138 = vmatprep.mubr.msk.bf16.mxu1 %vm446_vm2, %v4220_v30  ;;  %v2073_v4 = vshll.u32 %v4631_v19, 16  ;;  %v2068_v30 = vsel %vm345_vm1, %v2064_v39, %v2067_v15 }
 0x142   : > { %3251 = vmatmul.mubr.msk.bf16.gmra.mrb[12].mxu0 %vm446_vm2, %v4412_v26  ;;  %v2061_v8 = vsel %vm345_vm1, %v2057_v24, %v2060_v37  ;;  %v2071_v26 = vor.u32 %v2069_v56, %v2067_v15 }
 0x143   : > { %3254 = vmatprep.mubr.msk.bf16.mxu0 %vm446_vm2, %v2054_v51  ;;  %v2075_v18 = vrot.slane %v2073_v4, 1 }
 0x145   : > { %v2076_v40 = vsel %vm345_vm1, %v2071_v26, %v2075_v18 }
 0x148   : > { %3139 = vmatmul.mubr.msk.bf16.gmra.mrb[4].mxu1 %vm446_vm2, %v4231_v45  ;;  %v1286_v45 = vshrl.u32 %v4284_v33, 16 }
 0x149   : > { %3142 = vmatprep.mubr.msk.bf16.mxu1 %vm446_vm2, %v4252_v2  ;;  %v1289_v2 = vshll.u32 %v4422_v38, 16 }
 0x14a   : > { %3255 = vmatmul.mubr.msk.bf16.gmra.mrb[16].mxu0 %vm446_vm2, %v2061_v8 }
 0x14b   : > { %3258 = vmatprep.mubr.msk.bf16.mxu0 %vm446_vm2, %v2068_v30  ;;  %v1291_v9 = vrot.slane %v1289_v2, 1 }
 0x150   : > { %3143 = vmatmul.mubr.msk.bf16.gmra.mrb[8].mxu1 %vm446_vm2, %v4267_v17  ;;  %v1288_v17 = vor.u32 %v1286_v45, %v4307_v52  ;;  %v1302_v52 = vor.u32 %v1300_v20, %v1298_v34 }
 0x151   : > { %3146 = vmatprep.mubr.msk.bf16.mxu1 %vm446_vm2, %v4284_v33  ;;  %v1293_v33 = vshrl.u32 %v4422_v38, 16 }
 0x152   : > { %3259 = vmatmul.mubr.msk.bf16.gmra.mrb[20].mxu0 %vm446_vm2, %v2076_v40  ;;  %v1292_v12 = vsel %vm345_vm1, %v1288_v17, %v1291_v9  ;;  %v1306_v41 = vsel %vm345_vm1, %v1302_v52, %v1305_v36 }
 0x153   : > { %3264 = vmatprep.mubr.msk.bf16.mxu0 %vm446_vm2, %v4534_v16  ;;  %v1295_v57 = vor.u32 %v1293_v33, %v1291_v9  ;;  %v1314_v16 = vshrl.u32 %v4456_v6, 16 }
 0x155   : > { %v1299_v46 = vsel %vm345_vm1, %v1295_v57, %v1298_v34 }
 0x158   : > { %3147 = vmatmul.mubr.msk.bf16.gmra.mrb[12].mxu1 %vm446_vm2, %v4422_v38  ;;  %v2301_v38 = vrot.slane %v4414_v31, 1  ;;  %v1309_v31 = vor.u32 %v1307_v23, %v1305_v36 }
 0x159   : > { %3150 = vmatprep.mubr.msk.bf16.mxu1 %vm446_vm2, %v4437_v54  ;;  %v1310_v54 = vshll.u32 %v4456_v6, 16 }
 0x15a   : > { %3265 = vmatmul.mubr.msk.bf16.vlgmr.msra.gmra.mrb[0].mxu0 %vm446_vm2, %v4537_v0  ;;  %v1317_v0 = vshll.u32 %v4461_v61, 16  ;;  %v2302_v59 = vsel %vm787_vm3, %v4586_v29, %v2301_v38 }
 0x15b   : > { %3268 = vmatprep.mubr.msk.bf16.mxu0 %vm446_vm2, %v4554_v47  ;;  %v1312_v1 = vrot.slane %v1310_v54, 1 }
 0x15d   : > { %v1316_v13 = vor.u32 %v1314_v16, %v1312_v1  ;;  %v1313_v47 = vsel %vm345_vm1, %v1309_v31, %v1312_v1 }
 0x160   : > { %3151 = vmatmul.mubr.msk.bf16.gmra.mrb[16].mxu1 %vm446_vm2, %v4443_v50  ;;  %v1319_v50 = vrot.slane %v1317_v0, 1 }
 0x161   : > { %3154 = vmatprep.mubr.msk.bf16.mxu1 %vm446_vm2, %v4456_v6  ;;  %v2303_v6 = vrot.slane %v4539_v25, 1  ;;  %v1327_v25 = vrot.slane %v1325_v28, 1 }
 0x162   : > { %3269 = vmatmul.mubr.msk.bf16.gmra.mrb[4].mxu0 %vm446_vm2, %v4559_v43  ;;  %v1321_v43 = vshrl.u32 %v4461_v61, 16  ;;  %v1320_v42 = vsel %vm345_vm1, %v1316_v13, %v1319_v50 }
 0x163   : > { %3272 = vmatprep.mubr.msk.bf16.mxu0 %vm446_vm2, %v4572_v49  ;;  %v2304_v49 = vsel %vm787_vm3, %v2301_v38, %v2303_v6 }
 0x164   : > { %v1323_v55 = vor.u32 %v1321_v43, %v1319_v50 }
 0x166   : > { %v1328_v63 = vsel %vm345_vm1, %v1323_v55, %v1327_v25 }
 0x168   : > { %3155 = vmatmul.mubr.msk.bf16.gmra.mrb[20].mxu1 %vm446_vm2, %v4461_v61  ;;  %v2307_v61 = vrot.slane %v4631_v19, 1  ;;  %v4720_v19 = vld [vmem:[#allocation8] ss:$0 sm:$0xff] }
 0x169   : > { %3172 = vmatprep.mubr.msk.bf16.mxu1 %vm446_vm2, %v1292_v12 }
 0x16a   : > { %3273 = vmatmul.mubr.msk.bf16.gmra.mrb[8].mxu0 %vm446_vm2, %v4575_v58  ;;  %v2306_v58 = vsel %vm787_vm3, %v2303_v6, %v2305_v32  ;;  %v2308_v48 = vsel %vm787_vm3, %v2305_v32, %v2307_v61 }
 0x16b   : > { %3276 = vmatprep.mubr.msk.bf16.mxu0 %vm446_vm2, %v4591_v10 }
 0x170   : > { %3173 = vmatmul.mubr.msk.bf16.vlgmr.msra.gmra.mrb[12].mxu1 %vm446_vm2, %v1299_v46 }
 0x171   : > { %3176 = vmatprep.mubr.msk.bf16.mxu1 %vm446_vm2, %v1306_v41 }
 0x172   : > { %3277 = vmatmul.mubr.msk.bf16.gmra.mrb[12].mxu0 %vm446_vm2, %v4595_v3 }
 0x173   : > { %3280 = vmatprep.mubr.msk.bf16.mxu0 %vm446_vm2, %v2302_v59 }
 0x178   : > { %3177 = vmatmul.mubr.msk.bf16.gmra.mrb[16].mxu1 %vm446_vm2, %v1313_v47 }
 0x179   : > { %3180 = vmatprep.mubr.msk.bf16.mxu1 %vm446_vm2, %v1320_v42 }
 0x17a   : > { %3281 = vmatmul.mubr.msk.bf16.gmra.mrb[16].mxu0 %vm446_vm2, %v2304_v49 }
 0x17b   : > { %3284 = vmatprep.mubr.msk.bf16.mxu0 %vm446_vm2, %v2306_v58 }
 0x180   : > { %3181 = vmatmul.mubr.msk.bf16.gmra.mrb[20].mxu1 %vm446_vm2, %v1328_v63 }
 0x182   : > { %3285 = vmatmul.mubr.msk.bf16.gmra.mrb[20].mxu0 %vm446_vm2, %v2308_v48 }
 0x213   : > { %v3136_v53 = vpop.f32.mrb[0].mxu1 }
 0x214   : > { %v1119_v29 = vpop.f32.mrb[1].mxu1 }
 0x215   : > { %v3137_v10 = vpop.f32.mrb[2].mxu1 }
 0x216   : > { %v1122_v3 = vpop.f32.mrb[3].mxu1 }
 0x21b   : > { %v3140_v44 = vpop.f32.mrb[4].mxu1 }
 0x21c   : > { %v1135_v62 = vpop.f32.mrb[5].mxu1 }
 0x21d   : > { %v3141_v22 = vpop.f32.mrb[6].mxu1 }
 0x21e   : > { %v1138_v7 = vpop.f32.mrb[7].mxu1 }
 0x223   : > { %v3144_v27 = vpop.f32.mrb[8].mxu1 }
 0x224   : > { %v1151_v35 = vpop.f32.mrb[9].mxu1 }
 0x225   : > { %v3145_v51 = vpop.f32.mrb[10].mxu1 }
 0x226   : > { %v4713_v60 = vpop.f32.mrb[11].mxu1 }
 0x22d   : > { %v3266_v14 = vpop.f32.mrb[0].mxu0 }
 0x22e   : > { %v3290_v37 = vadd.f32 %v3266_v14, %v3136_v53  ;;  %v2382_v24 = vpop.f32.mrb[1].mxu0 }
 0x22f   : > { %v3291_v39 = vadd.f32 %v2382_v24, %v1119_v29  ;;  %v3267_v15 = vpop.f32.mrb[2].mxu0 }
 0x230   : > { %v2510_v8 = vmul.f32 %v3290_v37, %v4716_v5  ;;  %v3292_v56 = vadd.f32 %v3267_v15, %v3137_v10  ;;  %v2385_v4 = vpop.f32.mrb[3].mxu0 }
 0x231   : > { %v2508_v30 = vmul.f32 %v3291_v39, %v4716_v5  ;;  %v3293_v26 = vadd.f32 %v2385_v4, %v1122_v3 }
 0x232   : > { %v2541_v18 = vadd.f32 %v4720_v19, %v2510_v8  ;;  %v2511_v40 = vmul.f32 %v3292_v56, %v4716_v5 }
 0x233   : > { %v2539_v45 = vadd.f32 %v4720_v19, %v2508_v30  ;;  %v2509_v2 = vmul.f32 %v3293_v26, %v4716_v5 }
 0x234   : > { %v2565_v17 = vmax.f32 %v2541_v18, 0.0  ;;  %v2542_v9 = vadd.f32 %v4720_v19, %v2511_v40 }
 0x235   : > { %v2563_v11 = vmax.f32 %v2539_v45, 0.0  ;;  %v2540_v33 = vadd.f32 %v4720_v19, %v2509_v2  ;;  %v3270_v12 = vpop.f32.mrb[4].mxu0 }
 0x236   : > { %2589 = vst [vmem:[%s4730_s4 + $0x10] sm:$0xff] %v2565_v17  ;;  %v2566_v20 = vmax.f32 %v2542_v9, 0.0  ;;  %v3294_v21 = vadd.f32 %v3270_v12, %v3140_v44  ;;  %v2398_v34 = vpop.f32.mrb[5].mxu0 }
 0x237   : > { %2587 = vst [vmem:[%s4730_s4] sm:$0xff] %v2563_v11  ;;  %v2564_v57 = vmax.f32 %v2540_v33, 0.0  ;;  %v3295_v52 = vadd.f32 %v2398_v34, %v1135_v62  ;;  %v3271_v36 = vpop.f32.mrb[6].mxu0 }
 0x238   : > { %2590 = vst [vmem:[%s4730_s4 + $0x18] sm:$0xff] %v2566_v20  ;;  %v2514_v38 = vmul.f32 %v3294_v21, %v4716_v5  ;;  %v3296_v54 = vadd.f32 %v3271_v36, %v3141_v22  ;;  %v2401_v46 = vpop.f32.mrb[7].mxu0 }
 0x239   : > { %2588 = vst [vmem:[%s4730_s4 + $0x8] sm:$0xff] %v2564_v57  ;;  %v2512_v23 = vmul.f32 %v3295_v52, %v4716_v5  ;;  %v3297_v41 = vadd.f32 %v2401_v46, %v1138_v7 }
 0x23a   : > { %v2545_v16 = vadd.f32 %v4720_v19, %v2514_v38  ;;  %v2515_v0 = vmul.f32 %v3296_v54, %v4716_v5 }
 0x23b   : > { %v2543_v59 = vadd.f32 %v4720_v19, %v2512_v23  ;;  %v2513_v1 = vmul.f32 %v3297_v41, %v4716_v5 }
 0x23c   : > { %v2569_v31 = vmax.f32 %v2545_v16, 0.0  ;;  %v2546_v13 = vadd.f32 %v4720_v19, %v2515_v0 }
 0x23d   : > { %v2567_v50 = vmax.f32 %v2543_v59, 0.0  ;;  %v2544_v6 = vadd.f32 %v4720_v19, %v2513_v1  ;;  %v3274_v32 = vpop.f32.mrb[8].mxu0 }
 0x23e   : > { %2593 = vst [vmem:[%s4730_s4 + $0x30] sm:$0xff] %v2569_v31  ;;  %v2570_v47 = vmax.f32 %v2546_v13, 0.0  ;;  %v3298_v43 = vadd.f32 %v3274_v32, %v3144_v27  ;;  %v2414_v28 = vpop.f32.mrb[9].mxu0 }
 0x23f   : > { %2591 = vst [vmem:[%s4730_s4 + $0x20] sm:$0xff] %v2567_v50  ;;  %v2568_v42 = vmax.f32 %v2544_v6, 0.0  ;;  %v3299_v49 = vadd.f32 %v2414_v28, %v1151_v35  ;;  %v3275_v58 = vpop.f32.mrb[10].mxu0 }
 0x240   : > { %2594 = vst [vmem:[%s4730_s4 + $0x38] sm:$0xff] %v2570_v47  ;;  %v2518_v55 = vmul.f32 %v3298_v43, %v4716_v5  ;;  %v3300_v25 = vadd.f32 %v3275_v58, %v3145_v51  ;;  %v2417_v61 = vpop.f32.mrb[11].mxu0 }
 0x241   : > { %2592 = vst [vmem:[%s4730_s4 + $0x28] sm:$0xff] %v2568_v42  ;;  %v2516_v63 = vmul.f32 %v3299_v49, %v4716_v5  ;;  %v3301_v48 = vadd.f32 %v2417_v61, %v4713_v60 }
 0x242   : > { %v2549_v53 = vadd.f32 %v4720_v19, %v2518_v55  ;;  %v2519_v29 = vmul.f32 %v3300_v25, %v4716_v5 }
 0x243   : > { %v2547_v10 = vadd.f32 %v4720_v19, %v2516_v63  ;;  %v2517_v3 = vmul.f32 %v3301_v48, %v4716_v5  ;;  %v3174_v44 = vpop.f32.mrb[12].mxu1 }
 0x244   : > { %v2573_v62 = vmax.f32 %v2549_v53, 0.0  ;;  %v2550_v22 = vadd.f32 %v4720_v19, %v2519_v29  ;;  %v1450_v7 = vpop.f32.mrb[13].mxu1 }
 0x245   : > { %v2571_v27 = vmax.f32 %v2547_v10, 0.0  ;;  %v2548_v35 = vadd.f32 %v4720_v19, %v2517_v3  ;;  %v3278_v51 = vpop.f32.mrb[12].mxu0  ;;  %v3175_v60 = vpop.f32.mrb[14].mxu1 }
 0x246   : > { %2597 = vst [vmem:[%s4730_s4 + $0x50] sm:$0xff] %v2573_v62  ;;  %v2574_v14 = vmax.f32 %v2550_v22, 0.0  ;;  %v3302_v37 = vadd.f32 %v3278_v51, %v3174_v44  ;;  %v2430_v24 = vpop.f32.mrb[13].mxu0  ;;  %v1453_v39 = vpop.f32.mrb[15].mxu1 }
 0x247   : > { %2595 = vst [vmem:[%s4730_s4 + $0x40] sm:$0xff] %v2571_v27  ;;  %v2572_v15 = vmax.f32 %v2548_v35, 0.0  ;;  %v3303_v8 = vadd.f32 %v2430_v24, %v1450_v7  ;;  %v3279_v56 = vpop.f32.mrb[14].mxu0 }
 0x248   : > { %2598 = vst [vmem:[%s4730_s4 + $0x58] sm:$0xff] %v2574_v14  ;;  %v2522_v4 = vmul.f32 %v3302_v37, %v4716_v5  ;;  %v3304_v30 = vadd.f32 %v3279_v56, %v3175_v60  ;;  %v2433_v26 = vpop.f32.mrb[15].mxu0 }
 0x249   : > { %2596 = vst [vmem:[%s4730_s4 + $0x48] sm:$0xff] %v2572_v15  ;;  %v2520_v18 = vmul.f32 %v3303_v8, %v4716_v5  ;;  %v3305_v40 = vadd.f32 %v2433_v26, %v1453_v39 }
 0x24a   : > { %v2553_v45 = vadd.f32 %v4720_v19, %v2522_v4  ;;  %v2523_v2 = vmul.f32 %v3304_v30, %v4716_v5 }
 0x24b   : > { %v2551_v17 = vadd.f32 %v4720_v19, %v2520_v18  ;;  %v2521_v9 = vmul.f32 %v3305_v40, %v4716_v5  ;;  %v3178_v11 = vpop.f32.mrb[16].mxu1 }
 0x24c   : > { %v2577_v33 = vmax.f32 %v2553_v45, 0.0  ;;  %v2554_v12 = vadd.f32 %v4720_v19, %v2523_v2  ;;  %v1466_v20 = vpop.f32.mrb[17].mxu1 }
 0x24d   : > { %v2575_v21 = vmax.f32 %v2551_v17, 0.0  ;;  %v2552_v34 = vadd.f32 %v4720_v19, %v2521_v9  ;;  %v3282_v57 = vpop.f32.mrb[16].mxu0  ;;  %v3179_v52 = vpop.f32.mrb[18].mxu1 }
 0x24e   : > { %2601 = vst [vmem:[%s4730_s4 + $0x70] sm:$0xff] %v2577_v33  ;;  %v2578_v36 = vmax.f32 %v2554_v12, 0.0  ;;  %v3306_v38 = vadd.f32 %v3282_v57, %v3178_v11  ;;  %v2446_v54 = vpop.f32.mrb[17].mxu0  ;;  %v1469_v46 = vpop.f32.mrb[19].mxu1 }
 0x24f   : > { %2599 = vst [vmem:[%s4730_s4 + $0x60] sm:$0xff] %v2575_v21  ;;  %v2576_v23 = vmax.f32 %v2552_v34, 0.0  ;;  %v3307_v41 = vadd.f32 %v2446_v54, %v1466_v20  ;;  %v3283_v16 = vpop.f32.mrb[18].mxu0 }
 0x250   : > { %2602 = vst [vmem:[%s4730_s4 + $0x78] sm:$0xff] %v2578_v36  ;;  %v2526_v0 = vmul.f32 %v3306_v38, %v4716_v5  ;;  %v3308_v59 = vadd.f32 %v3283_v16, %v3179_v52  ;;  %v2449_v1 = vpop.f32.mrb[19].mxu0 }
 0x251   : > { %2600 = vst [vmem:[%s4730_s4 + $0x68] sm:$0xff] %v2576_v23  ;;  %v2524_v31 = vmul.f32 %v3307_v41, %v4716_v5  ;;  %v3309_v13 = vadd.f32 %v2449_v1, %v1469_v46 }
 0x252   : > { %v2557_v50 = vadd.f32 %v4720_v19, %v2526_v0  ;;  %v2527_v6 = vmul.f32 %v3308_v59, %v4716_v5 }
 0x253   : > { %v2555_v32 = vadd.f32 %v4720_v19, %v2524_v31  ;;  %v2525_v47 = vmul.f32 %v3309_v13, %v4716_v5  ;;  %v3182_v43 = vpop.f32.mrb[20].mxu1 }
 0x254   : > { %v2581_v28 = vmax.f32 %v2557_v50, 0.0  ;;  %v2558_v42 = vadd.f32 %v4720_v19, %v2527_v6  ;;  %v1482_v49 = vpop.f32.mrb[21].mxu1 }
 0x255   : > { %v2579_v58 = vmax.f32 %v2555_v32, 0.0  ;;  %v2556_v55 = vadd.f32 %v4720_v19, %v2525_v47  ;;  %v3286_v25 = vpop.f32.mrb[20].mxu0  ;;  %v3183_v61 = vpop.f32.mrb[22].mxu1 }
 0x256   : > { %2605 = vst [vmem:[%s4730_s4 + $0x90] sm:$0xff] %v2581_v28  ;;  %v2582_v63 = vmax.f32 %v2558_v42, 0.0  ;;  %v3310_v48 = vadd.f32 %v3286_v25, %v3182_v43  ;;  %v2462_v53 = vpop.f32.mrb[21].mxu0  ;;  %v1485_v29 = vpop.f32.mrb[23].mxu1 }
 0x257   : > { %2603 = vst [vmem:[%s4730_s4 + $0x80] sm:$0xff] %v2579_v58  ;;  %v2580_v10 = vmax.f32 %v2556_v55, 0.0  ;;  %v3311_v3 = vadd.f32 %v2462_v53, %v1482_v49  ;;  %v3287_v44 = vpop.f32.mrb[22].mxu0 }
 0x258   : > { %2606 = vst [vmem:[%s4730_s4 + $0x98] sm:$0xff] %v2582_v63  ;;  %v2530_v62 = vmul.f32 %v3310_v48, %v4716_v5  ;;  %v3312_v22 = vadd.f32 %v3287_v44, %v3183_v61  ;;  %v2465_v7 = vpop.f32.mrb[23].mxu0 }
 0x259   : > { %2604 = vst [vmem:[%s4730_s4 + $0x88] sm:$0xff] %v2580_v10  ;;  %v2528_v27 = vmul.f32 %v3311_v3, %v4716_v5  ;;  %v3313_v35 = vadd.f32 %v2465_v7, %v1485_v29 }
 0x25a   : > { %v2561_v51 = vadd.f32 %v4720_v19, %v2530_v62  ;;  %v2531_v60 = vmul.f32 %v3312_v22, %v4716_v5 }
 0x25b   : > { %v2559_v14 = vadd.f32 %v4720_v19, %v2528_v27  ;;  %v2529_v37 = vmul.f32 %v3313_v35, %v4716_v5 }
 0x25c   : > { %v2585_v24 = vmax.f32 %v2561_v51, 0.0  ;;  %v2562_v39 = vadd.f32 %v4720_v19, %v2531_v60 }
 0x25d   : > { %v2583_v15 = vmax.f32 %v2559_v14, 0.0  ;;  %v2560_v8 = vadd.f32 %v4720_v19, %v2529_v37 }
 0x25e   : > { %2609 = vst [vmem:[%s4730_s4 + $0xb0] sm:$0xff] %v2585_v24  ;;  %v2586_v56 = vmax.f32 %v2562_v39, 0.0 }
 0x25f   : > { %2607 = vst [vmem:[%s4730_s4 + $0xa0] sm:$0xff] %v2583_v15  ;;  %v2584_v5 = vmax.f32 %v2560_v8, 0.0 }
 0x260   : > { %2610 = vst [vmem:[%s4730_s4 + $0xb8] sm:$0xff] %v2586_v56 }
 0x261   : > { %2608 = vst [vmem:[%s4730_s4 + $0xa8] sm:$0xff] %v2584_v5 }
 0x262   : > { %3763 = shalt.err (!%p3760_p12)
}
 0x263   : > { %s3764_s28 = scalar_lea.hbm %s4800_s27, 3072  ;;  %s3768_s5 = scalar_lea.hbm %s4910_s14, 12288 }
 0x264   : > { %p3765_p4 = scmp.ne.s32.totalorder %s4800_s27, %s3764_s28  ;;  %p3769_p0 = scmp.lt.u32.totalorder %s4800_s27, %s4910_s14 }
 0x265   : > { %p3770_p1 = scmp.lt.u32.totalorder %s3768_s5, %s3764_s28  ;;  %p3772_p10 = scmp.lt.u32.totalorder %s3764_s28, %s4800_s27 }
 0x266   : > { %p3766_p7 = pnand %p3765_p4, %p4911_p2 }
 0x267   : > { %p3771_p11 = por %p3770_p1, %p3769_p0 }
 0x268   : > { %p3767_p3 = pneg %p3766_p7 }
 0x269   : > { %p3773_p9 = por %p3772_p10, %p3771_p11 }
 0x26b   : > { %p3774_p5 = pnand %p3773_p9, %p3767_p3 }
 0x26d   : > { %3777 = shalt.err (!%p3774_p5)
}
 0x26e   : > { %s3891_s26 = smov 128   ;;  %s3892_s1 = smov 8  }
 0x26f   : > { %3511 = dma.vmem_to_hbm [thread:$0]  (%p4911_p2), %s4802_s12, 3072, %s4800_s27, %s4809_s8, %s3891_s26, %s3891_s26, %s3892_s1  }
 0x270 PF: > { %s4912_s18 = sld [smem:[#allocation15_spill]]  ;;  %s4913_s2 = sld [smem:[#allocation18_spill]] }
 0x271   : > { %p3538_p13 = scmp.ge.s32.totalorder %s3880_s25, 2 }
 0x276   : > { %s2643_s7 = sand.u32 1, %s4912_s18   ;;  %p4914_p6 = scmp.ne.s32.totalorder %s4913_s2, 0 }
 0x277   : > { %s2644_s30 = scalar_lea.sflag [#allocation4], %s2643_s7 }
 0x278   : > { %p3528_p8 = pnand %p3538_p13, %p4914_p6 }
 0x27a   : > { %3835 = dma.done.wait (!%p3528_p8), %s2644_s30, 3072  }
 0x27b   : > { %3837 = vsyncadd (!%p3528_p8), %s2644_s30, 4294964224  ;;  %s22_s25 = sadd.s32 1, %s3880_s25   ;;  %s4915_s12 = smov %s4931_s15 }
 0x27c   : > { %p19_p12 = scmp.ge.s32.totalorder %s22_s25, 6   ;;  %s4916_s15 = smov %s3844_s16 }
 0x27d   : > { %s4917_s16 = smov %s3848_s17  ;;  %s4918_s17 = smov %s4117_s29 }
 0x27e   : > { %s4919_s18 = smov %s3856_s19  ;;  %s4920_s19 = smov %s3860_s20 }
 0x27f   : > { %s4921_s20 = smov %s4112_s11  ;;  %s4922_s21 = smov %s3872_s23 }
 0x280   : > { %s4923_s22 = smov %s3876_s24  ;;  %s4924_s23 = smov %s4927_s6 }
 0x281   : > { %s4925_s24 = smov %s4915_s12  ;;  %21 = sbr.rel (!%p19_p12) target bundleno = 15 (0xf), region = 107 }
 0x288   :  { %2649 = vsyncpa [#allocation3], 1 }
 0x289   :  { %2651 = vsyncpa [#allocation3 + $0x1], 1 }
 0x28a   :  { %2652 = vsyncpa [#allocation6], 1 }
 0x28b   :  { %2653 = vsyncpa [#allocation9], 1 }
 0x28c   :  { %2654 = vsyncpa [#allocation4], 1 }
 0x28d   :  { %2656 = vsyncpa [#allocation4 + $0x1], 1 }

</bundles_post_ra>
